<compile_context>
chip_gen: v6e
topology: v6e:2x2x1
jax: 0.10.0
libtpu: 0.0.40
codegen_flags: <defaults>
</compile_context>

<pallas_src>
import functools

import jax
import jax.numpy as jnp
import numpy as np
from jax.experimental import pallas as pl
from jax.experimental.pallas import tpu as pltpu


_TI_PREF = 512    # i-tile (sublanes); multiple of 128 (>= int8 sublane tile 32)
_TJ_PREF = 1024   # j-tile (lanes);    multiple of 128 -> unmasked, lane-dense stores


def _bvh_tile_kernel(feat_i_ref, feat_j_ref, o_ref, *, n_faces):
    # feat_i_ref: [1, TI, 16] row layout:    [mn_xyz(3), mx_xyz(3), v0 v1 v2 (9), pad]
    # feat_j_ref: [1, 16, TJ] column layout, same field order along dim 1.
    # o_ref     : [1, TI, TJ] int8 candidate-collision tile.
    tile_i = o_ref.shape[1]
    tile_j = o_ref.shape[2]
    i0 = pl.program_id(1) * tile_i
    j0 = pl.program_id(2) * tile_j

    # Tile intersects the strict i < j region iff its smallest row index is
    # below its largest column index.
    upper = i0 < j0 + tile_j

    @pl.when(upper)
    def _compute():
        fi = feat_i_ref[0]            # [TI, 16]
        fj = feat_j_ref[0]            # [16, TJ]

        # Pairwise AABB overlap, per axis c: mn_i[c] <= mx_j[c] & mn_j[c] <= mx_i[c].
        ov = (fi[:, 0:1] <= fj[3:4, :]) & (fj[0:1, :] <= fi[:, 3:4])
        ov &= (fi[:, 1:2] <= fj[4:5, :]) & (fj[1:2, :] <= fi[:, 4:5])
        ov &= (fi[:, 2:3] <= fj[5:6, :]) & (fj[2:3, :] <= fi[:, 5:6])

        # Shared-vertex filter: exact coordinate equality for any of the 3x3
        # vertex pairs. Slices hoisted out of the double loop.
        vi = [fi[:, 6 + c:7 + c] for c in range(9)]     # 9 x [TI, 1]
        vj = [fj[6 + c:7 + c, :] for c in range(9)]     # 9 x [1, TJ]
        share = None
        for a in range(3):
            for b in range(3):
                eq = vi[3 * a] == vj[3 * b]
                eq &= vi[3 * a + 1] == vj[3 * b + 1]
                eq &= vi[3 * a + 2] == vj[3 * b + 2]
                share = eq if share is None else (share | eq)

        cand = ov & jnp.logical_not(share)

        # Interior tiles: strictly above the diagonal (every row < every col)
        # and no padded columns -> no per-element index masking needed at all
        # (padded rows cannot occur in such tiles either).
        interior = jnp.logical_and(i0 + tile_i <= j0, j0 + tile_j <= n_faces)

        @pl.when(interior)
        def _fast():
            o_ref[0] = cand.astype(jnp.int8)

        @pl.when(jnp.logical_not(interior))
        def _edge():
            row_g = i0 + jax.lax.broadcasted_iota(jnp.int32, (tile_i, tile_j), 0)
            col_g = j0 + jax.lax.broadcasted_iota(jnp.int32, (tile_i, tile_j), 1)
            keep = cand & (row_g < col_g) & (col_g < n_faces)
            o_ref[0] = keep.astype(jnp.int8)

    @pl.when(jnp.logical_not(upper))
    def _skip():
        o_ref[0] = jnp.zeros((tile_i, tile_j), jnp.int8)


def _pick_tile(padded, pref):
    t = min(pref, padded)
    while padded % t != 0:
        t //= 2
    # Floors: TI must stay a multiple of 32 (int8 sublane tile), TJ a multiple
    # of 128 (lane-dense stores). Fp is a multiple of 128, so 128 always works.
    assert t >= 128 and t % 128 == 0, (padded, pref, t)
    return t


def _pairwise_candidates(triangles):
    """triangles [B, F, 3, 3] f32 -> [B, Fp, Fp] int8 candidate matrix.

    Fp = F rounded up to a multiple of 128 (lane-dense output tiles); padded
    rows/cols are guaranteed zero (masked / skipped in-kernel).
    """
    B, F = triangles.shape[0], triangles.shape[1]
    Fp = ((F + 127) // 128) * 128

    # O(F) precompute, fused by XLA: per-triangle AABB + raw verts in one
    # 16-wide feature vector, in both row and column layouts.
    tri_row = triangles.reshape(B, F, 9)
    mn = triangles.min(axis=2)                                   # [B, F, 3]
    mx = triangles.max(axis=2)                                   # [B, F, 3]
    pad_col = jnp.zeros((B, F, 1), triangles.dtype)
    feat = jnp.concatenate([mn, mx, tri_row, pad_col], axis=-1)  # [B, F, 16]
    if Fp != F:
        feat = jnp.pad(feat, ((0, 0), (0, Fp - F), (0, 0)))
    feat_row = feat                                              # [B, Fp, 16]
    feat_col = jnp.transpose(feat, (0, 2, 1))                    # [B, 16, Fp]

    tile_i = _pick_tile(Fp, _TI_PREF)
    tile_j = _pick_tile(Fp, _TJ_PREF)
    grid = (B, Fp // tile_i, Fp // tile_j)   # j innermost: i-side block reused

    kernel = functools.partial(_bvh_tile_kernel, n_faces=F)
    return pl.pallas_call(
        kernel,
        out_shape=jax.ShapeDtypeStruct((B, Fp, Fp), jnp.int8),
        grid_spec=pltpu.PrefetchScalarGridSpec(
            num_scalar_prefetch=0,
            grid=grid,
            in_specs=[
                pl.BlockSpec((1, tile_i, 16), lambda b, i, j: (b, i, 0)),
                pl.BlockSpec((1, 16, tile_j), lambda b, i, j: (b, 0, j)),
            ],
            out_specs=pl.BlockSpec((1, tile_i, tile_j), lambda b, i, j: (b, i, j)),
        ),
        compiler_params=pltpu.CompilerParams(
            dimension_semantics=("parallel", "parallel", "arbitrary"),
            vmem_limit_bytes=32 * 1024 * 1024,   # v7x-safe cap; fits 512x1024 tiles
        ),
    )(feat_row, feat_col)


def bvh_forward(triangles, max_collisions=8):
    """BVH.forward equivalent.

    triangles: [B, F, 3, 3] float32
    returns  : [B, F * max_collisions, 2] int32, padded with -1.
    """
    B, F = triangles.shape[0], triangles.shape[1]
    K = F * max_collisions

    mask = _pairwise_candidates(triangles)          # [B, Fp, Fp] int8
    Fp = mask.shape[1]
    N = Fp * Fp

    # Compaction (row-major == lexicographic (i, j) order): within-row inclusive
    # cumsum gives the slot inside the row; an O(F) exclusive scan of per-row
    # counts gives the row's base offset. No arange over Fp^2, so no int32
    # overflow until the *total* candidate count itself exceeds int32.
    m_set = mask > 0
    cs = jnp.cumsum(mask.astype(jnp.int32), axis=-1)             # [B, Fp, Fp]
    row_counts = cs[..., -1]                                     # [B, Fp]
    row_off = jnp.cumsum(row_counts, axis=-1) - row_counts       # exclusive scan
    dst = row_off[:, :, None] + (cs - 1)                         # output slot
    keep = m_set & (dst < K)
    dst = jnp.where(keep, dst, K).reshape(B, N)                  # overflow -> slot K

    i_grid = jax.lax.broadcasted_iota(jnp.int32, (Fp, Fp), 0).reshape(N)
    j_grid = jax.lax.broadcasted_iota(jnp.int32, (Fp, Fp), 1).reshape(N)
    batch_ix = jnp.arange(B, dtype=jnp.int32)[:, None]
    base = jnp.full((B, K + 1), -1, jnp.int32)
    out_i = base.at[batch_ix, dst].set(jnp.broadcast_to(i_grid, (B, N)))[:, :K]
    out_j = base.at[batch_ix, dst].set(jnp.broadcast_to(j_grid, (B, N)))[:, :K]
    return jnp.stack([out_i, out_j], axis=-1)       # [B, K, 2]


def _reference_pairs(triangles, max_collisions):
    """Pure-numpy reference with identical semantics (small shapes only)."""
    tri = np.asarray(triangles, dtype=np.float32)
    B, F = tri.shape[0], tri.shape[1]
    K = F * max_collisions
    out = np.full((B, K, 2), -1, np.int32)
    v = tri.reshape(B, F, 3, 3)
    mn = v.min(axis=2)
    mx = v.max(axis=2)
    for b in range(B):
        cnt = 0
        for i in range(F):
            for j in range(i + 1, F):
                if not (np.all(mn[b, i] <= mx[b, j]) and np.all(mn[b, j] <= mx[b, i])):
                    continue
                share = any(np.all(v[b, i, a] == v[b, j, c])
                            for a in range(3) for c in range(3))
                if share:
                    continue
                if cnt < K:
                    out[b, cnt] = (i, j)
                    cnt += 1
    return out


if __name__ == "__main__":
    MAX_COLLISIONS = 8
    B, F = 2, 64

    key = jax.random.PRNGKey(0)
    k_center, k_offset = jax.random.split(key)
    # Triangle soup: random centers + small vertex offsets so some AABBs overlap.
    centers = jax.random.uniform(k_center, (B, F, 1, 3), dtype=jnp.float32)
    offsets = 0.05 * jax.random.normal(k_offset, (B, F, 3, 3), dtype=jnp.float32)
    triangles = centers + offsets                    # [B, F, 3, 3]

    out = jax.jit(lambda t: bvh_forward(t, MAX_COLLISIONS))(triangles)
    out = jax.block_until_ready(out)

    assert out.shape == (B, F * MAX_COLLISIONS, 2), out.shape
    assert out.dtype == jnp.int32

    ref = _reference_pairs(triangles, MAX_COLLISIONS)
    assert np.array_equal(np.asarray(out), ref), "mismatch vs. numpy reference"

    print("KERNEL_OK")
</pallas_src>

<mosaic_0001>
module attributes {stable_mosaic.version = 11 : i64} {
  func.func @_bvh_tile_kernel(%arg0: i32, %arg1: i32, %arg2: i32, %arg3: memref<1x128x16xf32, #tpu.memory_space<vmem>>, %arg4: memref<1x16x128xf32, #tpu.memory_space<vmem>>, %arg5: memref<1x128x128xi8, #tpu.memory_space<vmem>>) attributes {dimension_semantics = [#tpu.dimension_semantics<parallel>, #tpu.dimension_semantics<parallel>, #tpu.dimension_semantics<arbitrary>], iteration_bounds = array<i64: 2, 1, 1>, scalar_prefetch = 0 : i64, scratch_operands = 0 : i64, tpu.core_type = #tpu.core_type<tc>, window_params = [{transform_indices = @transform_0, window_bounds = array<i64: 1, 128, 16>}, {transform_indices = @transform_1, window_bounds = array<i64: 1, 16, 128>}, {transform_indices = @transform_2, window_bounds = array<i64: 1, 128, 128>}]} {
    %c128_i32 = arith.constant 128 : i32
    %0 = arith.muli %arg1, %c128_i32 : i32
    %c128_i32_0 = arith.constant 128 : i32
    %1 = arith.muli %arg2, %c128_i32_0 : i32
    %c128_i32_1 = arith.constant 128 : i32
    %2 = arith.addi %1, %c128_i32_1 : i32
    %3 = arith.cmpi slt, %0, %2 : i32
    %4 = arith.extui %3 : i1 to i32
    %c0_i32 = arith.constant 0 : i32
    %5 = arith.cmpi ne, %4, %c0_i32 : i32
    scf.if %5 {
      %c0 = arith.constant 0 : index
      %c0_3 = arith.constant 0 : index
      %c0_4 = arith.constant 0 : index
      %9 = vector.load %arg3[%c0, %c0_3, %c0_4] : memref<1x128x16xf32, #tpu.memory_space<vmem>>, vector<1x128x16xf32>
      %10 = vector.shape_cast %9 : vector<1x128x16xf32> to vector<128x16xf32>
      %c0_5 = arith.constant 0 : index
      %c0_6 = arith.constant 0 : index
      %c0_7 = arith.constant 0 : index
      %11 = vector.load %arg4[%c0_5, %c0_6, %c0_7] : memref<1x16x128xf32, #tpu.memory_space<vmem>>, vector<1x16x128xf32>
      %12 = vector.shape_cast %11 : vector<1x16x128xf32> to vector<16x128xf32>
      %13 = vector.extract_strided_slice %10 {offsets = [0, 0], sizes = [128, 1], strides = [1, 1]} : vector<128x16xf32> to vector<128x1xf32>
      %14 = vector.extract_strided_slice %12 {offsets = [3, 0], sizes = [1, 128], strides = [1, 1]} : vector<16x128xf32> to vector<1x128xf32>
      %15 = vector.broadcast %13 : vector<128x1xf32> to vector<128x128xf32>
      %16 = vector.broadcast %14 : vector<1x128xf32> to vector<128x128xf32>
      %17 = arith.cmpf ole, %15, %16 : vector<128x128xf32>
      %18 = vector.extract_strided_slice %12 {offsets = [0, 0], sizes = [1, 128], strides = [1, 1]} : vector<16x128xf32> to vector<1x128xf32>
      %19 = vector.extract_strided_slice %10 {offsets = [0, 3], sizes = [128, 1], strides = [1, 1]} : vector<128x16xf32> to vector<128x1xf32>
      %20 = vector.broadcast %18 : vector<1x128xf32> to vector<128x128xf32>
      %21 = vector.broadcast %19 : vector<128x1xf32> to vector<128x128xf32>
      %22 = arith.cmpf ole, %20, %21 : vector<128x128xf32>
      %23 = arith.andi %17, %22 : vector<128x128xi1>
      %24 = vector.extract_strided_slice %10 {offsets = [0, 1], sizes = [128, 1], strides = [1, 1]} : vector<128x16xf32> to vector<128x1xf32>
      %25 = vector.extract_strided_slice %12 {offsets = [4, 0], sizes = [1, 128], strides = [1, 1]} : vector<16x128xf32> to vector<1x128xf32>
      %26 = vector.broadcast %24 : vector<128x1xf32> to vector<128x128xf32>
      %27 = vector.broadcast %25 : vector<1x128xf32> to vector<128x128xf32>
      %28 = arith.cmpf ole, %26, %27 : vector<128x128xf32>
      %29 = vector.extract_strided_slice %12 {offsets = [1, 0], sizes = [1, 128], strides = [1, 1]} : vector<16x128xf32> to vector<1x128xf32>
      %30 = vector.extract_strided_slice %10 {offsets = [0, 4], sizes = [128, 1], strides = [1, 1]} : vector<128x16xf32> to vector<128x1xf32>
      %31 = vector.broadcast %29 : vector<1x128xf32> to vector<128x128xf32>
      %32 = vector.broadcast %30 : vector<128x1xf32> to vector<128x128xf32>
      %33 = arith.cmpf ole, %31, %32 : vector<128x128xf32>
      %34 = arith.andi %28, %33 : vector<128x128xi1>
      %35 = arith.andi %23, %34 : vector<128x128xi1>
      %36 = vector.extract_strided_slice %10 {offsets = [0, 2], sizes = [128, 1], strides = [1, 1]} : vector<128x16xf32> to vector<128x1xf32>
      %37 = vector.extract_strided_slice %12 {offsets = [5, 0], sizes = [1, 128], strides = [1, 1]} : vector<16x128xf32> to vector<1x128xf32>
      %38 = vector.broadcast %36 : vector<128x1xf32> to vector<128x128xf32>
      %39 = vector.broadcast %37 : vector<1x128xf32> to vector<128x128xf32>
      %40 = arith.cmpf ole, %38, %39 : vector<128x128xf32>
      %41 = vector.extract_strided_slice %12 {offsets = [2, 0], sizes = [1, 128], strides = [1, 1]} : vector<16x128xf32> to vector<1x128xf32>
      %42 = vector.extract_strided_slice %10 {offsets = [0, 5], sizes = [128, 1], strides = [1, 1]} : vector<128x16xf32> to vector<128x1xf32>
      %43 = vector.broadcast %41 : vector<1x128xf32> to vector<128x128xf32>
      %44 = vector.broadcast %42 : vector<128x1xf32> to vector<128x128xf32>
      %45 = arith.cmpf ole, %43, %44 : vector<128x128xf32>
      %46 = arith.andi %40, %45 : vector<128x128xi1>
      %47 = arith.andi %35, %46 : vector<128x128xi1>
      %48 = vector.extract_strided_slice %10 {offsets = [0, 6], sizes = [128, 1], strides = [1, 1]} : vector<128x16xf32> to vector<128x1xf32>
      %49 = vector.extract_strided_slice %10 {offsets = [0, 7], sizes = [128, 1], strides = [1, 1]} : vector<128x16xf32> to vector<128x1xf32>
      %50 = vector.extract_strided_slice %10 {offsets = [0, 8], sizes = [128, 1], strides = [1, 1]} : vector<128x16xf32> to vector<128x1xf32>
      %51 = vector.extract_strided_slice %10 {offsets = [0, 9], sizes = [128, 1], strides = [1, 1]} : vector<128x16xf32> to vector<128x1xf32>
      %52 = vector.extract_strided_slice %10 {offsets = [0, 10], sizes = [128, 1], strides = [1, 1]} : vector<128x16xf32> to vector<128x1xf32>
      %53 = vector.extract_strided_slice %10 {offsets = [0, 11], sizes = [128, 1], strides = [1, 1]} : vector<128x16xf32> to vector<128x1xf32>
      %54 = vector.extract_strided_slice %10 {offsets = [0, 12], sizes = [128, 1], strides = [1, 1]} : vector<128x16xf32> to vector<128x1xf32>
      %55 = vector.extract_strided_slice %10 {offsets = [0, 13], sizes = [128, 1], strides = [1, 1]} : vector<128x16xf32> to vector<128x1xf32>
      %56 = vector.extract_strided_slice %10 {offsets = [0, 14], sizes = [128, 1], strides = [1, 1]} : vector<128x16xf32> to vector<128x1xf32>
      %57 = vector.extract_strided_slice %12 {offsets = [6, 0], sizes = [1, 128], strides = [1, 1]} : vector<16x128xf32> to vector<1x128xf32>
      %58 = vector.extract_strided_slice %12 {offsets = [7, 0], sizes = [1, 128], strides = [1, 1]} : vector<16x128xf32> to vector<1x128xf32>
      %59 = vector.extract_strided_slice %12 {offsets = [8, 0], sizes = [1, 128], strides = [1, 1]} : vector<16x128xf32> to vector<1x128xf32>
      %60 = vector.extract_strided_slice %12 {offsets = [9, 0], sizes = [1, 128], strides = [1, 1]} : vector<16x128xf32> to vector<1x128xf32>
      %61 = vector.extract_strided_slice %12 {offsets = [10, 0], sizes = [1, 128], strides = [1, 1]} : vector<16x128xf32> to vector<1x128xf32>
      %62 = vector.extract_strided_slice %12 {offsets = [11, 0], sizes = [1, 128], strides = [1, 1]} : vector<16x128xf32> to vector<1x128xf32>
      %63 = vector.extract_strided_slice %12 {offsets = [12, 0], sizes = [1, 128], strides = [1, 1]} : vector<16x128xf32> to vector<1x128xf32>
      %64 = vector.extract_strided_slice %12 {offsets = [13, 0], sizes = [1, 128], strides = [1, 1]} : vector<16x128xf32> to vector<1x128xf32>
      %65 = vector.extract_strided_slice %12 {offsets = [14, 0], sizes = [1, 128], strides = [1, 1]} : vector<16x128xf32> to vector<1x128xf32>
      %66 = vector.broadcast %48 : vector<128x1xf32> to vector<128x128xf32>
      %67 = vector.broadcast %57 : vector<1x128xf32> to vector<128x128xf32>
      %68 = arith.cmpf oeq, %66, %67 : vector<128x128xf32>
      %69 = vector.broadcast %49 : vector<128x1xf32> to vector<128x128xf32>
      %70 = vector.broadcast %58 : vector<1x128xf32> to vector<128x128xf32>
      %71 = arith.cmpf oeq, %69, %70 : vector<128x128xf32>
      %72 = arith.andi %68, %71 : vector<128x128xi1>
      %73 = vector.broadcast %50 : vector<128x1xf32> to vector<128x128xf32>
      %74 = vector.broadcast %59 : vector<1x128xf32> to vector<128x128xf32>
      %75 = arith.cmpf oeq, %73, %74 : vector<128x128xf32>
      %76 = arith.andi %72, %75 : vector<128x128xi1>
      %77 = vector.broadcast %48 : vector<128x1xf32> to vector<128x128xf32>
      %78 = vector.broadcast %60 : vector<1x128xf32> to vector<128x128xf32>
      %79 = arith.cmpf oeq, %77, %78 : vector<128x128xf32>
      %80 = vector.broadcast %49 : vector<128x1xf32> to vector<128x128xf32>
      %81 = vector.broadcast %61 : vector<1x128xf32> to vector<128x128xf32>
      %82 = arith.cmpf oeq, %80, %81 : vector<128x128xf32>
      %83 = arith.andi %79, %82 : vector<128x128xi1>
      %84 = vector.broadcast %50 : vector<128x1xf32> to vector<128x128xf32>
      %85 = vector.broadcast %62 : vector<1x128xf32> to vector<128x128xf32>
      %86 = arith.cmpf oeq, %84, %85 : vector<128x128xf32>
      %87 = arith.andi %83, %86 : vector<128x128xi1>
      %88 = arith.ori %76, %87 : vector<128x128xi1>
      %89 = vector.broadcast %48 : vector<128x1xf32> to vector<128x128xf32>
      %90 = vector.broadcast %63 : vector<1x128xf32> to vector<128x128xf32>
      %91 = arith.cmpf oeq, %89, %90 : vector<128x128xf32>
      %92 = vector.broadcast %49 : vector<128x1xf32> to vector<128x128xf32>
      %93 = vector.broadcast %64 : vector<1x128xf32> to vector<128x128xf32>
      %94 = arith.cmpf oeq, %92, %93 : vector<128x128xf32>
      %95 = arith.andi %91, %94 : vector<128x128xi1>
      %96 = vector.broadcast %50 : vector<128x1xf32> to vector<128x128xf32>
      %97 = vector.broadcast %65 : vector<1x128xf32> to vector<128x128xf32>
      %98 = arith.cmpf oeq, %96, %97 : vector<128x128xf32>
      %99 = arith.andi %95, %98 : vector<128x128xi1>
      %100 = arith.ori %88, %99 : vector<128x128xi1>
      %101 = vector.broadcast %51 : vector<128x1xf32> to vector<128x128xf32>
      %102 = vector.broadcast %57 : vector<1x128xf32> to vector<128x128xf32>
      %103 = arith.cmpf oeq, %101, %102 : vector<128x128xf32>
      %104 = vector.broadcast %52 : vector<128x1xf32> to vector<128x128xf32>
      %105 = vector.broadcast %58 : vector<1x128xf32> to vector<128x128xf32>
      %106 = arith.cmpf oeq, %104, %105 : vector<128x128xf32>
      %107 = arith.andi %103, %106 : vector<128x128xi1>
      %108 = vector.broadcast %53 : vector<128x1xf32> to vector<128x128xf32>
      %109 = vector.broadcast %59 : vector<1x128xf32> to vector<128x128xf32>
      %110 = arith.cmpf oeq, %108, %109 : vector<128x128xf32>
      %111 = arith.andi %107, %110 : vector<128x128xi1>
      %112 = arith.ori %100, %111 : vector<128x128xi1>
      %113 = vector.broadcast %51 : vector<128x1xf32> to vector<128x128xf32>
      %114 = vector.broadcast %60 : vector<1x128xf32> to vector<128x128xf32>
      %115 = arith.cmpf oeq, %113, %114 : vector<128x128xf32>
      %116 = vector.broadcast %52 : vector<128x1xf32> to vector<128x128xf32>
      %117 = vector.broadcast %61 : vector<1x128xf32> to vector<128x128xf32>
      %118 = arith.cmpf oeq, %116, %117 : vector<128x128xf32>
      %119 = arith.andi %115, %118 : vector<128x128xi1>
      %120 = vector.broadcast %53 : vector<128x1xf32> to vector<128x128xf32>
      %121 = vector.broadcast %62 : vector<1x128xf32> to vector<128x128xf32>
      %122 = arith.cmpf oeq, %120, %121 : vector<128x128xf32>
      %123 = arith.andi %119, %122 : vector<128x128xi1>
      %124 = arith.ori %112, %123 : vector<128x128xi1>
      %125 = vector.broadcast %51 : vector<128x1xf32> to vector<128x128xf32>
      %126 = vector.broadcast %63 : vector<1x128xf32> to vector<128x128xf32>
      %127 = arith.cmpf oeq, %125, %126 : vector<128x128xf32>
      %128 = vector.broadcast %52 : vector<128x1xf32> to vector<128x128xf32>
      %129 = vector.broadcast %64 : vector<1x128xf32> to vector<128x128xf32>
      %130 = arith.cmpf oeq, %128, %129 : vector<128x128xf32>
      %131 = arith.andi %127, %130 : vector<128x128xi1>
      %132 = vector.broadcast %53 : vector<128x1xf32> to vector<128x128xf32>
      %133 = vector.broadcast %65 : vector<1x128xf32> to vector<128x128xf32>
      %134 = arith.cmpf oeq, %132, %133 : vector<128x128xf32>
      %135 = arith.andi %131, %134 : vector<128x128xi1>
      %136 = arith.ori %124, %135 : vector<128x128xi1>
      %137 = vector.broadcast %54 : vector<128x1xf32> to vector<128x128xf32>
      %138 = vector.broadcast %57 : vector<1x128xf32> to vector<128x128xf32>
      %139 = arith.cmpf oeq, %137, %138 : vector<128x128xf32>
      %140 = vector.broadcast %55 : vector<128x1xf32> to vector<128x128xf32>
      %141 = vector.broadcast %58 : vector<1x128xf32> to vector<128x128xf32>
      %142 = arith.cmpf oeq, %140, %141 : vector<128x128xf32>
      %143 = arith.andi %139, %142 : vector<128x128xi1>
      %144 = vector.broadcast %56 : vector<128x1xf32> to vector<128x128xf32>
      %145 = vector.broadcast %59 : vector<1x128xf32> to vector<128x128xf32>
      %146 = arith.cmpf oeq, %144, %145 : vector<128x128xf32>
      %147 = arith.andi %143, %146 : vector<128x128xi1>
      %148 = arith.ori %136, %147 : vector<128x128xi1>
      %149 = vector.broadcast %54 : vector<128x1xf32> to vector<128x128xf32>
      %150 = vector.broadcast %60 : vector<1x128xf32> to vector<128x128xf32>
      %151 = arith.cmpf oeq, %149, %150 : vector<128x128xf32>
      %152 = vector.broadcast %55 : vector<128x1xf32> to vector<128x128xf32>
      %153 = vector.broadcast %61 : vector<1x128xf32> to vector<128x128xf32>
      %154 = arith.cmpf oeq, %152, %153 : vector<128x128xf32>
      %155 = arith.andi %151, %154 : vector<128x128xi1>
      %156 = vector.broadcast %56 : vector<128x1xf32> to vector<128x128xf32>
      %157 = vector.broadcast %62 : vector<1x128xf32> to vector<128x128xf32>
      %158 = arith.cmpf oeq, %156, %157 : vector<128x128xf32>
      %159 = arith.andi %155, %158 : vector<128x128xi1>
      %160 = arith.ori %148, %159 : vector<128x128xi1>
      %161 = vector.broadcast %54 : vector<128x1xf32> to vector<128x128xf32>
      %162 = vector.broadcast %63 : vector<1x128xf32> to vector<128x128xf32>
      %163 = arith.cmpf oeq, %161, %162 : vector<128x128xf32>
      %164 = vector.broadcast %55 : vector<128x1xf32> to vector<128x128xf32>
      %165 = vector.broadcast %64 : vector<1x128xf32> to vector<128x128xf32>
      %166 = arith.cmpf oeq, %164, %165 : vector<128x128xf32>
      %167 = arith.andi %163, %166 : vector<128x128xi1>
      %168 = vector.broadcast %56 : vector<128x1xf32> to vector<128x128xf32>
      %169 = vector.broadcast %65 : vector<1x128xf32> to vector<128x128xf32>
      %170 = arith.cmpf oeq, %168, %169 : vector<128x128xf32>
      %171 = arith.andi %167, %170 : vector<128x128xi1>
      %172 = arith.ori %160, %171 : vector<128x128xi1>
      %cst = arith.constant dense<true> : vector<128x128xi1>
      %173 = arith.xori %172, %cst : vector<128x128xi1>
      %174 = arith.andi %47, %173 : vector<128x128xi1>
      %c128_i32_8 = arith.constant 128 : i32
      %175 = arith.addi %0, %c128_i32_8 : i32
      %176 = arith.cmpi sle, %175, %1 : i32
      %c128_i32_9 = arith.constant 128 : i32
      %177 = arith.addi %1, %c128_i32_9 : i32
      %c64_i32 = arith.constant 64 : i32
      %178 = arith.cmpi sle, %177, %c64_i32 : i32
      %179 = arith.andi %176, %178 : i1
      %180 = arith.extui %179 : i1 to i32
      %c0_i32_10 = arith.constant 0 : i32
      %181 = arith.cmpi ne, %180, %c0_i32_10 : i32
      scf.if %181 {
        %185 = arith.extui %174 : vector<128x128xi1> to vector<128x128xi8>
        %c0_13 = arith.constant 0 : index
        %c0_14 = arith.constant 0 : index
        %c0_15 = arith.constant 0 : index
        %186 = vector.load %arg5[%c0_13, %c0_14, %c0_15] : memref<1x128x128xi8, #tpu.memory_space<vmem>>, vector<1x128x128xi8>
        %187 = vector.shape_cast %186 : vector<1x128x128xi8> to vector<128x128xi8>
        %188 = vector.shape_cast %185 : vector<128x128xi8> to vector<1x128x128xi8>
        tpu.vector_store %arg5[%c0_13, %c0_14, %c0_15], %188 {strides = array<i32>} : memref<1x128x128xi8, #tpu.memory_space<vmem>>, vector<1x128x128xi8>,
      } else {
      }
      %true_11 = arith.constant true
      %182 = arith.xori %179, %true_11 : i1
      %183 = arith.extui %182 : i1 to i32
      %c0_i32_12 = arith.constant 0 : i32
      %184 = arith.cmpi ne, %183, %c0_i32_12 : i32
      scf.if %184 {
        %185 = tpu.iota {dimensions = array<i32: 0>} : vector<128x128xi32>
        %186 = vector.broadcast %0 : i32 to vector<128x128xi32>
        %187 = arith.addi %186, %185 : vector<128x128xi32>
        %188 = tpu.iota {dimensions = array<i32: 1>} : vector<128x128xi32>
        %189 = vector.broadcast %1 : i32 to vector<128x128xi32>
        %190 = arith.addi %189, %188 : vector<128x128xi32>
        %191 = arith.cmpi slt, %187, %190 : vector<128x128xi32>
        %192 = arith.andi %174, %191 : vector<128x128xi1>
        %c64_i32_13 = arith.constant 64 : i32
        %193 = vector.broadcast %c64_i32_13 : i32 to vector<128x128xi32>
        %194 = arith.cmpi slt, %190, %193 : vector<128x128xi32>
        %195 = arith.andi %192, %194 : vector<128x128xi1>
        %196 = arith.extui %195 : vector<128x128xi1> to vector<128x128xi8>
        %c0_14 = arith.constant 0 : index
        %c0_15 = arith.constant 0 : index
        %c0_16 = arith.constant 0 : index
        %197 = vector.load %arg5[%c0_14, %c0_15, %c0_16] : memref<1x128x128xi8, #tpu.memory_space<vmem>>, vector<1x128x128xi8>
        %198 = vector.shape_cast %197 : vector<1x128x128xi8> to vector<128x128xi8>
        %199 = vector.shape_cast %196 : vector<128x128xi8> to vector<1x128x128xi8>
        tpu.vector_store %arg5[%c0_14, %c0_15, %c0_16], %199 {strides = array<i32>} : memref<1x128x128xi8, #tpu.memory_space<vmem>>, vector<1x128x128xi8>,
      } else {
      }
    } else {
    }
    %true = arith.constant true
    %6 = arith.xori %3, %true : i1
    %7 = arith.extui %6 : i1 to i32
    %c0_i32_2 = arith.constant 0 : i32
    %8 = arith.cmpi ne, %7, %c0_i32_2 : i32
    scf.if %8 {
      %c0_i8 = arith.constant 0 : i8
      %9 = vector.broadcast %c0_i8 : i8 to vector<128x128xi8>
      %c0 = arith.constant 0 : index
      %c0_3 = arith.constant 0 : index
      %c0_4 = arith.constant 0 : index
      %10 = vector.load %arg5[%c0, %c0_3, %c0_4] : memref<1x128x128xi8, #tpu.memory_space<vmem>>, vector<1x128x128xi8>
      %11 = vector.shape_cast %10 : vector<1x128x128xi8> to vector<128x128xi8>
      %12 = vector.shape_cast %9 : vector<128x128xi8> to vector<1x128x128xi8>
      tpu.vector_store %arg5[%c0, %c0_3, %c0_4], %12 {strides = array<i32>} : memref<1x128x128xi8, #tpu.memory_space<vmem>>, vector<1x128x128xi8>,
    } else {
    }
    return
  }
  func.func @transform_0(%arg0: i32, %arg1: i32, %arg2: i32) -> (i32, i32, i32) {
    %c0_i32 = arith.constant 0 : i32
    %c0_i32_0 = arith.constant 0 : i32
    return %arg0, %arg1, %c0_i32 : i32, i32, i32
  }
  func.func @transform_1(%arg0: i32, %arg1: i32, %arg2: i32) -> (i32, i32, i32) {
    %c0_i32 = arith.constant 0 : i32
    %c0_i32_0 = arith.constant 0 : i32
    return %arg0, %c0_i32, %arg2 : i32, i32, i32
  }
  func.func @transform_2(%arg0: i32, %arg1: i32, %arg2: i32) -> (i32, i32, i32) {
    %c0_i32 = arith.constant 0 : i32
    return %arg0, %arg1, %arg2 : i32, i32, i32
  }
}

</mosaic_0001>

<bundles_post_ra>
// kernel: _lambda_.1
= control target key start
LH: loop header
LB: loop body
LE: loop exit
PB: predicated region body
PF: predicated region fallthrough
CT: control target
= control target key end

     0   :  { %s2899_s9 = smov 0   ;;  %s2901_s10 = smov 0   ;;  %s7253_s0 = inlined_call_operand.vmem [shape: f32[2,128,16], index: 0, kind: input, shape index: {}]   ;;  %s7254_s1 = inlined_call_operand.vmem [shape: f32[2,16,128], index: 1, kind: input, shape index: {}]   ;;  %s7255_s2 = inlined_call_operand.vmem [shape: s8[2,128,128], index: 2, kind: output, shape index: {}]  }
   0x1   :  { %s2903_s11 = smov 0  }
   0x2 LB: > { %s31_s12 = sadd.s32 1, %s2862_s10  ;;  %p2747_p0 = scmp.ge.s32.totalorder %s2866_s11, 1  ;;  %s2866_s11 = sphi %s2903_s11, %s12_s11   ;;  %s2862_s10 = sphi %s2901_s10, %s8830_s10   ;;  %s2858_s9 = sphi %s2899_s9, %s8829_s9  }
   0x3   : > { %p33_p1 = scmp.ge.s32.totalorder %s31_s12, 2  ;;  %p157_p2 = scmp.lt.s32.totalorder %s2866_s11, 3 }
   0x5   : > { %s8832_s12 = smov (%p33_p1, %s31_s12), 0  ;;  %p158_p3 = pnand %p2747_p0, %p157_p2 }
   0x7   : > { %161 = sbr.rel (%p158_p3) target bundleno = 1040 (0x410), region = 28 }
   0xc   : > { %p199_p4 = scmp.lt.s32.totalorder %s2858_s9, 1  ;;  %v7256_v0 = vmov 0   ;;  %v2869_v17 = vmov 3   ;;  %v2870_v18 = vmov 1   ;;  %v2871_v19 = vmov 4  }
   0xd   : > { %2800 = vset.pattern.permute.xlu1 %v7256_v0  ;;  %2799 = vset.pattern.permute.xlu0 %v7256_v0  ;;  %v2872_v23 = vmov 2   ;;  %v2873_v38 = vmov 5   ;;  %v7258_v44 = vlaneseq  ;;  %v7551_v59 = vmov 0 }
   0xe   : > { %s8834_s9 = smov (!%p199_p4, %s2858_s9), 1 }
   0xf   : > { %s2756_s13 = sshll.u32 %s8834_s9, 7  ;;  %s2757_s17 = sshll.u32 %s8834_s9, 4  ;;  %v3100_v47 = vshrl.u32 %v7258_v44, 7 }
  0x10   : > { %s2925_s16 = scalar_lea.vmem %s7253_s0, %s2756_s13  ;;  %s3106_s20 = scalar_lea.vmem %s7254_s1, %s2757_s17 }
  0x11   : > { %v2928_v1 = vld [vmem:[%s2925_s16 + $0x10] sm:$0xff]  ;;  %v2931_v2 = vld [vmem:[%s2925_s16] sm:$0xff]  ;;  %v2936_v3 = vld [vmem:[%s2925_s16 + $0x18] sm:$0xff]  ;;  %7463 = vst [vmem:[#allocation22_spill] sm:$0xff] %v3100_v47  ;;  %v7260_v50 = vsub.s32 3, %v3100_v47  ;;  %v7259_v52 = vsub.s32 0, %v3100_v47 }
  0x12   : > { %268 = vperm.xlu1 %2800, %v2928_v1   ;;  %258 = vperm.xlu0 %2799, %v2931_v2   ;;  %v2939_v4 = vld [vmem:[%s2925_s16 + $0x8] sm:$0xff]  ;;  %v2947_v6 = vld [vmem:[%s2925_s16 + $0x20] sm:$0xff]  ;;  %v2952_v7 = vld [vmem:[%s2925_s16 + $0x38] sm:$0xff]  ;;  %s2758_s21 = sshll.u32 %s8834_s9, 5 }
  0x13   : > { %v2944_v5 = vld [vmem:[%s2925_s16 + $0x28] sm:$0xff]  ;;  %v2955_v8 = vld [vmem:[%s2925_s16 + $0x30] sm:$0xff]  ;;  %v2963_v10 = vld [vmem:[%s2925_s16 + $0x40] sm:$0xff]  ;;  %s6778_s24 = scalar_lea.vmem %s7255_s2, %s2758_s21 }
  0x14   : > { %v2960_v9 = vld [vmem:[%s2925_s16 + $0x48] sm:$0xff]  ;;  %v2968_v11 = vld [vmem:[%s2925_s16 + $0x58] sm:$0xff]  ;;  %v2971_v12 = vld [vmem:[%s2925_s16 + $0x50] sm:$0xff] }
  0x15   : > { %v2976_v13 = vld [vmem:[%s2925_s16 + $0x68] sm:$0xff]  ;;  %v2979_v14 = vld [vmem:[%s2925_s16 + $0x60] sm:$0xff]  ;;  %v2984_v15 = vld [vmem:[%s2925_s16 + $0x78] sm:$0xff] }
  0x16   : > { %273 = vperm.xlu1 %2800, %v2936_v3   ;;  %263 = vperm.xlu0 %2799, %v2939_v4   ;;  %v2987_v16 = vld [vmem:[%s2925_s16 + $0x70] sm:$0xff]  ;;  %v3116_v51 = vld [vmem:[%s3106_s20] sm:$0xff] }
  0x17   : > { %v3126_v55 = vrot.slane %v3116_v51, %v7260_v50  ;;  %v3134_v56 = vrot.slane %v3116_v51, %v7259_v52  ;;  %v2875_v50 = vmov 7  }
  0x19   : > { %7468 = vst [vmem:[#allocation27_spill] sm:$0xff] %v3126_v55  ;;  %7469 = vst [vmem:[#allocation28_spill] sm:$0xff] %v3134_v56 }
  0x1a   : > { %283 = vperm.xlu1 %2800, %v2944_v5   ;;  %278 = vperm.xlu0 %2799, %v2947_v6  }
  0x1e   : > { %293 = vperm.xlu1 %2800, %v2952_v7   ;;  %288 = vperm.xlu0 %2799, %v2955_v8  }
  0x22   : > { %303 = vperm.xlu1 %2800, %v2960_v9   ;;  %298 = vperm.xlu0 %2799, %v2963_v10  }
  0x26   : > { %313 = vperm.xlu1 %2800, %v2968_v11   ;;  %308 = vperm.xlu0 %2799, %v2971_v12  }
  0x2a   : > { %323 = vperm.xlu1 %2800, %v2976_v13   ;;  %318 = vperm.xlu0 %2799, %v2979_v14  }
  0x2e   : > { %333 = vperm.xlu1 %2800, %v2984_v15   ;;  %328 = vperm.xlu0 %2799, %v2987_v16  }
  0x32   : > { %2802 = vset.pattern.permute.xlu1 %v2869_v17  ;;  %2801 = vset.pattern.permute.xlu0 %v2869_v17 }
  0x33   : > { %365 = vperm.xlu1 %2802, %v2939_v4   ;;  %361 = vperm.xlu0 %2801, %v2931_v2  }
  0x37   : > { %369 = vperm.xlu1 %2802, %v2928_v1   ;;  %373 = vperm.xlu0 %2801, %v2936_v3  }
  0x3b   : > { %377 = vperm.xlu1 %2802, %v2947_v6   ;;  %381 = vperm.xlu0 %2801, %v2944_v5  }
  0x3f   : > { %385 = vperm.xlu1 %2802, %v2955_v8   ;;  %389 = vperm.xlu0 %2801, %v2952_v7  }
  0x43   : > { %393 = vperm.xlu1 %2802, %v2963_v10   ;;  %397 = vperm.xlu0 %2801, %v2960_v9  }
  0x47   : > { %401 = vperm.xlu1 %2802, %v2971_v12   ;;  %405 = vperm.xlu0 %2801, %v2968_v11  }
  0x4b   : > { %409 = vperm.xlu1 %2802, %v2979_v14   ;;  %413 = vperm.xlu0 %2801, %v2976_v13  }
  0x4f   : > { %417 = vperm.xlu1 %2802, %v2987_v16   ;;  %421 = vperm.xlu0 %2801, %v2984_v15  }
  0x53   : > { %2803 = vset.pattern.permute.xlu1 %v2870_v18  ;;  %2804 = vset.pattern.permute.xlu0 %v2870_v18 }
  0x54   : > { %457 = vperm.xlu1 %2803, %v2931_v2   ;;  %461 = vperm.xlu0 %2804, %v2939_v4  }
  0x58   : > { %465 = vperm.xlu1 %2803, %v2928_v1   ;;  %473 = vperm.xlu0 %2804, %v2947_v6  }
  0x5c   : > { %469 = vperm.xlu1 %2803, %v2936_v3   ;;  %481 = vperm.xlu0 %2804, %v2955_v8  }
  0x60   : > { %477 = vperm.xlu1 %2803, %v2944_v5   ;;  %489 = vperm.xlu0 %2804, %v2963_v10  }
  0x64   : > { %485 = vperm.xlu1 %2803, %v2952_v7   ;;  %497 = vperm.xlu0 %2804, %v2971_v12  }
  0x68   : > { %493 = vperm.xlu1 %2803, %v2960_v9   ;;  %505 = vperm.xlu0 %2804, %v2979_v14  }
  0x6c   : > { %501 = vperm.xlu1 %2803, %v2968_v11   ;;  %513 = vperm.xlu0 %2804, %v2987_v16  }
  0x70   : > { %509 = vperm.xlu1 %2803, %v2976_v13   ;;  %2805 = vset.pattern.permute.xlu0 %v2871_v19 }
  0x71   : > { %545 = vperm.xlu0 %2805, %v2931_v2  }
  0x74   : > { %517 = vperm.xlu1 %2803, %v2984_v15  }
  0x75   : > { %557 = vperm.xlu0 %2805, %v2936_v3  }
  0x78   : > { %2806 = vset.pattern.permute.xlu1 %v2871_v19  ;;  %v2874_v19 = vmov 6  }
  0x79   : > { %549 = vperm.xlu1 %2806, %v2939_v4   ;;  %565 = vperm.xlu0 %2805, %v2944_v5  }
  0x7d   : > { %553 = vperm.xlu1 %2806, %v2928_v1   ;;  %573 = vperm.xlu0 %2805, %v2952_v7  }
  0x81   : > { %561 = vperm.xlu1 %2806, %v2947_v6   ;;  %581 = vperm.xlu0 %2805, %v2960_v9  }
  0x85   : > { %569 = vperm.xlu1 %2806, %v2955_v8   ;;  %589 = vperm.xlu0 %2805, %v2968_v11  }
  0x89   : > { %577 = vperm.xlu1 %2806, %v2963_v10   ;;  %597 = vperm.xlu0 %2805, %v2976_v13  }
  0x8d   : > { %v3035_v20 = vpop.permute.xlu1 %268  ;;  %585 = vperm.xlu1 %2806, %v2971_v12   ;;  %605 = vperm.xlu0 %2805, %v2984_v15   ;;  %v3039_v21 = vpop.permute.xlu0 %258 }
  0x8e   : > { %7443 = vst [vmem:[#allocation2_spill] sm:$0xff] %v3035_v20  ;;  %7444 = vst [vmem:[#allocation3_spill] sm:$0xff] %v3039_v21 }
  0x91   : > { %v3041_v22 = vpop.permute.xlu1 %273  ;;  %593 = vperm.xlu1 %2806, %v2979_v14   ;;  %2808 = vset.pattern.permute.xlu0 %v2872_v23  ;;  %v3044_v24 = vpop.permute.xlu0 %263 }
  0x92   : > { %7445 = vst [vmem:[#allocation4_spill] sm:$0xff] %v3041_v22  ;;  %7446 = vst [vmem:[#allocation5_spill] sm:$0xff] %v3044_v24  ;;  %661 = vperm.xlu0 %2808, %v2939_v4  }
  0x95   : > { %v3047_v25 = vpop.permute.xlu1 %283  ;;  %601 = vperm.xlu1 %2806, %v2987_v16   ;;  %v3050_v26 = vpop.permute.xlu0 %278 }
  0x96   : > { %7447 = vst [vmem:[#allocation6_spill] sm:$0xff] %v3047_v25  ;;  %7448 = vst [vmem:[#allocation7_spill] sm:$0xff] %v3050_v26  ;;  %673 = vperm.xlu0 %2808, %v2947_v6  }
  0x99   : > { %v3053_v27 = vpop.permute.xlu1 %293  ;;  %2807 = vset.pattern.permute.xlu1 %v2872_v23  ;;  %v3055_v28 = vpop.permute.xlu0 %288 }
  0x9a   : > { %7449 = vst [vmem:[#allocation8_spill] sm:$0xff] %v3053_v27  ;;  %7450 = vst [vmem:[#allocation9_spill] sm:$0xff] %v3055_v28  ;;  %657 = vperm.xlu1 %2807, %v2931_v2   ;;  %681 = vperm.xlu0 %2808, %v2955_v8  }
  0x9d   : > { %v3059_v29 = vpop.permute.xlu1 %303  ;;  %v3061_v30 = vpop.permute.xlu0 %298 }
  0x9e   : > { %7451 = vst [vmem:[#allocation10_spill] sm:$0xff] %v3059_v29  ;;  %7452 = vst [vmem:[#allocation11_spill] sm:$0xff] %v3061_v30  ;;  %665 = vperm.xlu1 %2807, %v2928_v1   ;;  %689 = vperm.xlu0 %2808, %v2963_v10  }
  0xa1   : > { %v3065_v31 = vpop.permute.xlu1 %313  ;;  %v3067_v32 = vpop.permute.xlu0 %308 }
  0xa2   : > { %7453 = vst [vmem:[#allocation12_spill] sm:$0xff] %v3065_v31  ;;  %7454 = vst [vmem:[#allocation13_spill] sm:$0xff] %v3067_v32  ;;  %669 = vperm.xlu1 %2807, %v2936_v3   ;;  %697 = vperm.xlu0 %2808, %v2971_v12  }
  0xa5   : > { %v324_v33 = vpop.permute.xlu1 %323  ;;  %v319_v34 = vpop.permute.xlu0 %318 }
  0xa6   : > { %677 = vperm.xlu1 %2807, %v2944_v5   ;;  %705 = vperm.xlu0 %2808, %v2979_v14   ;;  %vm352_vm0 = vcmp.le.f32.partialorder %v319_v34, %v3126_v55  ;;  %vm353_vm3 = vcmp.le.f32.partialorder %v324_v33, %v3126_v55 }
  0xa9   : > { %v334_v35 = vpop.permute.xlu1 %333  ;;  %v329_v36 = vpop.permute.xlu0 %328 }
  0xaa   : > { %685 = vperm.xlu1 %2807, %v2952_v7   ;;  %713 = vperm.xlu0 %2808, %v2987_v16   ;;  %vm354_vm6 = vcmp.le.f32.partialorder %v329_v36, %v3126_v55  ;;  %vm355_vm9 = vcmp.le.f32.partialorder %v334_v35, %v3126_v55 }
  0xae   : > { %v3075_v37 = vpop.permute.xlu1 %365  ;;  %693 = vperm.xlu1 %2807, %v2960_v9   ;;  %2809 = vset.pattern.permute.xlu0 %v2873_v38  ;;  %v3078_v39 = vpop.permute.xlu0 %361 }
  0xaf   : > { %7455 = vst [vmem:[#allocation14_spill] sm:$0xff] %v3075_v37  ;;  %7456 = vst [vmem:[#allocation15_spill] sm:$0xff] %v3078_v39  ;;  %745 = vperm.xlu0 %2809, %v2931_v2   ;;  %v2881_v37 = vmov 13  }
  0xb2   : > { %v3081_v40 = vpop.permute.xlu1 %369  ;;  %701 = vperm.xlu1 %2807, %v2968_v11   ;;  %v3084_v41 = vpop.permute.xlu0 %373 }
  0xb3   : > { %7457 = vst [vmem:[#allocation16_spill] sm:$0xff] %v3081_v40  ;;  %7458 = vst [vmem:[#allocation17_spill] sm:$0xff] %v3084_v41  ;;  %757 = vperm.xlu0 %2809, %v2936_v3  }
  0xb6   : > { %v3087_v42 = vpop.permute.xlu1 %377  ;;  %709 = vperm.xlu1 %2807, %v2976_v13   ;;  %v3090_v43 = vpop.permute.xlu0 %381 }
  0xb7   : > { %7459 = vst [vmem:[#allocation18_spill] sm:$0xff] %v3087_v42  ;;  %7460 = vst [vmem:[#allocation19_spill] sm:$0xff] %v3090_v43  ;;  %765 = vperm.xlu0 %2809, %v2944_v5  }
  0xba   : > { %v3094_v45 = vpop.permute.xlu1 %385  ;;  %717 = vperm.xlu1 %2807, %v2984_v15   ;;  %v3097_v46 = vpop.permute.xlu0 %389 }
  0xbb   : > { %7461 = vst [vmem:[#allocation20_spill] sm:$0xff] %v3094_v45  ;;  %7462 = vst [vmem:[#allocation21_spill] sm:$0xff] %v3097_v46  ;;  %773 = vperm.xlu0 %2809, %v2952_v7  }
  0xbe   : > { %v3108_v48 = vpop.permute.xlu1 %393  ;;  %2810 = vset.pattern.permute.xlu1 %v2873_v38  ;;  %v3110_v49 = vpop.permute.xlu0 %397 }
  0xbf   : > { %7464 = vst [vmem:[#allocation23_spill] sm:$0xff] %v3108_v48  ;;  %7465 = vst [vmem:[#allocation24_spill] sm:$0xff] %v3110_v49  ;;  %749 = vperm.xlu1 %2810, %v2939_v4   ;;  %781 = vperm.xlu0 %2809, %v2960_v9  }
  0xc2   : > { %v3119_v53 = vpop.permute.xlu1 %401  ;;  %v3121_v54 = vpop.permute.xlu0 %405 }
  0xc3   : > { %7466 = vst [vmem:[#allocation25_spill] sm:$0xff] %v3119_v53  ;;  %7467 = vst [vmem:[#allocation26_spill] sm:$0xff] %v3121_v54  ;;  %753 = vperm.xlu1 %2810, %v2928_v1   ;;  %789 = vperm.xlu0 %2809, %v2968_v11   ;;  %v7268_v53 = vsub.s32 1, %v3100_v47 }
  0xc5   : > { %v3240_v25 = vrot.slane %v3116_v51, %v7268_v53 }
  0xc6   : > { %v410_v57 = vpop.permute.xlu1 %409  ;;  %v414_v58 = vpop.permute.xlu0 %413 }
  0xc7   : > { %vm436_vm1 = vcmp.le.f32.partialorder %v3134_v56, %v410_v57  ;;  %vm437_vm2 = vcmp.le.f32.partialorder %v3134_v56, %v414_v58  ;;  %761 = vperm.xlu1 %2810, %v2947_v6   ;;  %797 = vperm.xlu0 %2809, %v2976_v13   ;;  %7500 = vst [vmem:[#allocation51_spill] sm:$0xff] %v3240_v25 }
  0xc8   : > { %vm3141_vm4 = vmand %vm352_vm0, %vm436_vm1 }
  0xc9   : > { %vm3145_vm5 = vmand %vm353_vm3, %vm437_vm2 }
  0xca   : > { %v418_v61 = vpop.permute.xlu1 %417  ;;  %v422_v62 = vpop.permute.xlu0 %421 }
  0xcb   : > { %vm438_vm7 = vcmp.le.f32.partialorder %v3134_v56, %v418_v61  ;;  %vm439_vm8 = vcmp.le.f32.partialorder %v3134_v56, %v422_v62  ;;  %769 = vperm.xlu1 %2810, %v2955_v8   ;;  %805 = vperm.xlu0 %2809, %v2984_v15  }
  0xcc   : > { %vm3155_vm10 = vmand %vm354_vm6, %vm438_vm7 }
  0xcd   : > { %vm3159_vm11 = vmand %vm355_vm9, %vm439_vm8 }
  0xcf   : > { %777 = vperm.xlu1 %2810, %v2963_v10   ;;  %v3164_v18 = vpop.permute.xlu1 %457  ;;  %2812 = vset.pattern.permute.xlu0 %v2874_v19  ;;  %v3166_v23 = vpop.permute.xlu0 %461 }
  0xd0   : > { %7478 = vst [vmem:[#allocation29_spill] sm:$0xff] %v3164_v18  ;;  %7479 = vst [vmem:[#allocation30_spill] sm:$0xff] %v3166_v23  ;;  %861 = vperm.xlu0 %2812, %v2939_v4  }
  0xd3   : > { %785 = vperm.xlu1 %2810, %v2971_v12   ;;  %v3170_v33 = vpop.permute.xlu1 %465  ;;  %v3172_v34 = vpop.permute.xlu0 %473 }
  0xd4   : > { %7480 = vst [vmem:[#allocation31_spill] sm:$0xff] %v3170_v33  ;;  %7481 = vst [vmem:[#allocation32_spill] sm:$0xff] %v3172_v34  ;;  %873 = vperm.xlu0 %2812, %v2947_v6   ;;  %v2880_v34 = vmov 12  }
  0xd7   : > { %793 = vperm.xlu1 %2810, %v2979_v14   ;;  %v3176_v35 = vpop.permute.xlu1 %469  ;;  %v3178_v36 = vpop.permute.xlu0 %481 }
  0xd8   : > { %7482 = vst [vmem:[#allocation33_spill] sm:$0xff] %v3176_v35  ;;  %7483 = vst [vmem:[#allocation34_spill] sm:$0xff] %v3178_v36  ;;  %881 = vperm.xlu0 %2812, %v2955_v8  }
  0xdb   : > { %801 = vperm.xlu1 %2810, %v2987_v16   ;;  %v3182_v38 = vpop.permute.xlu1 %477  ;;  %v3184_v57 = vpop.permute.xlu0 %489 }
  0xdc   : > { %7484 = vst [vmem:[#allocation35_spill] sm:$0xff] %v3182_v38  ;;  %7485 = vst [vmem:[#allocation36_spill] sm:$0xff] %v3184_v57  ;;  %889 = vperm.xlu0 %2812, %v2963_v10  }
  0xdf   : > { %2811 = vset.pattern.permute.xlu1 %v2874_v19  ;;  %v3187_v58 = vpop.permute.xlu1 %485  ;;  %v3189_v61 = vpop.permute.xlu0 %497 }
  0xe0   : > { %7486 = vst [vmem:[#allocation37_spill] sm:$0xff] %v3187_v58  ;;  %7487 = vst [vmem:[#allocation38_spill] sm:$0xff] %v3189_v61  ;;  %857 = vperm.xlu1 %2811, %v2931_v2   ;;  %897 = vperm.xlu0 %2812, %v2971_v12  }
  0xe3   : > { %v3193_v62 = vpop.permute.xlu1 %493  ;;  %v506_v0 = vpop.permute.xlu0 %505 }
  0xe4   : > { %7488 = vst [vmem:[#allocation39_spill] sm:$0xff] %v3193_v62  ;;  %865 = vperm.xlu1 %2811, %v2928_v1   ;;  %905 = vperm.xlu0 %2812, %v2979_v14  }
  0xe7   : > { %v3197_v44 = vpop.permute.xlu1 %501  ;;  %v3199_v52 = vpop.permute.xlu0 %513 }
  0xe8   : > { %7489 = vst [vmem:[#allocation40_spill] sm:$0xff] %v3197_v44  ;;  %869 = vperm.xlu1 %2811, %v2936_v3   ;;  %913 = vperm.xlu0 %2812, %v2987_v16  }
  0xeb   : > { %v510_v19 = vpop.permute.xlu1 %509 }
  0xec   : > { %877 = vperm.xlu1 %2811, %v2944_v5   ;;  %2813 = vset.pattern.permute.xlu0 %v2875_v50  ;;  %v3204_v31 = vpop.permute.xlu0 %545 }
  0xed   : > { %7490 = vst [vmem:[#allocation41_spill] sm:$0xff] %v3204_v31  ;;  %941 = vperm.xlu0 %2813, %v2931_v2  }
  0xef   : > { %v518_v54 = vpop.permute.xlu1 %517 }
  0xf0   : > { %885 = vperm.xlu1 %2811, %v2952_v7   ;;  %v3208_v29 = vpop.permute.xlu0 %557 }
  0xf1   : > { %7491 = vst [vmem:[#allocation42_spill] sm:$0xff] %v3208_v29  ;;  %953 = vperm.xlu0 %2813, %v2936_v3   ;;  %v7276_v29 = vsub.s32 2, %v3100_v47 }
  0xf3   : > { %v3371_v28 = vrot.slane %v3116_v51, %v7276_v29 }
  0xf4   : > { %893 = vperm.xlu1 %2811, %v2960_v9   ;;  %v3212_v44 = vpop.permute.xlu1 %549  ;;  %v3214_v62 = vpop.permute.xlu0 %565 }
  0xf5   : > { %7492 = vst [vmem:[#allocation43_spill] sm:$0xff] %v3212_v44  ;;  %7493 = vst [vmem:[#allocation44_spill] sm:$0xff] %v3214_v62  ;;  %961 = vperm.xlu0 %2813, %v2944_v5  }
  0xf6   : > { %7532 = vst [vmem:[#allocation75_spill] sm:$0xff] %v3371_v28 }
  0xf8   : > { %901 = vperm.xlu1 %2811, %v2968_v11   ;;  %v3218_v49 = vpop.permute.xlu1 %553  ;;  %v3220_v27 = vpop.permute.xlu0 %573 }
  0xf9   : > { %7494 = vst [vmem:[#allocation45_spill] sm:$0xff] %v3218_v49  ;;  %7495 = vst [vmem:[#allocation46_spill] sm:$0xff] %v3220_v27  ;;  %969 = vperm.xlu0 %2813, %v2952_v7   ;;  %v7269_v27 = vsub.s32 4, %v3100_v47 }
  0xfb   : > { %v3247_v43 = vrot.slane %v3116_v51, %v7269_v27 }
  0xfc   : > { %909 = vperm.xlu1 %2811, %v2976_v13   ;;  %v3224_v58 = vpop.permute.xlu1 %561  ;;  %v3226_v46 = vpop.permute.xlu0 %581 }
  0xfd   : > { %7496 = vst [vmem:[#allocation47_spill] sm:$0xff] %v3224_v58  ;;  %7497 = vst [vmem:[#allocation48_spill] sm:$0xff] %v3226_v46  ;;  %977 = vperm.xlu0 %2813, %v2960_v9   ;;  %vm537_vm13 = vcmp.le.f32.partialorder %v510_v19, %v3247_v43  ;;  %vm539_vm1 = vcmp.le.f32.partialorder %v518_v54, %v3247_v43  ;;  %vm536_vm3 = vcmp.le.f32.partialorder %v506_v0, %v3247_v43 }
  0xfe   : > { %7502 = vst [vmem:[#allocation53_spill] sm:$0xff] %v3247_v43 }
 0x100   : > { %917 = vperm.xlu1 %2811, %v2984_v15   ;;  %v3231_v32 = vpop.permute.xlu1 %569  ;;  %v3233_v61 = vpop.permute.xlu0 %589 }
 0x101   : > { %7498 = vst [vmem:[#allocation49_spill] sm:$0xff] %v3231_v32  ;;  %7499 = vst [vmem:[#allocation50_spill] sm:$0xff] %v3233_v61  ;;  %985 = vperm.xlu0 %2813, %v2968_v11  }
 0x104   : > { %2814 = vset.pattern.permute.xlu1 %v2875_v50  ;;  %v3242_v46 = vpop.permute.xlu1 %577  ;;  %v598_v38 = vpop.permute.xlu0 %597 }
 0x105   : > { %7501 = vst [vmem:[#allocation52_spill] sm:$0xff] %v3242_v46  ;;  %vm621_vm12 = vcmp.le.f32.partialorder %v3240_v25, %v598_v38  ;;  %945 = vperm.xlu1 %2814, %v2939_v4   ;;  %993 = vperm.xlu0 %2813, %v2976_v13   ;;  %v7546_v38 = vmov 0 }
 0x106   : > { %vm3253_vm14 = vmand %vm537_vm13, %vm621_vm12  ;;  %vm538_vm12 = vcmp.le.f32.partialorder %v3199_v52, %v3247_v43 }
 0x107   : > { %vm653_vm15 = vmand %vm3145_vm5, %vm3253_vm14 }
 0x108   : > { %v3257_v50 = vpop.permute.xlu1 %585  ;;  %v606_v61 = vpop.permute.xlu0 %605 }
 0x109   : > { %7505 = vst [vmem:[#allocation54_spill] sm:$0xff] %v3257_v50  ;;  %vm623_vm0 = vcmp.le.f32.partialorder %v3240_v25, %v606_v61  ;;  %949 = vperm.xlu1 %2814, %v2928_v1   ;;  %1001 = vperm.xlu0 %2813, %v2984_v15   ;;  %v2876_v61 = vmov 8  }
 0x10a   : > { %vm3267_vm2 = vmand %vm539_vm1, %vm623_vm0 }
 0x10b   : > { %vm655_vm6 = vmand %vm3159_vm11, %vm3267_vm2 }
 0x10c   : > { %v594_v19 = vpop.permute.xlu1 %593 }
 0x10d   : > { %vm620_vm7 = vcmp.le.f32.partialorder %v3240_v25, %v594_v19  ;;  %957 = vperm.xlu1 %2814, %v2947_v6   ;;  %2816 = vset.pattern.permute.xlu0 %v2876_v61  ;;  %v3278_v27 = vpop.permute.xlu0 %661 }
 0x10e   : > { %7508 = vst [vmem:[#allocation55_spill] sm:$0xff] %v3278_v27  ;;  %vm3280_vm8 = vmand %vm536_vm3, %vm620_vm7  ;;  %1045 = vperm.xlu0 %2816, %v2939_v4  }
 0x10f   : > { %vm652_vm9 = vmand %vm3141_vm4, %vm3280_vm8 }
 0x110   : > { %v602_v0 = vpop.permute.xlu1 %601 }
 0x111   : > { %vm622_vm13 = vcmp.le.f32.partialorder %v3240_v25, %v602_v0  ;;  %965 = vperm.xlu1 %2814, %v2955_v8   ;;  %v3293_v19 = vpop.permute.xlu0 %673 }
 0x112   : > { %7511 = vst [vmem:[#allocation56_spill] sm:$0xff] %v3293_v19  ;;  %vm3295_vm0 = vmand %vm538_vm12, %vm622_vm13  ;;  %1057 = vperm.xlu0 %2816, %v2947_v6  }
 0x113   : > { %vm7550_vm4 = vmand %vm3155_vm10, %vm3295_vm0 }
 0x115   : > { %973 = vperm.xlu1 %2814, %v2963_v10   ;;  %v3305_v52 = vpop.permute.xlu1 %657  ;;  %v3307_v0 = vpop.permute.xlu0 %681 }
 0x116   : > { %7514 = vst [vmem:[#allocation57_spill] sm:$0xff] %v3305_v52  ;;  %7515 = vst [vmem:[#allocation58_spill] sm:$0xff] %v3307_v0  ;;  %1065 = vperm.xlu0 %2816, %v2955_v8  }
 0x119   : > { %981 = vperm.xlu1 %2814, %v2971_v12   ;;  %v3311_v62 = vpop.permute.xlu1 %665  ;;  %v3313_v48 = vpop.permute.xlu0 %689 }
 0x11a   : > { %7516 = vst [vmem:[#allocation59_spill] sm:$0xff] %v3311_v62  ;;  %7517 = vst [vmem:[#allocation60_spill] sm:$0xff] %v3313_v48  ;;  %1073 = vperm.xlu0 %2816, %v2963_v10  }
 0x11d   : > { %989 = vperm.xlu1 %2814, %v2979_v14   ;;  %v3317_v30 = vpop.permute.xlu1 %669  ;;  %v3319_v46 = vpop.permute.xlu0 %697 }
 0x11e   : > { %7518 = vst [vmem:[#allocation61_spill] sm:$0xff] %v3317_v30  ;;  %7519 = vst [vmem:[#allocation62_spill] sm:$0xff] %v3319_v46  ;;  %1081 = vperm.xlu0 %2816, %v2971_v12   ;;  %v2877_v30 = vmov 9  }
 0x121   : > { %997 = vperm.xlu1 %2814, %v2987_v16   ;;  %v3323_v57 = vpop.permute.xlu1 %677  ;;  %v3325_v0 = vpop.permute.xlu0 %705 }
 0x122   : > { %7520 = vst [vmem:[#allocation63_spill] sm:$0xff] %v3323_v57  ;;  %1089 = vperm.xlu0 %2816, %v2979_v14  }
 0x125   : > { %2815 = vset.pattern.permute.xlu1 %v2876_v61  ;;  %v3328_v48 = vpop.permute.xlu1 %685  ;;  %v3330_v22 = vpop.permute.xlu0 %713 }
 0x126   : > { %7521 = vst [vmem:[#allocation64_spill] sm:$0xff] %v3328_v48  ;;  %1041 = vperm.xlu1 %2815, %v2931_v2   ;;  %1097 = vperm.xlu0 %2816, %v2987_v16  }
 0x129   : > { %v3334_v46 = vpop.permute.xlu1 %693 }
 0x12a   : > { %7522 = vst [vmem:[#allocation65_spill] sm:$0xff] %v3334_v46  ;;  %1049 = vperm.xlu1 %2815, %v2928_v1   ;;  %2817 = vset.pattern.permute.xlu0 %v2877_v30  ;;  %v3337_v57 = vpop.permute.xlu0 %745 }
 0x12b   : > { %7523 = vst [vmem:[#allocation66_spill] sm:$0xff] %v3337_v57  ;;  %1357 = vperm.xlu0 %2817, %v2931_v2  }
 0x12d   : > { %v3340_v35 = vpop.permute.xlu1 %701 }
 0x12e   : > { %7524 = vst [vmem:[#allocation67_spill] sm:$0xff] %v3340_v35  ;;  %1053 = vperm.xlu1 %2815, %v2936_v3   ;;  %v3343_v61 = vpop.permute.xlu0 %757 }
 0x12f   : > { %7525 = vst [vmem:[#allocation68_spill] sm:$0xff] %v3343_v61  ;;  %1369 = vperm.xlu0 %2817, %v2936_v3  }
 0x131   : > { %v710_v48 = vpop.permute.xlu1 %709 }
 0x132   : > { %1061 = vperm.xlu1 %2815, %v2944_v5   ;;  %v3347_v46 = vpop.permute.xlu0 %765 }
 0x133   : > { %7526 = vst [vmem:[#allocation69_spill] sm:$0xff] %v3347_v46  ;;  %1377 = vperm.xlu0 %2817, %v2944_v5  }
 0x135   : > { %v718_v41 = vpop.permute.xlu1 %717 }
 0x136   : > { %1069 = vperm.xlu1 %2815, %v2952_v7   ;;  %v3351_v62 = vpop.permute.xlu0 %773 }
 0x137   : > { %7527 = vst [vmem:[#allocation70_spill] sm:$0xff] %v3351_v62  ;;  %1385 = vperm.xlu0 %2817, %v2952_v7   ;;  %v7277_v62 = vsub.s32 5, %v3100_v47 }
 0x13a   : > { %1077 = vperm.xlu1 %2815, %v2960_v9   ;;  %v3355_v35 = vpop.permute.xlu1 %749  ;;  %v3357_v61 = vpop.permute.xlu0 %781 }
 0x13b   : > { %7528 = vst [vmem:[#allocation71_spill] sm:$0xff] %v3355_v35  ;;  %7529 = vst [vmem:[#allocation72_spill] sm:$0xff] %v3357_v61  ;;  %1393 = vperm.xlu0 %2817, %v2960_v9  }
 0x13e   : > { %1085 = vperm.xlu1 %2815, %v2968_v11   ;;  %v3362_v46 = vpop.permute.xlu1 %753  ;;  %v3364_v45 = vpop.permute.xlu0 %789 }
 0x13f   : > { %7530 = vst [vmem:[#allocation73_spill] sm:$0xff] %v3362_v46  ;;  %7531 = vst [vmem:[#allocation74_spill] sm:$0xff] %v3364_v45  ;;  %1401 = vperm.xlu0 %2817, %v2968_v11   ;;  %v3379_v46 = vrot.slane %v3116_v51, %v7277_v62  ;;  %v7536_v62 = vmov 0 }
 0x141   : > { %7534 = vst [vmem:[#allocation77_spill] sm:$0xff] %v3379_v46  ;;  %vm737_vm7 = vcmp.le.f32.partialorder %v710_v48, %v3379_v46  ;;  %v7540_v48 = vmov 0  ;;  %vm736_vm11 = vcmp.le.f32.partialorder %v3325_v0, %v3379_v46 }
 0x142   : > { %1093 = vperm.xlu1 %2815, %v2976_v13   ;;  %v3374_v61 = vpop.permute.xlu1 %761  ;;  %v798_v32 = vpop.permute.xlu0 %797 }
 0x143   : > { %7533 = vst [vmem:[#allocation76_spill] sm:$0xff] %v3374_v61  ;;  %vm821_vm3 = vcmp.le.f32.partialorder %v3371_v28, %v798_v32  ;;  %1409 = vperm.xlu0 %2817, %v2976_v13  }
 0x144   : > { %vm837_vm12 = vmand %vm737_vm7, %vm821_vm3  ;;  %vm739_vm3 = vcmp.le.f32.partialorder %v718_v41, %v3379_v46 }
 0x145   : > { %vm3392_vm13 = vmand %vm653_vm15, %vm837_vm12 }
 0x146   : > { %1101 = vperm.xlu1 %2815, %v2984_v15   ;;  %v3385_v29 = vpop.permute.xlu1 %769  ;;  %v806_v45 = vpop.permute.xlu0 %805  ;;  %v7537_v62 = vsel %vm3392_vm13, 4294967295, %v7536_v62 }
 0x147   : > { %7535 = vst [vmem:[#allocation78_spill] sm:$0xff] %v3385_v29  ;;  %7538 = vst [vmem:[#allocation79_spill] sm:$0xff] %v7537_v62  ;;  %vm823_vm1 = vcmp.le.f32.partialorder %v3371_v28, %v806_v45  ;;  %1417 = vperm.xlu0 %2817, %v2984_v15   ;;  %v2878_v45 = vmov 10  }
 0x148   : > { %vm839_vm7 = vmand %vm739_vm3, %vm823_vm1 }
 0x149   : > { %vm3406_vm5 = vmand %vm655_vm6, %vm839_vm7  ;;  %vm738_vm6 = vcmp.le.f32.partialorder %v3330_v22, %v3379_v46 }
 0x14a   : > { %2818 = vset.pattern.permute.xlu1 %v2877_v30  ;;  %v3399_v32 = vpop.permute.xlu1 %777  ;;  %v7541_v48 = vsel %vm3406_vm5, 4294967295, %v7540_v48 }
 0x14b   : > { %7539 = vst [vmem:[#allocation80_spill] sm:$0xff] %v3399_v32  ;;  %7542 = vst [vmem:[#allocation81_spill] sm:$0xff] %v7541_v48  ;;  %1361 = vperm.xlu1 %2818, %v2939_v4   ;;  %2820 = vset.pattern.permute.xlu0 %v2878_v45  ;;  %v3411_v53 = vpop.permute.xlu0 %861  ;;  %v2879_v32 = vmov 11  }
 0x14c   : > { %1441 = vperm.xlu0 %2820, %v2939_v4  }
 0x14e   : > { %v3414_v30 = vpop.permute.xlu1 %785 }
 0x14f   : > { %7543 = vst [vmem:[#allocation82_spill] sm:$0xff] %v3414_v30  ;;  %1365 = vperm.xlu1 %2818, %v2928_v1   ;;  %v3417_v41 = vpop.permute.xlu0 %873 }
 0x150   : > { %7544 = vst [vmem:[#allocation83_spill] sm:$0xff] %v3417_v41  ;;  %1453 = vperm.xlu0 %2820, %v2947_v6  }
 0x152   : > { %v794_v60 = vpop.permute.xlu1 %793 }
 0x153   : > { %vm820_vm14 = vcmp.le.f32.partialorder %v3371_v28, %v794_v60  ;;  %1373 = vperm.xlu1 %2818, %v2947_v6   ;;  %v3424_v17 = vpop.permute.xlu0 %881 }
 0x154   : > { %7545 = vst [vmem:[#allocation84_spill] sm:$0xff] %v3424_v17  ;;  %vm836_vm15 = vmand %vm736_vm11, %vm820_vm14  ;;  %1461 = vperm.xlu0 %2820, %v2955_v8   ;;  %v922_v17 = vsub.s32 6, %v3100_v47 }
 0x155   : > { %vm3432_vm2 = vmand %vm652_vm9, %vm836_vm15 }
 0x156   : > { %v7547_v38 = vsel %vm3432_vm2, 4294967295, %v7546_v38  ;;  %v802_v48 = vpop.permute.xlu1 %801 }
 0x157   : > { %7548 = vst [vmem:[#allocation85_spill] sm:$0xff] %v7547_v38  ;;  %vm822_vm1 = vcmp.le.f32.partialorder %v3371_v28, %v802_v48  ;;  %1381 = vperm.xlu1 %2818, %v2955_v8   ;;  %v3440_v0 = vpop.permute.xlu0 %889 }
 0x158   : > { %7549 = vst [vmem:[#allocation86_spill] sm:$0xff] %v3440_v0  ;;  %vm838_vm12 = vmand %vm738_vm6, %vm822_vm1  ;;  %1469 = vperm.xlu0 %2820, %v2963_v10  }
 0x159   : > { %vm3448_vm8 = vmand %vm7550_vm4, %vm838_vm12 }
 0x15a   : > { %v7552_v59 = vsel %vm3448_vm8, 4294967295, %v7551_v59 }
 0x15b   : > { %7553 = vst [vmem:[#allocation87_spill] sm:$0xff] %v7552_v59  ;;  %1389 = vperm.xlu1 %2818, %v2963_v10   ;;  %v3453_v22 = vpop.permute.xlu1 %857  ;;  %v3455_v54 = vpop.permute.xlu0 %897 }
 0x15c   : > { %7554 = vst [vmem:[#allocation88_spill] sm:$0xff] %v3455_v54  ;;  %1477 = vperm.xlu0 %2820, %v2971_v12   ;;  %v1006_v54 = vsub.s32 7, %v3100_v47 }
 0x15f   : > { %1397 = vperm.xlu1 %2818, %v2971_v12   ;;  %v3459_v48 = vpop.permute.xlu1 %865  ;;  %v3461_v63 = vpop.permute.xlu0 %905 }
 0x160   : > { %7555 = vst [vmem:[#allocation89_spill] sm:$0xff] %v3461_v63  ;;  %1485 = vperm.xlu0 %2820, %v2979_v14  }
 0x163   : > { %1405 = vperm.xlu1 %2818, %v2979_v14   ;;  %v3465_v50 = vpop.permute.xlu1 %869  ;;  %v3467_v60 = vpop.permute.xlu0 %913 }
 0x164   : > { %7556 = vst [vmem:[#allocation90_spill] sm:$0xff] %v3467_v60  ;;  %1493 = vperm.xlu0 %2820, %v2987_v16  }
 0x167   : > { %1413 = vperm.xlu1 %2818, %v2987_v16   ;;  %v3471_v62 = vpop.permute.xlu1 %877 }
 0x168   : > { %v3473_v30 = vpop.permute.xlu0 %941  ;;  %2821 = vset.pattern.permute.xlu0 %v2879_v32 }
 0x169   : > { %1533 = vperm.xlu0 %2821, %v2931_v2  }
 0x16b   : > { %2819 = vset.pattern.permute.xlu1 %v2878_v45  ;;  %v3476_v29 = vpop.permute.xlu1 %885 }
 0x16c   : > { %1437 = vperm.xlu1 %2819, %v2931_v2   ;;  %v3479_v59 = vpop.permute.xlu0 %953 }
 0x16d   : > { %1545 = vperm.xlu0 %2821, %v2936_v3  }
 0x16f   : > { %v3482_v36 = vpop.permute.xlu1 %893 }
 0x170   : > { %1445 = vperm.xlu1 %2819, %v2928_v1   ;;  %v3485_v20 = vpop.permute.xlu0 %961 }
 0x171   : > { %1553 = vperm.xlu0 %2821, %v2944_v5  }
 0x173   : > { %v3488_v61 = vpop.permute.xlu1 %901 }
 0x174   : > { %1449 = vperm.xlu1 %2819, %v2936_v3   ;;  %v3491_v45 = vpop.permute.xlu0 %969 }
 0x175   : > { %1561 = vperm.xlu0 %2821, %v2952_v7  }
 0x177   : > { %v3494_v19 = vpop.permute.xlu1 %909 }
 0x178   : > { %1457 = vperm.xlu1 %2819, %v2944_v5   ;;  %v3497_v33 = vpop.permute.xlu0 %977 }
 0x179   : > { %1569 = vperm.xlu0 %2821, %v2960_v9  }
 0x17b   : > { %v3500_v40 = vpop.permute.xlu1 %917 }
 0x17c   : > { %1465 = vperm.xlu1 %2819, %v2952_v7   ;;  %v3503_v52 = vpop.permute.xlu0 %985 }
 0x17d   : > { %1577 = vperm.xlu0 %2821, %v2968_v11  }
 0x180   : > { %1473 = vperm.xlu1 %2819, %v2960_v9   ;;  %v3507_v49 = vpop.permute.xlu1 %945  ;;  %v3509_v57 = vpop.permute.xlu0 %993 }
 0x181   : > { %1585 = vperm.xlu0 %2821, %v2976_v13  }
 0x184   : > { %1481 = vperm.xlu1 %2819, %v2968_v11   ;;  %v3513_v38 = vpop.permute.xlu1 %949  ;;  %v3515_v42 = vpop.permute.xlu0 %1001 }
 0x185   : > { %1593 = vperm.xlu0 %2821, %v2984_v15  }
 0x188   : > { %1489 = vperm.xlu1 %2819, %v2976_v13   ;;  %v3519_v26 = vpop.permute.xlu1 %957 }
 0x189   : > { %7557 = vst [vmem:[#allocation91_spill] sm:$0xff] %v3519_v26  ;;  %v3521_v58 = vpop.permute.xlu0 %1045  ;;  %2824 = vset.pattern.permute.xlu0 %v2880_v34  ;;  %v7572_v26 = vsub.s32 1, %v3100_v47 }
 0x18a   : > { %1841 = vperm.xlu0 %2824, %v2939_v4  }
 0x18c   : > { %1497 = vperm.xlu1 %2819, %v2984_v15   ;;  %v3525_v18 = vpop.permute.xlu1 %965 }
 0x18d   : > { %7558 = vst [vmem:[#allocation92_spill] sm:$0xff] %v3525_v18  ;;  %v3527_v39 = vpop.permute.xlu0 %1057 }
 0x18e   : > { %7559 = vst [vmem:[#allocation93_spill] sm:$0xff] %v3527_v39  ;;  %1853 = vperm.xlu0 %2824, %v2947_v6  }
 0x190   : > { %2822 = vset.pattern.permute.xlu1 %v2879_v32  ;;  %v3530_v21 = vpop.permute.xlu1 %973 }
 0x191   : > { %1537 = vperm.xlu1 %2822, %v2939_v4   ;;  %v3533_v31 = vpop.permute.xlu0 %1065 }
 0x192   : > { %7560 = vst [vmem:[#allocation94_spill] sm:$0xff] %v3533_v31  ;;  %1861 = vperm.xlu0 %2824, %v2955_v8  }
 0x194   : > { %v3536_v28 = vpop.permute.xlu1 %981 }
 0x195   : > { %7561 = vst [vmem:[#allocation95_spill] sm:$0xff] %v3536_v28  ;;  %1541 = vperm.xlu1 %2822, %v2928_v1   ;;  %v3539_v35 = vpop.permute.xlu0 %1073 }
 0x196   : > { %7562 = vst [vmem:[#allocation96_spill] sm:$0xff] %v3539_v35  ;;  %1869 = vperm.xlu0 %2824, %v2963_v10   ;;  %v7316_v35 = vmov 14  }
 0x198   : > { %v3542_v27 = vpop.permute.xlu1 %989 }
 0x199   : > { %7563 = vst [vmem:[#allocation97_spill] sm:$0xff] %v3542_v27  ;;  %1549 = vperm.xlu1 %2822, %v2947_v6   ;;  %v3545_v32 = vpop.permute.xlu0 %1081 }
 0x19a   : > { %7564 = vst [vmem:[#allocation98_spill] sm:$0xff] %v3545_v32  ;;  %1877 = vperm.xlu0 %2824, %v2971_v12  }
 0x19c   : > { %v3548_v46 = vpop.permute.xlu1 %997 }
 0x19d   : > { %7565 = vst [vmem:[#allocation99_spill] sm:$0xff] %v3548_v46  ;;  %1557 = vperm.xlu1 %2822, %v2955_v8   ;;  %v3551_v25 = vpop.permute.xlu0 %1089 }
 0x19e   : > { %7566 = vst [vmem:[#allocation100_spill] sm:$0xff] %v3551_v25  ;;  %1885 = vperm.xlu0 %2824, %v2979_v14  }
 0x1a1   : > { %1565 = vperm.xlu1 %2822, %v2963_v10   ;;  %v3555_v44 = vpop.permute.xlu1 %1041  ;;  %v3557_v23 = vpop.permute.xlu0 %1097 }
 0x1a2   : > { %7567 = vst [vmem:[#allocation101_spill] sm:$0xff] %v3557_v23  ;;  %1893 = vperm.xlu0 %2824, %v2987_v16  }
 0x1a5   : > { %1573 = vperm.xlu1 %2822, %v2971_v12   ;;  %v3561_v43 = vpop.permute.xlu1 %1049 }
 0x1a6   : > { %7568 = vst [vmem:[#allocation102_spill] sm:$0xff] %v3561_v43  ;;  %v3563_v56 = vpop.permute.xlu0 %1357  ;;  %2825 = vset.pattern.permute.xlu0 %v2881_v37  ;;  %v3640_v43 = vrot.slane %v3116_v51, %v922_v17 }
 0x1a7   : > { %1917 = vperm.xlu0 %2825, %v2931_v2  }
 0x1a8   : > { %vm924_vm1 = vcmp.eq.f32.partialorder %v3453_v22, %v3640_v43 }
 0x1a9   : > { %1581 = vperm.xlu1 %2822, %v2979_v14   ;;  %v3567_v24 = vpop.permute.xlu1 %1053 }
 0x1aa   : > { %v3569_v55 = vpop.permute.xlu0 %1369 }
 0x1ab   : > { %1929 = vperm.xlu0 %2825, %v2936_v3  }
 0x1ad   : > { %1589 = vperm.xlu1 %2822, %v2987_v16   ;;  %v3573_v23 = vpop.permute.xlu1 %1061 }
 0x1ae   : > { %v3575_v25 = vpop.permute.xlu0 %1377 }
 0x1af   : > { %1937 = vperm.xlu0 %2825, %v2944_v5  }
 0x1b1   : > { %2823 = vset.pattern.permute.xlu1 %v2880_v34  ;;  %v3578_v31 = vpop.permute.xlu1 %1069 }
 0x1b2   : > { %1837 = vperm.xlu1 %2823, %v2931_v2   ;;  %v3581_v60 = vpop.permute.xlu0 %1385 }
 0x1b3   : > { %1945 = vperm.xlu0 %2825, %v2952_v7  }
 0x1b5   : > { %v3584_v46 = vpop.permute.xlu1 %1077 }
 0x1b6   : > { %1845 = vperm.xlu1 %2823, %v2928_v1   ;;  %v3587_v16 = vpop.permute.xlu0 %1393 }
 0x1b7   : > { %1953 = vperm.xlu0 %2825, %v2960_v9  }
 0x1b9   : > { %v3590_v32 = vpop.permute.xlu1 %1085 }
 0x1ba   : > { %1849 = vperm.xlu1 %2823, %v2936_v3   ;;  %v3593_v34 = vpop.permute.xlu0 %1401 }
 0x1bb   : > { %1961 = vperm.xlu0 %2825, %v2968_v11  }
 0x1bd   : > { %v3596_v2 = vpop.permute.xlu1 %1093 }
 0x1be   : > { %1857 = vperm.xlu1 %2823, %v2944_v5   ;;  %v3599_v63 = vpop.permute.xlu0 %1409 }
 0x1bf   : > { %1969 = vperm.xlu0 %2825, %v2976_v13  }
 0x1c1   : > { %v3602_v1 = vpop.permute.xlu1 %1101 }
 0x1c2   : > { %1865 = vperm.xlu1 %2823, %v2952_v7   ;;  %v3605_v27 = vpop.permute.xlu0 %1417 }
 0x1c3   : > { %1977 = vperm.xlu0 %2825, %v2984_v15  }
 0x1c6   : > { %1873 = vperm.xlu1 %2823, %v2960_v9   ;;  %v3609_v3 = vpop.permute.xlu1 %1361 }
 0x1c7   : > { %v3611_v39 = vpop.permute.xlu0 %1441  ;;  %2828 = vset.pattern.permute.xlu0 %v7316_v35 }
 0x1c8   : > { %2017 = vperm.xlu0 %2828, %v2939_v4  }
 0x1ca   : > { %1881 = vperm.xlu1 %2823, %v2968_v11   ;;  %v3616_v5 = vpop.permute.xlu1 %1365  ;;  %v255_v11 = vld [vmem:[%s3106_s20 + $0x8] sm:$0xff] }
 0x1cb   : > { %7569 = vst [vmem:[#allocation103_spill] sm:$0xff] %v3616_v5  ;;  %v1454_v7 = vpop.permute.xlu0 %1453  ;;  %v3644_v0 = vrot.slane %v255_v11, %v7572_v26  ;;  %v3677_v26 = vld [vmem:[%s2925_s16 + $0x10] sm:$0xff] }
 0x1cc   : > { %2029 = vperm.xlu0 %2828, %v2947_v6   ;;  %v7570_v6 = vsub.s32 2, %v3100_v47 }
 0x1cd   : > { %vm1144_vm12 = vcmp.eq.f32.partialorder %v3453_v22, %v3644_v0 }
 0x1ce   : > { %1889 = vperm.xlu1 %2823, %v2976_v13   ;;  %v1374_v9 = vpop.permute.xlu1 %1373  ;;  %v3630_v5 = vrot.slane %v255_v11, %v7570_v6  ;;  %v3633_v13 = vrot.slane %v3116_v51, %v1006_v54  ;;  %v7629_v51 = vmov 0 }
 0x1cf   : > { %v1462_v18 = vpop.permute.xlu0 %1461  ;;  %vm1424_vm10 = vcmp.eq.f32.partialorder %v1374_v9, %v3640_v43  ;;  %vm7582_vm7 = vcmp.eq.f32.partialorder %v1374_v9, %v3644_v0 }
 0x1d0   : > { %2037 = vperm.xlu0 %2828, %v2955_v8   ;;  %v7571_v8 = vsub.s32 5, %v3100_v47  ;;  %vm1504_vm9 = vcmp.eq.f32.partialorder %v1454_v7, %v3633_v13  ;;  %vm1008_vm0 = vcmp.eq.f32.partialorder %v3473_v30, %v3633_v13  ;;  %vm1164_vm3 = vcmp.eq.f32.partialorder %v3473_v30, %v3630_v5 }
 0x1d1   : > { %vm3670_vm4 = vmand %vm1424_vm10, %vm1504_vm9  ;;  %vm1506_vm11 = vcmp.eq.f32.partialorder %v1462_v18, %v3633_v13  ;;  %vm7581_vm9 = vcmp.eq.f32.partialorder %v1454_v7, %v3630_v5 }
 0x1d2   : > { %1897 = vperm.xlu1 %2823, %v2984_v15   ;;  %v1382_v35 = vpop.permute.xlu1 %1381  ;;  %v3637_v41 = vrot.slane %v255_v11, %v7571_v8  ;;  %vm3685_vm6 = vmand %vm924_vm1, %vm1008_vm0  ;;  %vm1666_vm1 = vcmp.eq.f32.partialorder %v1462_v18, %v3630_v5 }
 0x1d3   : > { %v3624_v28 = vpop.permute.xlu0 %1469  ;;  %vm3692_vm10 = vmand %vm1144_vm12, %vm1164_vm3  ;;  %vm1650_vm0 = vcmp.eq.f32.partialorder %v1382_v35, %v3644_v0  ;;  %vm7594_vm2 = vcmp.eq.f32.partialorder %v1382_v35, %v3640_v43 }
 0x1d4   : > { %2045 = vperm.xlu0 %2828, %v2963_v10   ;;  %v7573_v10 = vsub.s32 4, %v3100_v47  ;;  %vm3700_vm14 = vmand %vm7582_vm7, %vm7581_vm9  ;;  %vm7586_vm3 = vcmp.eq.f32.partialorder %v3473_v30, %v3637_v41  ;;  %vm7589_vm5 = vcmp.eq.f32.partialorder %v1454_v7, %v3637_v41  ;;  %vm1762_vm8 = vcmp.eq.f32.partialorder %v1462_v18, %v3637_v41  ;;  %v2830_v18 = vld [vmem:[%s2925_s16 + $0x20] sm:$0xff] }
 0x1d6   : > { %2826 = vset.pattern.permute.xlu1 %v2881_v37  ;;  %v1390_v15 = vpop.permute.xlu1 %1389  ;;  %v3649_v6 = vrot.slane %v255_v11, %v7573_v10  ;;  %v7591_v10 = vmov 0  ;;  %v7674_v37 = vmov 14  }
 0x1d7   : > { %1921 = vperm.xlu1 %2826, %v2939_v4   ;;  %v3653_v54 = vpop.permute.xlu0 %1477 }
 0x1d8   : > { %2053 = vperm.xlu0 %2828, %v2971_v12   ;;  %v7574_v12 = vmov 0  ;;  %vm1252_vm15 = vcmp.eq.f32.partialorder %v3453_v22, %v3649_v6  ;;  %v7583_v22 = vmov 0  ;;  %vm7590_vm7 = vcmp.eq.f32.partialorder %v1374_v9, %v3649_v6 }
 0x1d9   : > { %v7575_v12 = vsel %vm3670_vm4, 4294967295, %v7574_v12  ;;  %v7584_v22 = vsel %vm3700_vm14, 4294967295, %v7583_v22  ;;  %vm3710_vm12 = vmand %vm1252_vm15, %vm7586_vm3  ;;  %vm1746_vm13 = vcmp.eq.f32.partialorder %v1382_v35, %v3649_v6  ;;  %vm1428_vm15 = vcmp.eq.f32.partialorder %v1390_v15, %v3640_v43 }
 0x1da   : > { %v1398_v4 = vpop.permute.xlu1 %1397  ;;  %7576 = vst [vmem:[#allocation104_spill] sm:$0xff] %v7575_v12  ;;  %7585 = vst [vmem:[#allocation105_spill] sm:$0xff] %v7584_v22  ;;  %vm1508_vm3 = vcmp.eq.f32.partialorder %v3624_v28, %v3633_v13  ;;  %v7598_v9 = vmov 0  ;;  %v7601_v35 = vsub.s32 3, %v3100_v47  ;;  %v7603_v12 = vmov 0 }
 0x1db   : > { %1925 = vperm.xlu1 %2826, %v3677_v26   ;;  %vm3718_vm9 = vmand %vm7590_vm7, %vm7589_vm5  ;;  %v1486_v7 = vpop.permute.xlu0 %1485  ;;  %vm7610_vm7 = vcmp.eq.f32.partialorder %v1390_v15, %v3649_v6 }
 0x1dc   : > { %2061 = vperm.xlu0 %2828, %v2979_v14   ;;  %v7592_v10 = vsel %vm3718_vm9, 4294967295, %v7591_v10  ;;  %vm3726_vm14 = vmand %vm7594_vm2, %vm1506_vm11  ;;  %v7595_v14 = vmov 0  ;;  %vm1668_vm9 = vcmp.eq.f32.partialorder %v3624_v28, %v3630_v5 }
 0x1dd   : > { %7593 = vst [vmem:[#allocation106_spill] sm:$0xff] %v7592_v10  ;;  %v7596_v14 = vsel %vm3726_vm14, 4294967295, %v7595_v14  ;;  %vm3733_vm5 = vmand %vm1650_vm0, %vm1666_vm1  ;;  %v7602_v10 = vsub.s32 0, %v3100_v47  ;;  %vm1764_vm0 = vcmp.eq.f32.partialorder %v3624_v28, %v3637_v41  ;;  %vm1510_vm1 = vcmp.eq.f32.partialorder %v3653_v54, %v3633_v13  ;;  %v2832_v28 = vld [vmem:[%s2925_s16 + $0x30] sm:$0xff] }
 0x1de   : > { %7597 = vst [vmem:[#allocation107_spill] sm:$0xff] %v7596_v14  ;;  %v1406_v30 = vpop.permute.xlu1 %1405  ;;  %v7599_v9 = vsel %vm3733_vm5, 4294967295, %v7598_v9  ;;  %v3743_v14 = vrot.slane %v255_v11, %v7601_v35  ;;  %vm3749_vm2 = vmand %vm1746_vm13, %vm1762_vm8  ;;  %vm1430_vm8 = vcmp.eq.f32.partialorder %v1398_v4, %v3640_v43  ;;  %v7611_v35 = vmov 0 }
 0x1df   : > { %7600 = vst [vmem:[#allocation108_spill] sm:$0xff] %v7599_v9  ;;  %1933 = vperm.xlu1 %2826, %v2830_v18   ;;  %v3747_v22 = vrot.slane %v255_v11, %v7602_v10  ;;  %v7604_v12 = vsel %vm3749_vm2, 4294967295, %v7603_v12  ;;  %v3757_v9 = vld [vmem:[%s2925_s16 + $0x70] sm:$0xff]  ;;  %v3760_v18 = vrot.slane %v255_v11, %v922_v17  ;;  %vm3767_vm13 = vmand %vm1428_vm15, %vm1508_vm3  ;;  %v7605_v10 = vmov 0 }
 0x1e0   : > { %2069 = vperm.xlu0 %2828, %v3757_v9   ;;  %v7606_v10 = vsel %vm3767_vm13, 4294967295, %v7605_v10  ;;  %vm7607_vm2 = vcmp.eq.f32.partialorder %v1390_v15, %v3644_v0  ;;  %v7608_v17 = vmov 0  ;;  %vm1670_vm13 = vcmp.eq.f32.partialorder %v3653_v54, %v3630_v5  ;;  %vm3794_vm5 = vmand %vm7610_vm7, %vm1764_vm0  ;;  %v1494_v15 = vpop.permute.xlu0 %1493 }
 0x1e1   : > { %vm3783_vm15 = vmand %vm7607_vm2, %vm1668_vm9  ;;  %v7612_v35 = vsel %vm3794_vm5, 4294967295, %v7611_v35  ;;  %vm1750_vm9 = vcmp.eq.f32.partialorder %v1398_v4, %v3649_v6  ;;  %vm1766_vm2 = vcmp.eq.f32.partialorder %v3653_v54, %v3637_v41  ;;  %v7614_v47 = vmov 0 }
 0x1e2   : > { %v7609_v17 = vsel %vm3783_vm15, 4294967295, %v7608_v17  ;;  %v1414_v11 = vpop.permute.xlu1 %1413  ;;  %7613 = vst [vmem:[#allocation109_spill] sm:$0xff] %v7612_v35  ;;  %vm3802_vm3 = vmand %vm1430_vm8, %vm1510_vm1  ;;  %vm1432_vm11 = vcmp.eq.f32.partialorder %v1406_v30, %v3640_v43  ;;  %vm1512_vm15 = vcmp.eq.f32.partialorder %v1486_v7, %v3633_v13  ;;  %vm7616_vm7 = vcmp.eq.f32.partialorder %v3555_v44, %v3747_v22 }
 0x1e3   : > { %1941 = vperm.xlu1 %2826, %v2832_v28   ;;  %v7615_v47 = vsel %vm3802_vm3, 4294967295, %v7614_v47  ;;  %vm3813_vm0 = vmand %vm3685_vm6, %vm7616_vm7  ;;  %vm7619_vm8 = vcmp.eq.f32.partialorder %v3555_v44, %v3743_v14  ;;  %vm7622_vm3 = vcmp.eq.f32.partialorder %v1398_v4, %v3644_v0  ;;  %v7623_v28 = vmov 0 }
 0x1e4   : > { %vm3822_vm1 = vmand %vm3692_vm10, %vm7619_vm8  ;;  %vm1656_vm6 = vcmp.eq.f32.partialorder %v1406_v30, %v3644_v0  ;;  %vm1672_vm7 = vcmp.eq.f32.partialorder %v1486_v7, %v3630_v5  ;;  %vm7626_vm14 = vcmp.eq.f32.partialorder %v3555_v44, %v3760_v18  ;;  %v7631_v4 = vmov 0  ;;  %v2833_v44 = vld [vmem:[%s2925_s16 + $0x40] sm:$0xff] }
 0x1e5   : > { %vm3828_vm5 = vmand %vm7622_vm3, %vm1670_vm13  ;;  %vm1752_vm13 = vcmp.eq.f32.partialorder %v1406_v30, %v3649_v6  ;;  %vm1768_vm3 = vcmp.eq.f32.partialorder %v1486_v7, %v3637_v41  ;;  %v7637_v30 = vmov 0  ;;  %v7640_v7 = vmov 0 }
 0x1e6   : > { %v7624_v28 = vsel %vm3828_vm5, 4294967295, %v7623_v28  ;;  %vm3839_vm4 = vmand %vm3710_vm12, %vm7626_vm14  ;;  %vm1434_vm5 = vcmp.eq.f32.partialorder %v1414_v11, %v3640_v43  ;;  %vm1514_vm14 = vcmp.eq.f32.partialorder %v1494_v15, %v3633_v13  ;;  %v7670_v54 = vmov 0 }
 0x1e7   : > { %7625 = vst [vmem:[#allocation110_spill] sm:$0xff] %v7624_v28  ;;  %vm3843_vm10 = vmand %vm1750_vm9, %vm1766_vm2  ;;  %1949 = vperm.xlu1 %2826, %v2833_v44   ;;  %v1438_v8 = vpop.permute.xlu1 %1437  ;;  %v7634_v28 = vmov 0  ;;  %vm1658_vm9 = vcmp.eq.f32.partialorder %v1414_v11, %v3644_v0  ;;  %vm1674_vm2 = vcmp.eq.f32.partialorder %v1494_v15, %v3630_v5  ;;  %v7643_v44 = vmov 0 }
 0x1e8   : > { %v7630_v51 = vsel %vm3843_vm10, 4294967295, %v7629_v51  ;;  %vm3849_vm8 = vmand %vm1432_vm11, %vm1512_vm15  ;;  %vm1754_vm15 = vcmp.eq.f32.partialorder %v1414_v11, %v3649_v6  ;;  %v7646_v11 = vmov 0 }
 0x1e9   : > { %v7632_v4 = vsel %vm3849_vm8, 4294967295, %v7631_v4  ;;  %vm3856_vm12 = vmand %vm1656_vm6, %vm1672_vm7  ;;  %vm1770_vm8 = vcmp.eq.f32.partialorder %v1494_v15, %v3637_v41  ;;  %vm1500_vm6 = vcmp.eq.f32.partialorder %v1438_v8, %v3633_v13  ;;  %v1534_v15 = vpop.permute.xlu0 %1533 }
 0x1ea   : > { %7633 = vst [vmem:[#allocation111_spill] sm:$0xff] %v7632_v4  ;;  %v7635_v28 = vsel %vm3856_vm12, 4294967295, %v7634_v28  ;;  %vm3862_vm11 = vmand %vm1752_vm13, %vm1768_vm3  ;;  %vm1660_vm12 = vcmp.eq.f32.partialorder %v1438_v8, %v3630_v5  ;;  %vm1011_vm13 = vcmp.eq.f32.partialorder %v3479_v59, %v3633_v13  ;;  %vm1420_vm3 = vcmp.eq.f32.partialorder %v3563_v56, %v3640_v43 }
 0x1eb   : > { %7636 = vst [vmem:[#allocation112_spill] sm:$0xff] %v7635_v28  ;;  %v7638_v30 = vsel %vm3862_vm11, 4294967295, %v7637_v30  ;;  %vm3868_vm10 = vmand %vm1434_vm5, %vm1514_vm14  ;;  %v2834_v28 = vld [vmem:[%s2925_s16 + $0x50] sm:$0xff]  ;;  %vm1756_vm14 = vcmp.eq.f32.partialorder %v1438_v8, %v3637_v41  ;;  %vm1596_vm11 = vcmp.eq.f32.partialorder %v1534_v15, %v3747_v22  ;;  %v7660_v4 = vmov 0 }
 0x1ec   : > { %7639 = vst [vmem:[#allocation113_spill] sm:$0xff] %v7638_v30  ;;  %v7641_v7 = vsel %vm3868_vm10, 4294967295, %v7640_v7  ;;  %vm3873_vm7 = vmand %vm1658_vm9, %vm1674_vm2  ;;  %1957 = vperm.xlu1 %2826, %v2834_v28   ;;  %vm1644_vm2 = vcmp.eq.f32.partialorder %v3563_v56, %v3644_v0  ;;  %vm927_vm10 = vcmp.eq.f32.partialorder %v3465_v50, %v3640_v43  ;;  %vm1147_vm9 = vcmp.eq.f32.partialorder %v3465_v50, %v3644_v0 }
 0x1ed   : > { %7642 = vst [vmem:[#allocation114_spill] sm:$0xff] %v7641_v7  ;;  %v7644_v44 = vsel %vm3873_vm7, 4294967295, %v7643_v44  ;;  %vm3883_vm5 = vmand %vm1754_vm15, %vm1770_vm8  ;;  %vm1275_vm8 = vcmp.eq.f32.partialorder %v3479_v59, %v3637_v41  ;;  %vm1740_vm15 = vcmp.eq.f32.partialorder %v3563_v56, %v3649_v6  ;;  %v3917_v7 = vpop.permute.xlu1 %1445  ;;  %v2835_v56 = vld [vmem:[%s2925_s16 + $0x60] sm:$0xff]  ;;  %v7658_v30 = vmov 0  ;;  %v1546_v28 = vpop.permute.xlu0 %1545 }
 0x1ee   : > { %7645 = vst [vmem:[#allocation115_spill] sm:$0xff] %v7644_v44  ;;  %v7647_v11 = vsel %vm3883_vm5, 4294967295, %v7646_v11  ;;  %vm3892_vm7 = vmand %vm1420_vm3, %vm1500_vm6  ;;  %v2836_v44 = vld [vmem:[%s2925_s16] sm:$0xff]  ;;  %v7780_v8 = vmov 0 }
 0x1ef   : > { %7648 = vst [vmem:[#allocation116_spill] sm:$0xff] %v7647_v11  ;;  %vm3902_vm5 = vmand %vm1644_vm2, %vm1660_vm12  ;;  %v7653_v11 = vmov 0  ;;  %vm1255_vm12 = vcmp.eq.f32.partialorder %v3465_v50, %v3649_v6  ;;  %vm7657_vm2 = vcmp.eq.f32.partialorder %v3479_v59, %v3630_v5  ;;  %v2837_v59 = vld [vmem:[%s2925_s16 + $0x18] sm:$0xff] }
 0x1f0   : > { %vm3908_vm6 = vmand %vm927_vm10, %vm1011_vm13  ;;  %1965 = vperm.xlu1 %2826, %v2835_v56   ;;  %v2841_v56 = vld [vmem:[%s2925_s16 + $0x58] sm:$0xff] }
 0x1f1   : > { %v7654_v11 = vsel %vm3908_vm6, 4294967295, %v7653_v11  ;;  %vm3912_vm3 = vmand %vm1740_vm15, %vm1756_vm14  ;;  %v1450_v35 = vpop.permute.xlu1 %1449 }
 0x1f2   : > { %vm3925_vm10 = vmand %vm1147_vm9, %vm7657_vm2  ;;  %vm1692_vm9 = vcmp.eq.f32.partialorder %v1534_v15, %v3743_v14  ;;  %vm1013_vm2 = vcmp.eq.f32.partialorder %v3485_v20, %v3633_v13 }
 0x1f3   : > { %v7659_v30 = vsel %vm3925_vm10, 4294967295, %v7658_v30  ;;  %vm1232_vm13 = vmor %vm3813_vm0, %vm3822_vm1  ;;  %vm1169_vm10 = vcmp.eq.f32.partialorder %v3485_v20, %v3630_v5  ;;  %vm1277_vm1 = vcmp.eq.f32.partialorder %v3485_v20, %v3637_v41 }
 0x1f4   : > { %vm3933_vm14 = vmand %vm1255_vm12, %vm1275_vm8  ;;  %vm1788_vm8 = vcmp.eq.f32.partialorder %v1534_v15, %v3760_v18  ;;  %1973 = vperm.xlu1 %2826, %v3757_v9   ;;  %vm929_vm12 = vcmp.eq.f32.partialorder %v3471_v62, %v3640_v43  ;;  %v7668_v9 = vmov 0  ;;  %v7752_v15 = vmov 0 }
 0x1f5   : > { %v7661_v4 = vsel %vm3933_vm14, 4294967295, %v7660_v4  ;;  %vm3939_vm15 = vmor %vm1232_vm13, %vm3839_vm4  ;;  %vm1149_vm13 = vcmp.eq.f32.partialorder %v3471_v62, %v3644_v0  ;;  %v1458_v20 = vpop.permute.xlu1 %1457 }
 0x1f6   : > { %vm1612_vm0 = vmand %vm3892_vm7, %vm1596_vm11  ;;  %vm1257_vm7 = vcmp.eq.f32.partialorder %v3471_v62, %v3649_v6  ;;  %v7672_v62 = vmov 0 }
 0x1f7   : > { %vm1628_vm4 = vmor %vm3939_vm15, %vm1612_vm0  ;;  %vm1111_vm0 = vcmp.eq.f32.partialorder %v3567_v24, %v3747_v22 }
 0x1f8   : > { %vm1708_vm11 = vmand %vm3902_vm5, %vm1692_vm9  ;;  %vm1203_vm9 = vcmp.eq.f32.partialorder %v3567_v24, %v3743_v14  ;;  %2827 = vset.pattern.permute.xlu1 %v7674_v37  ;;  %v1554_v37 = vpop.permute.xlu0 %1553 }
 0x1f9   : > { %vm3964_vm14 = vmand %vm929_vm12, %vm1013_vm2  ;;  %vm1311_vm2 = vcmp.eq.f32.partialorder %v3567_v24, %v3760_v18  ;;  %2013 = vperm.xlu1 %2827, %v2836_v44   ;;  %v2843_v24 = vld [vmem:[%s2925_s16 + $0x78] sm:$0xff]  ;;  %v7901_v44 = vld [vmem:[#allocation102_spill] sm:$0xff] }
 0x1fa   : > { %vm3968_vm15 = vmand %vm1149_vm13, %vm1169_vm10 }
 0x1fb   : > { %vm3974_vm6 = vmor %vm1628_vm4, %vm1708_vm11  ;;  %vm7675_vm4 = vnez %v7654_v11  ;;  %vm1663_vm11 = vcmp.eq.f32.partialorder %v1450_v35, %v3630_v5  ;;  %v7682_v11 = vmov 0 }
 0x1fc   : > { %v7669_v9 = vsel %vm3974_vm6, 4294967295, %v7668_v9  ;;  %vm3978_vm5 = vmand %vm1257_vm7, %vm1277_vm1  ;;  %vm7681_vm7 = vnez %v7661_v4  ;;  %v7684_v4 = vmov 0 }
 0x1fd   : > { %v7671_v54 = vsel %vm3978_vm5, 4294967295, %v7670_v54  ;;  %vm3986_vm10 = vmand %vm3912_vm3, %vm1788_vm8  ;;  %vm1503_vm3 = vcmp.eq.f32.partialorder %v1450_v35, %v3633_v13  ;;  %vm7678_vm8 = vnez %v7659_v30  ;;  %v7686_v30 = vmov 0  ;;  %2021 = vperm.xlu1 %2827, %v3677_v26  }
 0x1fe   : > { %v7673_v62 = vsel %vm3986_vm10, 4294967295, %v7672_v62  ;;  %vm3999_vm12 = vmand %vm7675_vm4, %vm1111_vm0  ;;  %vm1423_vm0 = vcmp.eq.f32.partialorder %v3569_v55, %v3640_v43  ;;  %vm1759_vm4 = vcmp.eq.f32.partialorder %v1450_v35, %v3637_v41  ;;  %vm1205_vm10 = vcmp.eq.f32.partialorder %v3573_v23, %v3743_v14 }
 0x1ff   : > { %vm4007_vm13 = vmand %vm7678_vm8, %vm1203_vm9  ;;  %vm1647_vm9 = vcmp.eq.f32.partialorder %v3569_v55, %v3644_v0  ;;  %vm1113_vm8 = vcmp.eq.f32.partialorder %v3573_v23, %v3747_v22  ;;  %vm1015_vm5 = vcmp.eq.f32.partialorder %v3491_v45, %v3633_v13  ;;  %v7695_v26 = vmov 0 }
 0x200   : > { %vm4014_vm1 = vmand %vm7681_vm7, %vm1311_vm2  ;;  %vm1743_vm2 = vcmp.eq.f32.partialorder %v3569_v55, %v3649_v6  ;;  %vm1313_vm7 = vcmp.eq.f32.partialorder %v3573_v23, %v3760_v18  ;;  %v7690_v55 = vmov 0  ;;  %v7692_v23 = vmov 0 }
 0x201   : > { %v7683_v11 = vsel %vm4014_vm1, 4294967295, %v7682_v11  ;;  %vm4027_vm6 = vmand %vm1423_vm0, %vm1503_vm3  ;;  %vm1171_vm3 = vcmp.eq.f32.partialorder %v3491_v45, %v3630_v5  ;;  %2025 = vperm.xlu1 %2827, %v2837_v59   ;;  %v7745_v35 = vmov 0  ;;  %v7882_v59 = vmov 0 }
 0x202   : > { %v7685_v4 = vsel %vm4027_vm6, 4294967295, %v7684_v4  ;;  %vm4035_vm1 = vmand %vm1647_vm9, %vm1663_vm11  ;;  %vm1599_vm6 = vcmp.eq.f32.partialorder %v1546_v28, %v3747_v22 }
 0x203   : > { %v7687_v30 = vsel %vm4035_vm1, 4294967295, %v7686_v30  ;;  %vm4044_vm0 = vmand %vm1743_vm2, %vm1759_vm4  ;;  %vm931_vm2 = vcmp.eq.f32.partialorder %v3476_v29, %v3640_v43 }
 0x204   : > { %vm4053_vm9 = vmand %vm3964_vm14, %vm1113_vm8  ;;  %vm1151_vm14 = vcmp.eq.f32.partialorder %v3476_v29, %v3644_v0  ;;  %vm7694_vm8 = vnez %v7671_v54  ;;  %v2838_v54 = vld [vmem:[%s2925_s16 + $0x28] sm:$0xff] }
 0x205   : > { %v7691_v55 = vsel %vm4053_vm9, 4294967295, %v7690_v55  ;;  %vm4059_vm1 = vmand %vm3968_vm15, %vm1205_vm10  ;;  %vm7697_vm15 = vnez %v7683_v11  ;;  %vm1695_vm9 = vcmp.eq.f32.partialorder %v1546_v28, %v3743_v14  ;;  %2033 = vperm.xlu1 %2827, %v2838_v54   ;;  %v7719_v11 = vmov 0 }
 0x206   : > { %v7693_v23 = vsel %vm4059_vm1, 4294967295, %v7692_v23  ;;  %vm1235_vm4 = vmor %vm3999_vm12, %vm4007_vm13  ;;  %vm1259_vm12 = vcmp.eq.f32.partialorder %v3476_v29, %v3649_v6  ;;  %v7707_v29 = vmov 0  ;;  %v7747_v54 = vmov 0 }
 0x207   : > { %vm4073_vm11 = vmand %vm7694_vm8, %vm1313_vm7  ;;  %vm7702_vm7 = vnez %v7685_v4  ;;  %v7838_v4 = vmov 0 }
 0x208   : > { %v7696_v26 = vsel %vm4073_vm11, 4294967295, %v7695_v26  ;;  %vm1343_vm10 = vmor %vm1235_vm4, %vm7697_vm15  ;;  %vm7703_vm4 = vcmp.eq.f32.partialorder %v3491_v45, %v3637_v41  ;;  %v7709_v45 = vmov 0 }
 0x209   : > { %vm4082_vm13 = vmand %vm931_vm2, %vm1015_vm5  ;;  %vm1791_vm2 = vcmp.eq.f32.partialorder %v1546_v28, %v3760_v18  ;;  %v7723_v28 = vmov 0 }
 0x20a   : > { %vm4086_vm1 = vmand %vm1151_vm14, %vm1171_vm3  ;;  %vm7706_vm3 = vnez %v7687_v30  ;;  %v7772_v30 = vmov 0 }
 0x20b   : > { %vm1615_vm8 = vmand %vm7702_vm7, %vm1599_vm6  ;;  %vm1505_vm6 = vcmp.eq.f32.partialorder %v1458_v20, %v3633_v13 }
 0x20c   : > { %vm4096_vm15 = vmand %vm1259_vm12, %vm7703_vm4  ;;  %vm1665_vm12 = vcmp.eq.f32.partialorder %v1458_v20, %v3630_v5  ;;  %vm1115_vm4 = vcmp.eq.f32.partialorder %v3578_v31, %v3747_v22 }
 0x20d   : > { %vm1631_vm5 = vmor %vm1343_vm10, %vm1615_vm8  ;;  %vm1761_vm8 = vcmp.eq.f32.partialorder %v1458_v20, %v3637_v41 }
 0x20e   : > { %vm1711_vm14 = vmand %vm7706_vm3, %vm1695_vm9  ;;  %vm1425_vm9 = vcmp.eq.f32.partialorder %v3575_v25, %v3640_v43  ;;  %vm1745_vm3 = vcmp.eq.f32.partialorder %v3575_v25, %v3649_v6 }
 0x20f   : > { %vm4103_vm11 = vmor %vm1631_vm5, %vm1711_vm14  ;;  %vm1207_vm5 = vcmp.eq.f32.partialorder %v3578_v31, %v3743_v14  ;;  %vm1315_vm14 = vcmp.eq.f32.partialorder %v3578_v31, %v3760_v18  ;;  %v7717_v31 = vmov 0 }
 0x210   : > { %v7708_v29 = vsel %vm4103_vm11, 4294967295, %v7707_v29  ;;  %vm4110_vm7 = vmand %vm4044_vm0, %vm1791_vm2  ;;  %vm1649_vm0 = vcmp.eq.f32.partialorder %v3575_v25, %v3644_v0  ;;  %v2839_v25 = vld [vmem:[%s2925_s16 + $0x38] sm:$0xff] }
 0x211   : > { %v7710_v45 = vsel %vm4110_vm7, 4294967295, %v7709_v45  ;;  %vm4129_vm2 = vmand %vm1425_vm9, %vm1505_vm6  ;;  %2041 = vperm.xlu1 %2827, %v2839_v25   ;;  %vm7722_vm9 = vnez %v7691_v55  ;;  %vm933_vm7 = vcmp.eq.f32.partialorder %v3482_v36, %v3640_v43  ;;  %v2840_v55 = vld [vmem:[%s2925_s16 + $0x48] sm:$0xff]  ;;  %v7764_v25 = vmov 0 }
 0x212   : > { %vm4137_vm10 = vmand %vm1649_vm0, %vm1665_vm12  ;;  %vm1281_vm12 = vcmp.eq.f32.partialorder %v3497_v33, %v3637_v41 }
 0x213   : > { %vm4145_vm6 = vmand %vm1745_vm3, %vm1761_vm8  ;;  %vm7721_vm3 = vnez %v7693_v23  ;;  %v7737_v23 = vmov 0 }
 0x214   : > { %vm4155_vm0 = vmand %vm4082_vm13, %vm1115_vm4  ;;  %vm1153_vm13 = vcmp.eq.f32.partialorder %v3482_v36, %v3644_v0 }
 0x215   : > { %v7718_v31 = vsel %vm4155_vm0, 4294967295, %v7717_v31  ;;  %vm4161_vm8 = vmand %vm4086_vm1, %vm1207_vm5  ;;  %vm7725_vm1 = vnez %v7696_v26  ;;  %vm1697_vm0 = vcmp.eq.f32.partialorder %v1554_v37, %v3743_v14  ;;  %2049 = vperm.xlu1 %2827, %v2840_v55   ;;  %v1562_v26 = vpop.permute.xlu0 %1561  ;;  %v7784_v55 = vmov 0 }
 0x216   : > { %v7720_v11 = vsel %vm4161_vm8, 4294967295, %v7719_v11  ;;  %vm1237_vm11 = vmor %vm7722_vm9, %vm7721_vm3  ;;  %vm1261_vm9 = vcmp.eq.f32.partialorder %v3482_v36, %v3649_v6  ;;  %vm7726_vm3 = vcmp.eq.f32.partialorder %v3497_v33, %v3633_v13  ;;  %v1466_v36 = vpop.permute.xlu1 %1465 }
 0x217   : > { %vm4175_vm4 = vmand %vm4096_vm15, %vm1315_vm14  ;;  %vm7729_vm15 = vcmp.eq.f32.partialorder %v3497_v33, %v3630_v5  ;;  %v7735_v33 = vmov 0 }
 0x218   : > { %v7724_v28 = vsel %vm4175_vm4, 4294967295, %v7723_v28  ;;  %vm1345_vm5 = vmor %vm1237_vm11, %vm7725_vm1  ;;  %vm7732_vm11 = vcmp.eq.f32.partialorder %v1554_v37, %v3747_v22 }
 0x219   : > { %vm4187_vm8 = vmand %vm933_vm7, %vm7726_vm3  ;;  %vm1793_vm3 = vcmp.eq.f32.partialorder %v1554_v37, %v3760_v18  ;;  %2057 = vperm.xlu1 %2827, %v2841_v56   ;;  %v2842_v37 = vld [vmem:[%s2925_s16 + $0x68] sm:$0xff]  ;;  %v7868_v56 = vmov 0 }
 0x21a   : > { %vm4194_vm14 = vmand %vm1153_vm13, %vm7729_vm15 }
 0x21b   : > { %vm1617_vm1 = vmand %vm4129_vm2, %vm7732_vm11  ;;  %vm1507_vm2 = vcmp.eq.f32.partialorder %v1466_v36, %v3633_v13  ;;  %vm1117_vm11 = vcmp.eq.f32.partialorder %v3584_v46, %v3747_v22 }
 0x21c   : > { %vm4202_vm4 = vmand %vm1261_vm9, %vm1281_vm12  ;;  %vm1427_vm9 = vcmp.eq.f32.partialorder %v3581_v60, %v3640_v43 }
 0x21d   : > { %vm1633_vm7 = vmor %vm1345_vm5, %vm1617_vm1  ;;  %vm1667_vm5 = vcmp.eq.f32.partialorder %v1466_v36, %v3630_v5  ;;  %vm1209_vm1 = vcmp.eq.f32.partialorder %v3584_v46, %v3743_v14  ;;  %2065 = vperm.xlu1 %2827, %v2842_v37  }
 0x21e   : > { %vm1713_vm13 = vmand %vm4137_vm10, %vm1697_vm0  ;;  %vm1763_vm0 = vcmp.eq.f32.partialorder %v1466_v36, %v3637_v41 }
 0x21f   : > { %vm4210_vm15 = vmor %vm1633_vm7, %vm1713_vm13  ;;  %vm1699_vm13 = vcmp.eq.f32.partialorder %v1562_v26, %v3743_v14 }
 0x220   : > { %v7736_v33 = vsel %vm4210_vm15, 4294967295, %v7735_v33  ;;  %vm4217_vm12 = vmand %vm4145_vm6, %vm1793_vm3  ;;  %vm1651_vm6 = vcmp.eq.f32.partialorder %v3581_v60, %v3644_v0  ;;  %vm1747_vm3 = vcmp.eq.f32.partialorder %v3581_v60, %v3649_v6  ;;  %v1474_v60 = vpop.permute.xlu1 %1473  ;;  %vm1263_vm15 = vcmp.eq.f32.partialorder %v3488_v61, %v3649_v6 }
 0x221   : > { %v7738_v23 = vsel %vm4217_vm12, 4294967295, %v7737_v23  ;;  %vm4236_vm7 = vmand %vm1427_vm9, %vm1507_vm2  ;;  %vm1019_vm12 = vcmp.eq.f32.partialorder %v3503_v52, %v3633_v13  ;;  %2073 = vperm.xlu1 %2827, %v2843_v24  }
 0x222   : > { %vm4244_vm10 = vmand %vm1651_vm6, %vm1667_vm5 }
 0x223   : > { %vm4252_vm2 = vmand %vm1747_vm3, %vm1763_vm0  ;;  %vm7749_vm0 = vnez %v7720_v11  ;;  %vm7750_vm3 = vnez %v7718_v31  ;;  %v1570_v11 = vpop.permute.xlu0 %1569 }
 0x224   : > { %vm4261_vm5 = vmand %vm4187_vm8, %vm1117_vm11  ;;  %vm935_vm8 = vcmp.eq.f32.partialorder %v3488_v61, %v3640_v43  ;;  %vm1155_vm11 = vcmp.eq.f32.partialorder %v3488_v61, %v3644_v0  ;;  %v1482_v31 = vpop.permute.xlu1 %1481 }
 0x225   : > { %v7746_v35 = vsel %vm4261_vm5, 4294967295, %v7745_v35  ;;  %vm4267_vm6 = vmand %vm4194_vm14, %vm1209_vm1  ;;  %vm7751_vm14 = vcmp.eq.f32.partialorder %v3584_v46, %v3760_v18  ;;  %v7904_v46 = vmov 0 }
 0x226   : > { %v7748_v54 = vsel %vm4267_vm6, 4294967295, %v7747_v54  ;;  %vm1239_vm9 = vmor %vm7750_vm3, %vm7749_vm0  ;;  %vm7754_vm0 = vnez %v7724_v28  ;;  %v7768_v28 = vmov 0 }
 0x227   : > { %vm4285_vm1 = vmand %vm4202_vm4, %vm7751_vm14  ;;  %vm7757_vm4 = vcmp.eq.f32.partialorder %v3503_v52, %v3630_v5  ;;  %v1578_v20 = vpop.permute.xlu0 %1577 }
 0x228   : > { %v7753_v15 = vsel %vm4285_vm1, 4294967295, %v7752_v15  ;;  %vm1347_vm3 = vmor %vm1239_vm9, %vm7754_vm0  ;;  %vm7760_vm9 = vcmp.eq.f32.partialorder %v1562_v26, %v3747_v22  ;;  %vm7761_vm1 = vcmp.eq.f32.partialorder %v3503_v52, %v3637_v41  ;;  %v7766_v52 = vmov 0  ;;  %v4387_v36 = vpop.permute.xlu1 %1489 }
 0x229   : > { %vm4297_vm5 = vmand %vm935_vm8, %vm1019_vm12  ;;  %vm1795_vm8 = vcmp.eq.f32.partialorder %v1562_v26, %v3760_v18  ;;  %v7787_v26 = vmov 0 }
 0x22a   : > { %vm4304_vm14 = vmand %vm1155_vm11, %vm7757_vm4 }
 0x22b   : > { %vm1619_vm0 = vmand %vm4236_vm7, %vm7760_vm9  ;;  %vm1509_vm7 = vcmp.eq.f32.partialorder %v1474_v60, %v3633_v13  ;;  %vm1653_vm9 = vcmp.eq.f32.partialorder %v3587_v16, %v3644_v0  ;;  %v1586_v61 = vpop.permute.xlu0 %1585 }
 0x22c   : > { %vm4315_vm6 = vmand %vm1263_vm15, %vm7761_vm1  ;;  %vm1669_vm1 = vcmp.eq.f32.partialorder %v1474_v60, %v3630_v5  ;;  %v4439_v50 = vpop.permute.xlu1 %1497 }
 0x22d   : > { %vm1635_vm12 = vmor %vm1347_vm3, %vm1619_vm0  ;;  %vm1765_vm3 = vcmp.eq.f32.partialorder %v1474_v60, %v3637_v41  ;;  %vm1211_vm0 = vcmp.eq.f32.partialorder %v3590_v32, %v3743_v14 }
 0x22e   : > { %vm1715_vm11 = vmand %vm4244_vm10, %vm1699_vm13  ;;  %vm1429_vm10 = vcmp.eq.f32.partialorder %v3587_v16, %v3640_v43 }
 0x22f   : > { %vm4323_vm4 = vmor %vm1635_vm12, %vm1715_vm11  ;;  %vm1319_vm11 = vcmp.eq.f32.partialorder %v3590_v32, %v3760_v18 }
 0x230   : > { %v7765_v25 = vsel %vm4323_vm4, 4294967295, %v7764_v25  ;;  %vm4330_vm15 = vmand %vm4252_vm2, %vm1795_vm8  ;;  %vm1119_vm2 = vcmp.eq.f32.partialorder %v3590_v32, %v3747_v22  ;;  %vm1749_vm8 = vcmp.eq.f32.partialorder %v3587_v16, %v3649_v6  ;;  %v7774_v32 = vmov 0  ;;  %v4506_v37 = vpop.permute.xlu1 %1537 }
 0x231   : > { %v7767_v52 = vsel %vm4330_vm15, 4294967295, %v7766_v52  ;;  %vm4348_vm12 = vmand %vm1429_vm10, %vm1509_vm7  ;;  %vm1605_vm10 = vcmp.eq.f32.partialorder %v1570_v11, %v3747_v22  ;;  %v7776_v16 = vmov 0  ;;  %vm937_vm15 = vcmp.eq.f32.partialorder %v3494_v19, %v3640_v43 }
 0x232   : > { %v7769_v28 = vsel %vm4348_vm12, 4294967295, %v7768_v28  ;;  %vm4356_vm13 = vmand %vm1653_vm9, %vm1669_vm1  ;;  %vm1285_vm12 = vcmp.eq.f32.partialorder %v3509_v57, %v3637_v41 }
 0x233   : > { %vm4364_vm7 = vmand %vm1749_vm8, %vm1765_vm3  ;;  %vm7778_vm3 = vnez %v7748_v54  ;;  %vm7779_vm8 = vnez %v7746_v35  ;;  %v7803_v35 = vmov 0  ;;  %v7813_v54 = vmov 0 }
 0x234   : > { %v7773_v30 = vsel %vm4364_vm7, 4294967295, %v7772_v30  ;;  %vm4373_vm1 = vmand %vm4297_vm5, %vm1119_vm2  ;;  %vm1157_vm5 = vcmp.eq.f32.partialorder %v3494_v19, %v3644_v0  ;;  %v4567_v24 = vpop.permute.xlu1 %1541 }
 0x235   : > { %v7775_v32 = vsel %vm4373_vm1, 4294967295, %v7774_v32  ;;  %vm4379_vm9 = vmand %vm4304_vm14, %vm1211_vm0  ;;  %vm7782_vm14 = vnez %v7753_v15  ;;  %vm1701_vm1 = vcmp.eq.f32.partialorder %v1570_v11, %v3743_v14  ;;  %v7817_v15 = vmov 0 }
 0x236   : > { %v7777_v16 = vsel %vm4379_vm9, 4294967295, %v7776_v16  ;;  %vm1241_vm4 = vmor %vm7779_vm8, %vm7778_vm3  ;;  %vm1265_vm3 = vcmp.eq.f32.partialorder %v3494_v19, %v3649_v6  ;;  %vm7783_vm8 = vcmp.eq.f32.partialorder %v3509_v57, %v3633_v13  ;;  %v7792_v19 = vmov 0 }
 0x237   : > { %vm4395_vm2 = vmand %vm4315_vm6, %vm1319_vm11  ;;  %vm7786_vm6 = vcmp.eq.f32.partialorder %v3509_v57, %v3630_v5  ;;  %v7796_v57 = vmov 0 }
 0x238   : > { %v7781_v8 = vsel %vm4395_vm2, 4294967295, %v7780_v8  ;;  %vm1349_vm0 = vmor %vm1241_vm4, %vm7782_vm14  ;;  %vm7789_vm4 = vnez %v7769_v28  ;;  %v7835_v28 = vmov 0 }
 0x239   : > { %vm4407_vm9 = vmand %vm937_vm15, %vm7783_vm8  ;;  %vm1797_vm15 = vcmp.eq.f32.partialorder %v1570_v11, %v3760_v18  ;;  %v7833_v11 = vmov 0 }
 0x23a   : > { %v7785_v55 = vsel %vm4407_vm9, 4294967295, %v7784_v55  ;;  %vm4414_vm11 = vmand %vm1157_vm5, %vm7786_vm6  ;;  %vm1511_vm5 = vcmp.eq.f32.partialorder %v1482_v31, %v3633_v13  ;;  %vm7795_vm6 = vnez %v7773_v30  ;;  %v7921_v30 = vmov 0 }
 0x23b   : > { %v7788_v26 = vsel %vm4414_vm11, 4294967295, %v7787_v26  ;;  %vm1621_vm14 = vmand %vm7789_vm4, %vm1605_vm10  ;;  %vm1431_vm10 = vcmp.eq.f32.partialorder %v3593_v34, %v3640_v43 }
 0x23c   : > { %vm4420_vm2 = vmand %vm1265_vm3, %vm1285_vm12  ;;  %vm1671_vm12 = vcmp.eq.f32.partialorder %v1482_v31, %v3630_v5  ;;  %vm1213_vm3 = vcmp.eq.f32.partialorder %v3596_v2, %v3743_v14 }
 0x23d   : > { %vm1637_vm7 = vmor %vm1349_vm0, %vm1621_vm14  ;;  %vm1121_vm0 = vcmp.eq.f32.partialorder %v3596_v2, %v3747_v22  ;;  %vm1751_vm14 = vcmp.eq.f32.partialorder %v3593_v34, %v3649_v6 }
 0x23e   : > { %vm1717_vm8 = vmand %vm4356_vm13, %vm1701_vm1  ;;  %vm1655_vm1 = vcmp.eq.f32.partialorder %v3593_v34, %v3644_v0  ;;  %v7806_v34 = vmov 0 }
 0x23f   : > { %vm4427_vm9 = vmor %vm1637_vm7, %vm1717_vm8  ;;  %vm1767_vm7 = vcmp.eq.f32.partialorder %v1482_v31, %v3637_v41  ;;  %v7909_v31 = vld [vmem:[#allocation83_spill] sm:$0xff] }
 0x240   : > { %v7793_v19 = vsel %vm4427_vm9, 4294967295, %v7792_v19  ;;  %vm4434_vm11 = vmand %vm7795_vm6, %vm1797_vm15  ;;  %vm1321_vm15 = vcmp.eq.f32.partialorder %v3596_v2, %v3760_v18  ;;  %vm7808_vm6 = vnez %v7788_v26  ;;  %v7809_v2 = vmov 0 }
 0x241   : > { %7794 = vst [vmem:[#allocation117_spill] sm:$0xff] %v7793_v19  ;;  %v7797_v57 = vsel %vm4434_vm11, 4294967295, %v7796_v57  ;;  %vm4454_vm4 = vmand %vm1431_vm10, %vm1511_vm5  ;;  %vm1607_vm10 = vcmp.eq.f32.partialorder %v1578_v20, %v3747_v22  ;;  %vm1287_vm11 = vcmp.eq.f32.partialorder %v3515_v42, %v3637_v41  ;;  %v8328_v19 = vmov 0 }
 0x242   : > { %7798 = vst [vmem:[#allocation118_spill] sm:$0xff] %v7797_v57  ;;  %vm4462_vm8 = vmand %vm1655_vm1, %vm1671_vm12  ;;  %vm7805_vm12 = vnez %v7785_v55  ;;  %v7935_v55 = vmov 0  ;;  %v8320_v57 = vld [vmem:[#allocation34_spill] sm:$0xff] }
 0x243   : > { %vm4470_vm5 = vmand %vm1751_vm14, %vm1767_vm7  ;;  %vm7811_vm7 = vnez %v7777_v16  ;;  %vm7812_vm14 = vnez %v7775_v32  ;;  %v4659_v16 = vpop.permute.xlu1 %1549  ;;  %v7931_v32 = vmov 0 }
 0x244   : > { %v7804_v35 = vsel %vm4470_vm5, 4294967295, %v7803_v35  ;;  %vm4479_vm1 = vmand %vm7805_vm12, %vm1121_vm0  ;;  %vm939_vm5 = vcmp.eq.f32.partialorder %v3500_v40, %v3640_v43  ;;  %vm1159_vm0 = vcmp.eq.f32.partialorder %v3500_v40, %v3644_v0 }
 0x245   : > { %v7807_v34 = vsel %vm4479_vm1, 4294967295, %v7806_v34  ;;  %vm4485_vm9 = vmand %vm7808_vm6, %vm1213_vm3  ;;  %vm7815_vm3 = vnez %v7781_v8  ;;  %vm1703_vm1 = vcmp.eq.f32.partialorder %v1578_v20, %v3743_v14  ;;  %v4688_v8 = vpop.permute.xlu0 %1593 }
 0x246   : > { %v7810_v2 = vsel %vm4485_vm9, 4294967295, %v7809_v2  ;;  %vm1243_vm13 = vmor %vm7812_vm14, %vm7811_vm7  ;;  %vm1267_vm7 = vcmp.eq.f32.partialorder %v3500_v40, %v3649_v6  ;;  %vm7816_vm14 = vcmp.eq.f32.partialorder %v3515_v42, %v3633_v13  ;;  %v7824_v40 = vmov 0 }
 0x247   : > { %vm4499_vm12 = vmand %vm4420_vm2, %vm1321_vm15  ;;  %vm7819_vm2 = vcmp.eq.f32.partialorder %v3515_v42, %v3630_v5  ;;  %v7828_v42 = vmov 0  ;;  %v4773_v60 = vpop.permute.xlu1 %1557 }
 0x248   : > { %v7814_v54 = vsel %vm4499_vm12, 4294967295, %v7813_v54  ;;  %vm1351_vm6 = vmor %vm1243_vm13, %vm7815_vm3 }
 0x249   : > { %vm4513_vm9 = vmand %vm939_vm5, %vm7816_vm14  ;;  %vm1799_vm5 = vcmp.eq.f32.partialorder %v1578_v20, %v3760_v18  ;;  %v7875_v20 = vmov 0 }
 0x24a   : > { %v7818_v15 = vsel %vm4513_vm9, 4294967295, %v7817_v15  ;;  %vm4520_vm15 = vmand %vm1159_vm0, %vm7819_vm2  ;;  %vm925_vm9 = vcmp.eq.f32.partialorder %v3411_v53, %v3640_v43  ;;  %vm1215_vm2 = vcmp.eq.f32.partialorder %v3602_v1, %v3743_v14 }
 0x24b   : > { %vm1623_vm13 = vmand %vm4454_vm4, %vm1607_vm10  ;;  %vm1513_vm4 = vcmp.eq.f32.partialorder %v4387_v36, %v3633_v13  ;;  %vm1009_vm10 = vcmp.eq.f32.partialorder %v3507_v49, %v3633_v13 }
 0x24c   : > { %vm4526_vm3 = vmand %vm1267_vm7, %vm1287_vm11  ;;  %vm1145_vm11 = vcmp.eq.f32.partialorder %v3411_v53, %v3644_v0  ;;  %vm1123_vm7 = vcmp.eq.f32.partialorder %v3602_v1, %v3747_v22 }
 0x24d   : > { %vm1639_vm12 = vmor %vm1351_vm6, %vm1623_vm13  ;;  %vm1165_vm6 = vcmp.eq.f32.partialorder %v3507_v49, %v3630_v5  ;;  %vm1433_vm13 = vcmp.eq.f32.partialorder %v3599_v63, %v3640_v43 }
 0x24e   : > { %vm1719_vm14 = vmand %vm4462_vm8, %vm1703_vm1  ;;  %vm7827_vm8 = vnez %v7804_v35  ;;  %v7887_v35 = vld [vmem:[#allocation86_spill] sm:$0xff] }
 0x24f   : > { %vm4535_vm0 = vmor %vm1639_vm12, %vm1719_vm14  ;;  %vm1769_vm14 = vcmp.eq.f32.partialorder %v4387_v36, %v3637_v41 }
 0x250   : > { %v7825_v40 = vsel %vm4535_vm0, 4294967295, %v7824_v40  ;;  %vm4549_vm1 = vmand %vm7827_vm8, %vm1799_vm5  ;;  %vm1657_vm8 = vcmp.eq.f32.partialorder %v3599_v63, %v3644_v0  ;;  %vm7840_vm0 = vcmp.eq.f32.partialorder %v3507_v49, %v3637_v41  ;;  %v7925_v49 = vmov 0 }
 0x251   : > { %7826 = vst [vmem:[#allocation119_spill] sm:$0xff] %v7825_v40  ;;  %v7829_v42 = vsel %vm4549_vm1, 4294967295, %v7828_v42  ;;  %vm4578_vm12 = vmand %vm1433_vm13, %vm1513_vm4  ;;  %vm1753_vm13 = vcmp.eq.f32.partialorder %v3599_v63, %v3649_v6  ;;  %vm1323_vm1 = vcmp.eq.f32.partialorder %v3602_v1, %v3760_v18  ;;  %v7923_v63 = vld [vmem:[#allocation95_spill] sm:$0xff]  ;;  %v4904_v1 = vpop.permute.xlu1 %1565  ;;  %v8018_v40 = vmov 0 }
 0x252   : > { %7830 = vst [vmem:[#allocation120_spill] sm:$0xff] %v7829_v42  ;;  %vm4588_vm5 = vmand %vm925_vm9, %vm1009_vm10  ;;  %vm7837_vm9 = vcmp.eq.f32.partialorder %v4387_v36, %v3630_v5  ;;  %v7859_v36 = vmov 0  ;;  %v7994_v42 = vmov 0 }
 0x253   : > { %v7834_v11 = vsel %vm4588_vm5, 4294967295, %v7833_v11  ;;  %vm4598_vm4 = vmand %vm1145_vm11, %vm1165_vm6  ;;  %vm7841_vm11 = vcmp.eq.f32.partialorder %v3411_v53, %v3649_v6  ;;  %vm1609_vm5 = vcmp.eq.f32.partialorder %v1586_v61, %v3747_v22  ;;  %v7853_v53 = vmov 0 }
 0x254   : > { %v7836_v28 = vsel %vm4598_vm4, 4294967295, %v7835_v28  ;;  %vm4609_vm10 = vmand %vm1657_vm8, %vm7837_vm9  ;;  %vm7846_vm8 = vnez %v7818_v15  ;;  %v7899_v15 = vmov 0 }
 0x255   : > { %v7839_v4 = vsel %vm4609_vm10, 4294967295, %v7838_v4  ;;  %vm4619_vm6 = vmand %vm7841_vm11, %vm7840_vm0  ;;  %vm7851_vm0 = vnez %v7810_v2  ;;  %v4786_v2 = vpop.permute.xlu0 %1841 }
 0x256   : > { %vm4623_vm4 = vmand %vm1753_vm13, %vm1769_vm14  ;;  %vm7852_vm14 = vnez %v7807_v34  ;;  %v7889_v34 = vmov 0 }
 0x257   : > { %vm4630_vm9 = vmand %vm7846_vm8, %vm1123_vm7  ;;  %vm7855_vm7 = vnez %v7814_v54  ;;  %v7894_v54 = vld [vmem:[#allocation91_spill] sm:$0xff] }
 0x258   : > { %vm4636_vm10 = vmand %vm4520_vm15, %vm1215_vm2  ;;  %vm1705_vm15 = vcmp.eq.f32.partialorder %v1586_v61, %v3743_v14 }
 0x259   : > { %vm1245_vm13 = vmor %vm7852_vm14, %vm7851_vm0  ;;  %vm1801_vm14 = vcmp.eq.f32.partialorder %v1586_v61, %v3760_v18  ;;  %v4946_v26 = vpop.permute.xlu0 %1853  ;;  %v7949_v61 = vld [vmem:[#allocation96_spill] sm:$0xff] }
 0x25a   : > { %vm4646_vm11 = vmand %vm4526_vm3, %vm1323_vm1  ;;  %vm926_vm3 = vcmp.eq.f32.partialorder %v3459_v48, %v3640_v43 }
 0x25b   : > { %v7854_v53 = vsel %vm4646_vm11, 4294967295, %v7853_v53  ;;  %vm4652_vm8 = vmor %vm1245_vm13, %vm7855_vm7  ;;  %vm1274_vm13 = vcmp.eq.f32.partialorder %v3513_v38, %v3637_v41 }
 0x25c   : > { %vm1625_vm2 = vmand %vm4578_vm12, %vm1609_vm5  ;;  %vm7858_vm5 = vnez %v7839_v4  ;;  %v8009_v4 = vmov 0 }
 0x25d   : > { %vm1641_vm1 = vmor %vm4652_vm8, %vm1625_vm2  ;;  %vm1146_vm8 = vcmp.eq.f32.partialorder %v3459_v48, %v3644_v0 }
 0x25e   : > { %vm1721_vm0 = vmand %vm7858_vm5, %vm1705_vm15  ;;  %vm1254_vm15 = vcmp.eq.f32.partialorder %v3459_v48, %v3649_v6  ;;  %vm7862_vm5 = vcmp.eq.f32.partialorder %v3513_v38, %v3633_v13  ;;  %v7871_v48 = vmov 0 }
 0x25f   : > { %vm4682_vm11 = vmor %vm1641_vm1, %vm1721_vm0  ;;  %vm7865_vm0 = vcmp.eq.f32.partialorder %v3513_v38, %v3630_v5  ;;  %v7879_v38 = vmov 0 }
 0x260   : > { %v7860_v36 = vsel %vm4682_vm11, 4294967295, %v7859_v36  ;;  %vm4695_vm12 = vmand %vm926_vm3, %vm7862_vm5  ;;  %vm7874_vm5 = vnez %v7834_v11  ;;  %v8005_v11 = vmov 0 }
 0x261   : > { %7861 = vst [vmem:[#allocation121_spill] sm:$0xff] %v7860_v36  ;;  %vm4702_vm1 = vmand %vm1146_vm8, %vm7865_vm0  ;;  %vm7873_vm8 = vcmp.eq.f32.partialorder %v3521_v58, %v3747_v22  ;;  %v7991_v36 = vmov 0 }
 0x262   : > { %vm4708_vm7 = vmand %vm4623_vm4, %vm1801_vm14  ;;  %vm7877_vm4 = vcmp.eq.f32.partialorder %v3521_v58, %v3743_v14  ;;  %vm7878_vm14 = vnez %v7836_v28  ;;  %v7960_v28 = vld [vmem:[#allocation103_spill] sm:$0xff] }
 0x263   : > { %v7869_v56 = vsel %vm4708_vm7, 4294967295, %v7868_v56  ;;  %vm4717_vm3 = vmand %vm1254_vm15, %vm1274_vm13  ;;  %vm1435_vm15 = vcmp.eq.f32.partialorder %v3605_v27, %v3640_v43  ;;  %vm7884_vm7 = vcmp.eq.f32.partialorder %v4439_v50, %v3633_v13 }
 0x264   : > { %7870 = vst [vmem:[#allocation122_spill] sm:$0xff] %v7869_v56  ;;  %v7872_v48 = vsel %vm4717_vm3, 4294967295, %v7871_v48  ;;  %vm4726_vm0 = vmand %vm7874_vm5, %vm7873_vm8  ;;  %vm7888_vm8 = vcmp.eq.f32.partialorder %v4439_v50, %v3630_v5  ;;  %vm7895_vm5 = vcmp.eq.f32.partialorder %v3530_v21, %v3633_v13  ;;  %vm7910_vm3 = vcmp.eq.f32.partialorder %v3611_v39, %v3630_v5 }
 0x265   : > { %v7876_v20 = vsel %vm4726_vm0, 4294967295, %v7875_v20  ;;  %vm4735_vm2 = vmand %vm7878_vm14, %vm7877_vm4  ;;  %vm7881_vm4 = vcmp.eq.f32.partialorder %v3521_v58, %v3760_v18  ;;  %vm1659_vm0 = vcmp.eq.f32.partialorder %v3605_v27, %v3644_v0  ;;  %v7939_v58 = vld [vmem:[#allocation84_spill] sm:$0xff]  ;;  %v7988_v56 = vmov 0 }
 0x266   : > { %v7880_v38 = vsel %vm4735_vm2, 4294967295, %v7879_v38  ;;  %vm4754_vm14 = vmand %vm4619_vm6, %vm7881_vm4  ;;  %vm932_vm6 = vcmp.eq.f32.partialorder %v7887_v35, %v3640_v43  ;;  %vm1755_vm4 = vcmp.eq.f32.partialorder %v3605_v27, %v3649_v6  ;;  %v7965_v27 = vmov 0 }
 0x267   : > { %v7883_v59 = vsel %vm4754_vm14, 4294967295, %v7882_v59  ;;  %vm4769_vm11 = vmand %vm1435_vm15, %vm7884_vm7  ;;  %vm1152_vm7 = vcmp.eq.f32.partialorder %v7887_v35, %v3644_v0  ;;  %vm7891_vm14 = vcmp.eq.f32.partialorder %v4439_v50, %v3637_v41  ;;  %vm7902_vm15 = vcmp.eq.f32.partialorder %v3611_v39, %v3633_v13 }
 0x268   : > { %vm4782_vm13 = vmand %vm1659_vm0, %vm7888_vm8  ;;  %vm7903_vm8 = vcmp.eq.f32.partialorder %v3609_v3, %v3640_v43  ;;  %vm7906_vm0 = vnez %v7854_v53  ;;  %v7928_v53 = vmov 0  ;;  %v8059_v50 = vmov 0 }
 0x269   : > { %v7890_v34 = vsel %vm4782_vm13, 4294967295, %v7889_v34  ;;  %vm4797_vm2 = vmand %vm1755_vm4, %vm7891_vm14  ;;  %vm7898_vm14 = vcmp.eq.f32.partialorder %v3530_v21, %v3630_v5 }
 0x26a   : > { %vm4812_vm13 = vmand %vm932_vm6, %vm7895_vm5 }
 0x26b   : > { %vm4819_vm4 = vmand %vm1152_vm7, %vm7898_vm14  ;;  %vm1256_vm14 = vcmp.eq.f32.partialorder %v7909_v31, %v3649_v6 }
 0x26c   : > { %v7900_v15 = vsel %vm4819_vm4, 4294967295, %v7899_v15  ;;  %vm4831_vm5 = vmand %vm7903_vm8, %vm7902_vm15  ;;  %vm7914_vm8 = vcmp.eq.f32.partialorder %v4688_v8, %v3747_v22 }
 0x26d   : > { %v7905_v46 = vsel %vm4831_vm5, 4294967295, %v7904_v46  ;;  %vm1247_vm6 = vmor %vm4630_vm9, %vm4636_vm10  ;;  %vm928_vm10 = vcmp.eq.f32.partialorder %v7909_v31, %v3640_v43  ;;  %vm1148_vm9 = vcmp.eq.f32.partialorder %v7909_v31, %v3644_v0  ;;  %vm7917_vm5 = vcmp.eq.f32.partialorder %v7894_v54, %v3633_v13 }
 0x26e   : > { %vm4847_vm15 = vmor %vm1247_vm6, %vm7906_vm0  ;;  %vm7911_vm0 = vcmp.eq.f32.partialorder %v3609_v3, %v3644_v0  ;;  %v7957_v31 = vmov 0 }
 0x26f   : > { %vm4865_vm6 = vmand %vm7911_vm0, %vm7910_vm3  ;;  %vm7920_vm3 = vcmp.eq.f32.partialorder %v7894_v54, %v3630_v5 }
 0x270   : > { %vm4874_vm7 = vmand %vm4769_vm11, %vm7914_vm8  ;;  %vm7927_vm8 = vcmp.eq.f32.partialorder %v7901_v44, %v3747_v22 }
 0x271   : > { %vm4883_vm4 = vmand %vm928_vm10, %vm7917_vm5 }
 0x272   : > { %vm4890_vm0 = vmand %vm1148_vm9, %vm7920_vm3  ;;  %vm7924_vm9 = vcmp.eq.f32.partialorder %v7894_v54, %v3637_v41  ;;  %v7948_v54 = vld [vmem:[#allocation92_spill] sm:$0xff] }
 0x273   : > { %v7922_v30 = vsel %vm4890_vm0, 4294967295, %v7921_v30  ;;  %vm1643_vm5 = vmor %vm4847_vm15, %vm4874_vm7  ;;  %vm7930_vm7 = vcmp.eq.f32.partialorder %v7901_v44, %v3743_v14 }
 0x274   : > { %vm4909_vm3 = vmand %vm1256_vm14, %vm7924_vm9  ;;  %vm7933_vm14 = vcmp.eq.f32.partialorder %v3611_v39, %v3637_v41  ;;  %vm7934_vm9 = vcmp.eq.f32.partialorder %v3609_v3, %v3649_v6  ;;  %v7940_v39 = vld [vmem:[#allocation88_spill] sm:$0xff]  ;;  %v7943_v3 = vmov 0 }
 0x275   : > { %v7926_v49 = vsel %vm4909_vm3, 4294967295, %v7925_v49  ;;  %vm4918_vm11 = vmand %vm4695_vm12, %vm7927_vm8  ;;  %vm7937_vm12 = vcmp.eq.f32.partialorder %v4688_v8, %v3743_v14  ;;  %vm7938_vm8 = vnez %v7890_v34  ;;  %v7945_v34 = vmov 0 }
 0x276   : > { %v7929_v53 = vsel %vm4918_vm11, 4294967295, %v7928_v53  ;;  %vm4927_vm15 = vmand %vm4702_vm1, %vm7930_vm7  ;;  %vm934_vm7 = vcmp.eq.f32.partialorder %v7940_v39, %v3640_v43  ;;  %vm7956_vm1 = vcmp.eq.f32.partialorder %v4688_v8, %v3760_v18  ;;  %v7963_v8 = vld [vmem:[#allocation93_spill] sm:$0xff]  ;;  %vm7967_vm3 = vnez %v7883_v59 }
 0x277   : > { %v7932_v32 = vsel %vm4927_vm15, 4294967295, %v7931_v32  ;;  %vm4937_vm10 = vmand %vm7934_vm9, %vm7933_vm14  ;;  %vm1154_vm14 = vcmp.eq.f32.partialorder %v7940_v39, %v3644_v0  ;;  %vm7941_vm9 = vcmp.eq.f32.partialorder %v7901_v44, %v3760_v18  ;;  %vm7942_vm15 = vnez %v7872_v48 }
 0x278   : > { %v7936_v55 = vsel %vm4937_vm10, 4294967295, %v7935_v55  ;;  %vm1723_vm11 = vmand %vm7938_vm8, %vm7937_vm12  ;;  %v7951_v48 = vmov 0  ;;  %v7954_v44 = vmov 0  ;;  %v7975_v59 = vmov 0 }
 0x279   : > { %vm4959_vm10 = vmand %vm7942_vm15, %vm7941_vm9  ;;  %vm7950_vm15 = vcmp.eq.f32.partialorder %v7923_v63, %v3633_v13 }
 0x27a   : > { %v7944_v3 = vsel %vm4959_vm10, 4294967295, %v7943_v3  ;;  %vm4965_vm8 = vmor %vm1643_vm5, %vm1723_vm11  ;;  %vm7953_vm11 = vcmp.eq.f32.partialorder %v7923_v63, %v3630_v5 }
 0x27b   : > { %v7946_v34 = vsel %vm4965_vm8, 4294967295, %v7945_v34  ;;  %vm4978_vm9 = vmand %vm934_vm7, %vm7950_vm15  ;;  %vm7964_vm8 = vcmp.eq.f32.partialorder %v3917_v7, %v3633_v13  ;;  %vm1150_vm7 = vcmp.eq.f32.partialorder %v7939_v58, %v3644_v0 }
 0x27c   : > { %7947 = vst [vmem:[#allocation86_spill] sm:$0xff] %v7946_v34  ;;  %v7952_v48 = vsel %vm4978_vm9, 4294967295, %v7951_v48  ;;  %vm4985_vm5 = vmand %vm1154_vm14, %vm7953_vm11  ;;  %vm1422_vm11 = vcmp.eq.f32.partialorder %v7960_v28, %v3640_v43  ;;  %v7977_v34 = vld [vmem:[#allocation97_spill] sm:$0xff]  ;;  %vm7982_vm14 = vcmp.eq.f32.partialorder %v3917_v7, %v3630_v5 }
 0x27d   : > { %v7955_v44 = vsel %vm4985_vm5, 4294967295, %v7954_v44  ;;  %vm4994_vm0 = vmand %vm4797_vm2, %vm7956_vm1  ;;  %vm7961_vm2 = vnez %v7880_v38  ;;  %vm7962_vm1 = vnez %v7876_v20  ;;  %v7971_v38 = vmov 0 }
 0x27e   : > { %v7958_v31 = vsel %vm4994_vm0, 4294967295, %v7957_v31  ;;  %vm1233_vm12 = vmor %vm7962_vm1, %vm7961_vm2  ;;  %vm7970_vm1 = vcmp.eq.f32.partialorder %v7949_v61, %v3747_v22  ;;  %vm7978_vm2 = vcmp.eq.f32.partialorder %v4506_v37, %v3747_v22  ;;  %vm7993_vm5 = vcmp.eq.f32.partialorder %v3530_v21, %v3637_v41 }
 0x27f   : > { %7959 = vst [vmem:[#allocation91_spill] sm:$0xff] %v7958_v31  ;;  %vm5021_vm0 = vmand %vm1422_vm11, %vm7964_vm8  ;;  %vm7973_vm8 = vcmp.eq.f32.partialorder %v7949_v61, %v3743_v14  ;;  %vm1260_vm11 = vcmp.eq.f32.partialorder %v7887_v35, %v3649_v6  ;;  %v5089_v31 = vpop.permute.xlu0 %1861  ;;  %v7985_v35 = vld [vmem:[#allocation89_spill] sm:$0xff]  ;;  %v8001_v21 = vmov 0  ;;  %v8026_v20 = vmov 0 }
 0x280   : > { %v7966_v27 = vsel %vm5021_vm0, 4294967295, %v7965_v27  ;;  %vm5027_vm10 = vmor %vm1233_vm12, %vm7967_vm3  ;;  %vm7974_vm3 = vnez %v7900_v15  ;;  %v5068_v15 = vpop.permute.xlu1 %1573 }
 0x281   : > { %vm5038_vm15 = vmand %vm4812_vm13, %vm7970_vm1  ;;  %vm1646_vm13 = vcmp.eq.f32.partialorder %v7960_v28, %v3644_v0  ;;  %vm1258_vm1 = vcmp.eq.f32.partialorder %v7939_v58, %v3649_v6 }
 0x282   : > { %v7972_v38 = vsel %vm5038_vm15, 4294967295, %v7971_v38  ;;  %vm5047_vm12 = vmand %vm7974_vm3, %vm7973_vm8  ;;  %vm7979_vm8 = vnez %v7905_v46  ;;  %v7983_v46 = vmov 0 }
 0x283   : > { %v7976_v59 = vsel %vm5047_vm12, 4294967295, %v7975_v59  ;;  %vm5064_vm3 = vmand %vm7979_vm8, %vm7978_vm2  ;;  %vm936_vm12 = vcmp.eq.f32.partialorder %v7985_v35, %v3640_v43  ;;  %vm7987_vm2 = vcmp.eq.f32.partialorder %v7939_v58, %v3640_v43  ;;  %vm7990_vm8 = vcmp.eq.f32.partialorder %v7948_v54, %v3630_v5 }
 0x284   : > { %vm5079_vm15 = vmand %vm1646_vm13, %vm7982_vm14  ;;  %vm1156_vm14 = vcmp.eq.f32.partialorder %v7985_v35, %v3644_v0  ;;  %vm7986_vm13 = vcmp.eq.f32.partialorder %v7948_v54, %v3633_v13  ;;  %v7998_v58 = vmov 0 }
 0x285   : > { %v7984_v46 = vsel %vm5079_vm15, 4294967295, %v7983_v46  ;;  %vm5103_vm15 = vmand %vm7987_vm2, %vm7986_vm13  ;;  %vm1742_vm2 = vcmp.eq.f32.partialorder %v7960_v28, %v3649_v6  ;;  %vm7996_vm13 = vcmp.eq.f32.partialorder %v4506_v37, %v3743_v14  ;;  %v8015_v28 = vmov 0 }
 0x286   : > { %v7989_v56 = vsel %vm5103_vm15, 4294967295, %v7988_v56  ;;  %vm5110_vm0 = vmand %vm1150_vm7, %vm7990_vm8  ;;  %vm7997_vm7 = vcmp.eq.f32.partialorder %v7948_v54, %v3637_v41  ;;  %v8007_v54 = vld [vmem:[#allocation98_spill] sm:$0xff] }
 0x287   : > { %v7992_v36 = vsel %vm5110_vm0, 4294967295, %v7991_v36  ;;  %vm5117_vm9 = vmand %vm1260_vm11, %vm7993_vm5  ;;  %vm8000_vm5 = vcmp.eq.f32.partialorder %v7963_v8, %v3747_v22  ;;  %vm1790_vm0 = vcmp.eq.f32.partialorder %v4567_v24, %v3760_v18 }
 0x288   : > { %v7995_v42 = vsel %vm5117_vm9, 4294967295, %v7994_v42  ;;  %vm1709_vm15 = vmand %vm4865_vm6, %vm7996_vm13  ;;  %vm8003_vm9 = vcmp.eq.f32.partialorder %v7963_v8, %v3743_v14  ;;  %vm8004_vm6 = vnez %v7922_v30  ;;  %v8012_v30 = vmov 0 }
 0x289   : > { %vm5131_vm8 = vmand %vm1258_vm1, %vm7997_vm7  ;;  %vm1118_vm1 = vcmp.eq.f32.partialorder %v8007_v54, %v3747_v22  ;;  %vm1210_vm7 = vcmp.eq.f32.partialorder %v8007_v54, %v3743_v14 }
 0x28a   : > { %v7999_v58 = vsel %vm5131_vm8, 4294967295, %v7998_v58  ;;  %vm5140_vm11 = vmand %vm4883_vm4, %vm8000_vm5  ;;  %vm8008_vm4 = vcmp.eq.f32.partialorder %v7977_v34, %v3633_v13 }
 0x28b   : > { %v8002_v21 = vsel %vm5140_vm11, 4294967295, %v8001_v21  ;;  %vm5149_vm13 = vmand %vm8004_vm6, %vm8003_vm9  ;;  %vm8011_vm11 = vcmp.eq.f32.partialorder %v7977_v34, %v3630_v5  ;;  %vm8014_vm6 = vcmp.eq.f32.partialorder %v3917_v7, %v3637_v41  ;;  %v8022_v7 = vmov 0 }
 0x28c   : > { %v8006_v11 = vsel %vm5149_vm13, 4294967295, %v8005_v11  ;;  %vm5160_vm5 = vmand %vm936_vm12, %vm8008_vm4 }
 0x28d   : > { %v8010_v4 = vsel %vm5160_vm5, 4294967295, %v8009_v4  ;;  %vm5167_vm9 = vmand %vm1156_vm14, %vm8011_vm11  ;;  %vm8020_vm14 = vcmp.eq.f32.partialorder %v7963_v8, %v3760_v18  ;;  %vm8021_vm11 = vnez %v7926_v49  ;;  %v8032_v49 = vmov 0 }
 0x28e   : > { %v8013_v30 = vsel %vm5167_vm9, 4294967295, %v8012_v30  ;;  %vm5174_vm13 = vmand %vm1742_vm2, %vm8014_vm6  ;;  %vm8024_vm2 = vcmp.eq.f32.partialorder %v4506_v37, %v3760_v18  ;;  %vm8025_vm6 = vnez %v7936_v55  ;;  %v8029_v37 = vmov 0  ;;  %v8034_v55 = vld [vmem:[#allocation99_spill] sm:$0xff] }
 0x28f   : > { %v8016_v28 = vsel %vm5174_vm13, 4294967295, %v8015_v28  ;;  %vm8017_vm12 = vmor %vm5027_vm10, %vm5064_vm3  ;;  %vm8035_vm3 = vnez %v7932_v32  ;;  %vm8036_vm10 = vnez %v7929_v53  ;;  %v5247_v32 = vpop.permute.xlu0 %1869  ;;  %v8041_v53 = vld [vmem:[#allocation94_spill] sm:$0xff]  ;;  %v8062_v8 = vmov 0 }
 0x290   : > { %vm5183_vm4 = vmor %vm8017_vm12, %vm1709_vm15  ;;  %vm8028_vm12 = vnez %v7952_v48  ;;  %v5233_v48 = vpop.permute.xlu1 %1581  ;;  %vm8045_vm15 = vcmp.eq.f32.partialorder %v4567_v24, %v3747_v22 }
 0x291   : > { %v8019_v40 = vsel %vm5183_vm4, 4294967295, %v8018_v40  ;;  %vm5192_vm9 = vmand %vm8021_vm11, %vm8020_vm14  ;;  %vm8031_vm11 = vnez %v7955_v44  ;;  %v8037_v44 = vld [vmem:[#allocation90_spill] sm:$0xff] }
 0x292   : > { %v8023_v7 = vsel %vm5192_vm9, 4294967295, %v8022_v7  ;;  %vm5201_vm13 = vmand %vm8025_vm6, %vm8024_vm2  ;;  %vm1206_vm6 = vcmp.eq.f32.partialorder %v8041_v53, %v3743_v14  ;;  %vm1314_vm9 = vcmp.eq.f32.partialorder %v8041_v53, %v3760_v18 }
 0x293   : > { %v8027_v20 = vsel %vm5201_vm13, 4294967295, %v8026_v20  ;;  %vm5215_vm14 = vmand %vm8028_vm12, %vm1118_vm1  ;;  %vm1262_vm12 = vcmp.eq.f32.partialorder %v7940_v39, %v3649_v6  ;;  %v8043_v39 = vmov 0 }
 0x294   : > { %v8030_v37 = vsel %vm5215_vm14, 4294967295, %v8029_v37  ;;  %vm5221_vm2 = vmand %vm8031_vm11, %vm1210_vm7  ;;  %vm938_vm7 = vcmp.eq.f32.partialorder %v8037_v44, %v3640_v43  ;;  %vm8038_vm11 = vnez %v7944_v3  ;;  %vm8046_vm14 = vnez %v7966_v27  ;;  %v8108_v3 = vld [vmem:[#allocation106_spill] sm:$0xff] }
 0x295   : > { %v8033_v49 = vsel %vm5221_vm2, 4294967295, %v8032_v49  ;;  %vm1234_vm1 = vmor %vm8036_vm10, %vm8035_vm3  ;;  %vm1158_vm10 = vcmp.eq.f32.partialorder %v8037_v44, %v3644_v0  ;;  %vm1114_vm3 = vcmp.eq.f32.partialorder %v8041_v53, %v3747_v22  ;;  %v8054_v27 = vmov 0 }
 0x296   : > { %vm5241_vm13 = vmor %vm1234_vm1, %vm8038_vm11  ;;  %vm1316_vm1 = vcmp.eq.f32.partialorder %v7949_v61, %v3760_v18  ;;  %vm8042_vm11 = vcmp.eq.f32.partialorder %v7923_v63, %v3637_v41  ;;  %v8049_v61 = vld [vmem:[#allocation100_spill] sm:$0xff]  ;;  %v8051_v63 = vmov 0 }
 0x297   : > { %vm5260_vm4 = vmand %vm1262_vm12, %vm8042_vm11  ;;  %vm1120_vm5 = vcmp.eq.f32.partialorder %v8049_v61, %v3747_v22  ;;  %vm1212_vm12 = vcmp.eq.f32.partialorder %v8049_v61, %v3743_v14  ;;  %vm8050_vm11 = vcmp.eq.f32.partialorder %v8034_v55, %v3633_v13 }
 0x298   : > { %v8044_v39 = vsel %vm5260_vm4, 4294967295, %v8043_v39  ;;  %vm5269_vm2 = vmand %vm8046_vm14, %vm8045_vm15  ;;  %vm8053_vm15 = vcmp.eq.f32.partialorder %v8034_v55, %v3630_v5 }
 0x299   : > { %vm5282_vm4 = vmand %vm938_vm7, %vm8050_vm11  ;;  %vm8056_vm7 = vcmp.eq.f32.partialorder %v4567_v24, %v3743_v14  ;;  %vm8057_vm11 = vnez %v7984_v46  ;;  %v8067_v24 = vmov 0  ;;  %v8081_v46 = vmov 0 }
 0x29a   : > { %v8052_v63 = vsel %vm5282_vm4, 4294967295, %v8051_v63  ;;  %vm5289_vm14 = vmand %vm1158_vm10, %vm8053_vm15  ;;  %vm8058_vm10 = vnez %v7989_v56  ;;  %v8072_v56 = vmov 0 }
 0x29b   : > { %v8055_v27 = vsel %vm5289_vm14, 4294967295, %v8054_v27  ;;  %vm1630_vm8 = vmor %vm5241_vm13, %vm5269_vm2  ;;  %vm8061_vm14 = vnez %v7992_v36  ;;  %v8069_v36 = vmov 0 }
 0x29c   : > { %vm1710_vm4 = vmand %vm8057_vm11, %vm8056_vm7  ;;  %vm8074_vm11 = vnez %v8010_v4  ;;  %v5366_v4 = vpop.permute.xlu0 %1877 }
 0x29d   : > { %vm5306_vm15 = vmand %vm8058_vm10, %vm1114_vm3  ;;  %vm8066_vm3 = vnez %v7995_v42  ;;  %v8075_v42 = vmov 0 }
 0x29e   : > { %v8060_v50 = vsel %vm5306_vm15, 4294967295, %v8059_v50  ;;  %vm5312_vm2 = vmand %vm8061_vm14, %vm1206_vm6  ;;  %vm1284_vm15 = vcmp.eq.f32.partialorder %v7977_v34, %v3637_v41  ;;  %vm8071_vm14 = vnez %v7999_v58  ;;  %v8078_v34 = vmov 0  ;;  %v5356_v58 = vpop.permute.xlu1 %1589 }
 0x29f   : > { %v8063_v8 = vsel %vm5312_vm2, 4294967295, %v8062_v8  ;;  %vm5322_vm10 = vmand %vm8066_vm3, %vm1316_vm1  ;;  %vm8077_vm1 = vnez %v8013_v30  ;;  %v8083_v30 = vmov 0 }
 0x2a0   : > { %v8068_v24 = vsel %vm5322_vm10, 4294967295, %v8067_v24  ;;  %vm5328_vm6 = vmor %vm1630_vm8, %vm1710_vm4  ;;  %vm8080_vm8 = vnez %v8016_v28  ;;  %vm1792_vm10 = vcmp.eq.f32.partialorder %v4659_v16, %v3760_v18  ;;  %v8100_v28 = vmov 0  ;;  %v5424_v53 = vpop.permute.xlu0 %1885 }
 0x2a1   : > { %v8070_v36 = vsel %vm5328_vm6, 4294967295, %v8069_v36  ;;  %vm5334_vm2 = vmand %vm8071_vm14, %vm1314_vm9  ;;  %vm8085_vm14 = vnez %v8006_v11  ;;  %vm8088_vm6 = vnez %v8023_v7  ;;  %v8097_v11 = vmov 0  ;;  %v8102_v7 = vld [vmem:[#allocation105_spill] sm:$0xff] }
 0x2a2   : > { %v8073_v56 = vsel %vm5334_vm2, 4294967295, %v8072_v56  ;;  %vm5340_vm13 = vmand %vm8074_vm11, %vm1120_vm5  ;;  %vm1264_vm5 = vcmp.eq.f32.partialorder %v7985_v35, %v3649_v6  ;;  %v8087_v35 = vld [vmem:[#allocation101_spill] sm:$0xff] }
 0x2a3   : > { %v8076_v42 = vsel %vm5340_vm13, 4294967295, %v8075_v42  ;;  %vm5346_vm3 = vmand %vm8077_vm1, %vm1212_vm12  ;;  %vm1600_vm12 = vcmp.eq.f32.partialorder %v4659_v16, %v3747_v22  ;;  %vm8086_vm1 = vnez %v8002_v21  ;;  %vm1122_vm9 = vcmp.eq.f32.partialorder %v8087_v35, %v3747_v22  ;;  %v8171_v21 = vld [vmem:[#allocation111_spill] sm:$0xff] }
 0x2a4   : > { %v8079_v34 = vsel %vm5346_vm3, 4294967295, %v8078_v34  ;;  %vm5352_vm4 = vmand %vm8080_vm8, %vm1790_vm0  ;;  %vm1318_vm0 = vcmp.eq.f32.partialorder %v8007_v54, %v3760_v18  ;;  %v8089_v54 = vld [vmem:[#allocation104_spill] sm:$0xff] }
 0x2a5   : > { %v8082_v46 = vsel %vm5352_vm4, 4294967295, %v8081_v46  ;;  %vm5370_vm11 = vmand %vm1264_vm5, %vm1284_vm15  ;;  %vm1214_vm4 = vcmp.eq.f32.partialorder %v8087_v35, %v3743_v14  ;;  %vm1696_vm15 = vcmp.eq.f32.partialorder %v4659_v16, %v3743_v14  ;;  %vm8090_vm5 = vnez %v8089_v54 }
 0x2a6   : > { %v8084_v30 = vsel %vm5370_vm11, 4294967295, %v8083_v30  ;;  %vm1236_vm8 = vmor %vm8086_vm1, %vm8085_vm14  ;;  %vm8093_vm1 = vnez %v8044_v39  ;;  %vm8099_vm14 = vnez %v8055_v27  ;;  %v8104_v16 = vmov 0  ;;  %v5479_v27 = vpop.permute.xlu0 %1893 }
 0x2a7   : > { %vm1344_vm2 = vmor %vm1236_vm8, %vm8088_vm6  ;;  %vm1286_vm6 = vcmp.eq.f32.partialorder %v8034_v55, %v3637_v41  ;;  %v5416_v55 = vpop.permute.xlu1 %1837  ;;  %v8106_v39 = vmov 0 }
 0x2a8   : > { %vm1616_vm11 = vmand %vm8090_vm5, %vm1600_vm12  ;;  %vm8096_vm12 = vnez %v8052_v63  ;;  %v8110_v63 = vmov 0 }
 0x2a9   : > { %vm5394_vm7 = vmand %vm8093_vm1, %vm1318_vm0  ;;  %vm8103_vm0 = vnez %v8102_v7  ;;  %v8177_v7 = vld [vmem:[#allocation113_spill] sm:$0xff] }
 0x2aa   : > { %vm1632_vm8 = vmor %vm1344_vm2, %vm1616_vm11  ;;  %vm1266_vm2 = vcmp.eq.f32.partialorder %v8037_v44, %v3649_v6  ;;  %v8116_v44 = vmov 0 }
 0x2ab   : > { %vm5404_vm5 = vmand %vm8096_vm12, %vm1122_vm9  ;;  %vm1602_vm12 = vcmp.eq.f32.partialorder %v4773_v60, %v3747_v22 }
 0x2ac   : > { %v8098_v11 = vsel %vm5404_vm5, 4294967295, %v8097_v11  ;;  %vm5410_vm13 = vmand %vm8099_vm14, %vm1214_vm4  ;;  %vm1320_vm4 = vcmp.eq.f32.partialorder %v8049_v61, %v3760_v18  ;;  %v5475_v61 = vpop.permute.xlu1 %1845 }
 0x2ad   : > { %v8101_v28 = vsel %vm5410_vm13, 4294967295, %v8100_v28  ;;  %vm1712_vm1 = vmand %vm8103_vm0, %vm1696_vm15  ;;  %vm8109_vm15 = vnez %v8108_v3  ;;  %vm8112_vm0 = vnez %v8068_v24  ;;  %vm8122_vm13 = vnez %v8084_v30  ;;  %v8161_v30 = vld [vmem:[#allocation110_spill] sm:$0xff] }
 0x2ae   : > { %vm5420_vm11 = vmor %vm1632_vm8, %vm1712_vm1  ;;  %vm8114_vm1 = vnez %v7976_v59  ;;  %v8126_v59 = vld [vmem:[#allocation107_spill] sm:$0xff]  ;;  %v8138_v24 = vmov 0  ;;  %v8181_v3 = vld [vmem:[#allocation114_spill] sm:$0xff] }
 0x2af   : > { %v8105_v16 = vsel %vm5420_vm11, 4294967295, %v8104_v16  ;;  %vm5428_vm9 = vmand %vm1266_vm2, %vm1286_vm6  ;;  %vm8113_vm6 = vnez %v7972_v38  ;;  %v8123_v38 = vmov 0  ;;  %vm1794_vm11 = vcmp.eq.f32.partialorder %v4773_v60, %v3760_v18 }
 0x2b0   : > { %v8107_v39 = vsel %vm5428_vm9, 4294967295, %v8106_v39  ;;  %vm5434_vm14 = vmand %vm8109_vm15, %vm1792_vm10  ;;  %vm8118_vm10 = vnez %v8063_v8  ;;  %vm8119_vm15 = vnez %v8060_v50  ;;  %v8128_v50 = vld [vmem:[#allocation108_spill] sm:$0xff]  ;;  %v8130_v8 = vmov 0 }
 0x2b1   : > { %v8111_v63 = vsel %vm5434_vm14, 4294967295, %v8110_v63  ;;  %vm8115_vm2 = vmor %vm8113_vm6, %vm8114_vm1  ;;  %vm1698_vm1 = vcmp.eq.f32.partialorder %v4773_v60, %v3743_v14  ;;  %v8189_v60 = vmov 0 }
 0x2b2   : > { %vm5451_vm9 = vmor %vm8115_vm2, %vm8112_vm0  ;;  %vm8125_vm0 = vnez %v8073_v56  ;;  %vm8127_vm2 = vnez %v8126_v59  ;;  %v8148_v56 = vmov 0  ;;  %v8185_v59 = vmov 0 }
 0x2b3   : > { %v8117_v44 = vsel %vm5451_vm9, 4294967295, %v8116_v44  ;;  %vm1238_vm5 = vmor %vm8119_vm15, %vm8118_vm10 }
 0x2b4   : > { %vm5465_vm3 = vmand %vm8122_vm13, %vm1320_vm4  ;;  %vm1322_vm13 = vcmp.eq.f32.partialorder %v8087_v35, %v3760_v18  ;;  %vm8129_vm4 = vnez %v8128_v50  ;;  %v8163_v35 = vmov 0  ;;  %v8187_v50 = vld [vmem:[#allocation116_spill] sm:$0xff] }
 0x2b5   : > { %v8124_v38 = vsel %vm5465_vm3, 4294967295, %v8123_v38  ;;  %vm1346_vm6 = vmor %vm1238_vm5, %vm8125_vm0  ;;  %vm8142_vm3 = vnez %v8107_v39  ;;  %v8179_v39 = vmov 0 }
 0x2b6   : > { %vm1618_vm10 = vmand %vm8127_vm2, %vm1602_vm12  ;;  %vm1604_vm12 = vcmp.eq.f32.partialorder %v4904_v1, %v3747_v22  ;;  %vm8133_vm2 = vnez %v8033_v49  ;;  %v5532_v49 = vpop.permute.xlu0 %1917 }
 0x2b7   : > { %vm1634_vm15 = vmor %vm1346_vm6, %vm1618_vm10  ;;  %vm8132_vm6 = vnez %v8030_v37 }
 0x2b8   : > { %vm1714_vm5 = vmand %vm8129_vm4, %vm1698_vm1  ;;  %vm8137_vm1 = vnez %v7604_v12  ;;  %vm8140_vm4 = vnez %v8101_v28  ;;  %v5526_v12 = vpop.permute.xlu1 %1849  ;;  %v8175_v28 = vmov 0 }
 0x2b9   : > { %vm5485_vm0 = vmor %vm1634_vm15, %vm1714_vm5  ;;  %vm8141_vm5 = vnez %v8098_v11 }
 0x2ba   : > { %v8131_v8 = vsel %vm5485_vm0, 4294967295, %v8130_v8  ;;  %vm8134_vm10 = vmor %vm8132_vm6, %vm8133_vm2  ;;  %vm8145_vm6 = vnez %v7606_v10 }
 0x2bb   : > { %vm5498_vm8 = vmor %vm8134_vm10, %vm5394_vm7  ;;  %vm8146_vm10 = vnez %v8117_v44 }
 0x2bc   : > { %vm5504_vm15 = vmand %vm8137_vm1, %vm1794_vm11  ;;  %vm1700_vm11 = vcmp.eq.f32.partialorder %v4904_v1, %v3743_v14 }
 0x2bd   : > { %v8139_v24 = vsel %vm5504_vm15, 4294967295, %v8138_v24  ;;  %vm5514_vm9 = vmand %vm8142_vm3, %vm1322_vm13  ;;  %vm1796_vm3 = vcmp.eq.f32.partialorder %v4904_v1, %v3760_v18  ;;  %vm8147_vm13 = vnez %v7609_v17  ;;  %vm8151_vm15 = vnez %v8076_v42  ;;  %v8156_v17 = vld [vmem:[#allocation109_spill] sm:$0xff]  ;;  %v5565_v42 = vpop.permute.xlu0 %1929 }
 0x2be   : > { %vm1620_vm2 = vmand %vm8145_vm6, %vm1604_vm12  ;;  %vm1606_vm12 = vcmp.eq.f32.partialorder %v5068_v15, %v3747_v22  ;;  %vm8150_vm6 = vnez %v8124_v38  ;;  %v8158_v1 = vmov 0  ;;  %v8183_v38 = vld [vmem:[#allocation115_spill] sm:$0xff] }
 0x2bf   : > { %vm1636_vm1 = vmor %vm8146_vm10, %vm1620_vm2  ;;  %vm8152_vm2 = vnez %v8079_v34  ;;  %v5569_v34 = vpop.permute.xlu1 %1857 }
 0x2c0   : > { %vm1716_vm14 = vmand %vm8147_vm13, %vm1700_vm11  ;;  %vm8157_vm11 = vnez %v8156_v17  ;;  %vm1702_vm13 = vcmp.eq.f32.partialorder %v5068_v15, %v3743_v14 }
 0x2c1   : > { %vm5536_vm7 = vmor %vm1636_vm1, %vm1716_vm14  ;;  %v5606_v54 = vpop.permute.xlu0 %1937 }
 0x2c2   : > { %v8149_v56 = vsel %vm5536_vm7, 4294967295, %v8148_v56  ;;  %vm8153_vm10 = vmor %vm8151_vm15, %vm8152_vm2  ;;  %vm8160_vm15 = vnez %v7615_v47  ;;  %vm1798_vm2 = vcmp.eq.f32.partialorder %v5068_v15, %v3760_v18  ;;  %v8169_v15 = vmov 0 }
 0x2c3   : > { %vm5549_vm0 = vmor %vm8153_vm10, %vm8150_vm6  ;;  %vm8162_vm10 = vnez %v8161_v30  ;;  %v5610_v11 = vpop.permute.xlu1 %1865 }
 0x2c4   : > { %vm5555_vm14 = vmand %vm8157_vm11, %vm1796_vm3 }
 0x2c5   : > { %v8159_v1 = vsel %vm5555_vm14, 4294967295, %v8158_v1  ;;  %vm1622_vm6 = vmand %vm8160_vm15, %vm1606_vm12  ;;  %vm1608_vm14 = vcmp.eq.f32.partialorder %v5233_v48, %v3747_v22 }
 0x2c6   : > { %vm1638_vm3 = vmor %vm5498_vm8, %vm1622_vm6  ;;  %vm8188_vm6 = vnez %v8187_v50 }
 0x2c7   : > { %vm1718_vm11 = vmand %vm8162_vm10, %vm1702_vm13  ;;  %vm8168_vm13 = vnez %v7630_v51  ;;  %v8173_v51 = vld [vmem:[#allocation112_spill] sm:$0xff]  ;;  %v5640_v44 = vpop.permute.xlu1 %1873 }
 0x2c8   : > { %vm5577_vm1 = vmor %vm1638_vm3, %vm1718_vm11  ;;  %vm1704_vm3 = vcmp.eq.f32.partialorder %v5233_v48, %v3743_v14  ;;  %vm8174_vm10 = vnez %v8173_v51  ;;  %v8197_v51 = vmov 0 }
 0x2c9   : > { %v8164_v35 = vsel %vm5577_vm1, 4294967295, %v8163_v35  ;;  %vm8165_vm8 = vmor %vm8141_vm5, %vm8140_vm4 }
 0x2ca   : > { %vm5590_vm12 = vmor %vm8165_vm8, %vm5514_vm9  ;;  %vm8172_vm9 = vnez %v8171_v21  ;;  %v8194_v21 = vmov 0 }
 0x2cb   : > { %vm5596_vm15 = vmand %vm8168_vm13, %vm1798_vm2  ;;  %vm1800_vm2 = vcmp.eq.f32.partialorder %v5233_v48, %v3760_v18  ;;  %vm1610_vm13 = vcmp.eq.f32.partialorder %v5356_v58, %v3747_v22  ;;  %v5636_v48 = vpop.permute.xlu0 %1945  ;;  %v5660_v10 = vpop.permute.xlu1 %1881 }
 0x2cc   : > { %v8170_v15 = vsel %vm5596_vm15, 4294967295, %v8169_v15  ;;  %vm1624_vm4 = vmand %vm8172_vm9, %vm1608_vm14  ;;  %vm8178_vm14 = vnez %v8177_v7  ;;  %8191 = vst [vmem:[#allocation102_spill] sm:$0xff] %v5660_v10  ;;  %vm8205_vm15 = vnez %v8111_v63  ;;  %v8212_v63 = vmov 0 }
 0x2cd   : > { %vm1640_vm5 = vmor %vm5549_vm0, %vm1624_vm4  ;;  %vm8182_vm4 = vnez %v8181_v3  ;;  %v8200_v3 = vmov 0 }
 0x2ce   : > { %vm1720_vm11 = vmand %vm8174_vm10, %vm1704_vm3  ;;  %vm1706_vm3 = vcmp.eq.f32.partialorder %v5356_v58, %v3743_v14  ;;  %vm1802_vm10 = vcmp.eq.f32.partialorder %v5356_v58, %v3760_v18 }
 0x2cf   : > { %vm5618_vm8 = vmor %vm1640_vm5, %vm1720_vm11  ;;  %vm8184_vm11 = vnez %v8183_v38  ;;  %v5658_v37 = vpop.permute.xlu0 %1953  ;;  %v1890_v58 = vpop.permute.xlu1 %1889 }
 0x2d0   : > { %v8176_v28 = vsel %vm5618_vm8, 4294967295, %v8175_v28  ;;  %vm5626_vm9 = vmand %vm8178_vm14, %vm1800_vm2  ;;  %vm8204_vm8 = vnez %v8105_v16 }
 0x2d1   : > { %v8180_v39 = vsel %vm5626_vm9, 4294967295, %v8179_v39  ;;  %vm1626_vm5 = vmand %vm8182_vm4, %vm1610_vm13  ;;  %vm2233_vm4 = vcmp.eq.f32.partialorder %v1890_v58, %v3649_v6 }
 0x2d2   : > { %vm1642_vm2 = vmor %vm5590_vm12, %vm1626_vm5  ;;  %vm1913_vm12 = vcmp.eq.f32.partialorder %v1890_v58, %v3640_v43 }
 0x2d3   : > { %vm1722_vm14 = vmand %vm8184_vm11, %vm1706_vm3  ;;  %v5662_v17 = vpop.permute.xlu0 %1961  ;;  %v5664_v47 = vpop.permute.xlu1 %1897  ;;  %vm2137_vm3 = vcmp.eq.f32.partialorder %v1890_v58, %v3644_v0 }
 0x2d4   : > { %vm5648_vm0 = vmor %vm1642_vm2, %vm1722_vm14  ;;  %8192 = vst [vmem:[#allocation83_spill] sm:$0xff] %v5662_v17 }
 0x2d5   : > { %v8186_v59 = vsel %vm5648_vm0, 4294967295, %v8185_v59  ;;  %vm5654_vm9 = vmand %vm8188_vm6, %vm1802_vm10  ;;  %8193 = vst [vmem:[#allocation95_spill] sm:$0xff] %v5664_v47 }
 0x2d6   : > { %v8190_v60 = vsel %vm5654_vm9, 4294967295, %v8189_v60  ;;  %vm8206_vm1 = vmor %vm8204_vm8, %vm8205_vm15  ;;  %vm2130_vm15 = vcmp.eq.f32.partialorder %v5089_v31, %v3644_v0 }
 0x2d7   : > { %v1970_v30 = vpop.permute.xlu0 %1969  ;;  %v5680_v7 = vpop.permute.xlu1 %1921 }
 0x2d8   : > { %vm1993_vm13 = vcmp.eq.f32.partialorder %v1970_v30, %v3633_v13  ;;  %vm2153_vm6 = vcmp.eq.f32.partialorder %v1970_v30, %v3630_v5  ;;  %vm2249_vm5 = vcmp.eq.f32.partialorder %v1970_v30, %v3637_v41 }
 0x2d9   : > { %vm5672_vm2 = vmand %vm1913_vm12, %vm1993_vm13  ;;  %vm1904_vm13 = vcmp.eq.f32.partialorder %v4946_v26, %v3640_v43 }
 0x2da   : > { %v8195_v21 = vsel %vm5672_vm2, 4294967295, %v8194_v21  ;;  %vm5676_vm10 = vmand %vm2137_vm3, %vm2153_vm6  ;;  %vm2128_vm6 = vcmp.eq.f32.partialorder %v4946_v26, %v3644_v0 }
 0x2db   : > { %8196 = vst [vmem:[#allocation84_spill] sm:$0xff] %v8195_v21  ;;  %v8198_v51 = vsel %vm5676_vm10, 4294967295, %v8197_v51  ;;  %vm5682_vm11 = vmand %vm2233_vm4, %vm2249_vm5  ;;  %v5686_v38 = vpop.permute.xlu1 %1925  ;;  %v5688_v50 = vpop.permute.xlu0 %1977  ;;  %v8346_v21 = vmov 0 }
 0x2dc   : > { %8199 = vst [vmem:[#allocation88_spill] sm:$0xff] %v8198_v51  ;;  %v8201_v3 = vsel %vm5682_vm11, 4294967295, %v8200_v3  ;;  %8203 = vst [vmem:[#allocation96_spill] sm:$0xff] %v5688_v50  ;;  %vm2224_vm11 = vcmp.eq.f32.partialorder %v4946_v26, %v3649_v6  ;;  %v8207_v50 = vmov 0  ;;  %v8299_v51 = vld [vmem:[#allocation57_spill] sm:$0xff] }
 0x2dd   : > { %8202 = vst [vmem:[#allocation92_spill] sm:$0xff] %v8201_v3  ;;  %v8290_v3 = vmov 0 }
 0x2df   : > { %v5690_v58 = vpop.permute.xlu0 %2017  ;;  %v1934_v30 = vpop.permute.xlu1 %1933 }
 0x2e0   : > { %vm1984_vm14 = vcmp.eq.f32.partialorder %v1934_v30, %v3633_v13  ;;  %vm2144_vm12 = vcmp.eq.f32.partialorder %v1934_v30, %v3630_v5  ;;  %vm2240_vm3 = vcmp.eq.f32.partialorder %v1934_v30, %v3637_v41 }
 0x2e1   : > { %vm2000_vm4 = vmand %vm1904_vm13, %vm1984_vm14 }
 0x2e2   : > { %vm2160_vm10 = vmand %vm2128_vm6, %vm2144_vm12 }
 0x2e3   : > { %v2030_v47 = vpop.permute.xlu0 %2029  ;;  %vm2256_vm2 = vmand %vm2224_vm11, %vm2240_vm3  ;;  %v1942_v30 = vpop.permute.xlu1 %1941 }
 0x2e4   : > { %vm2080_vm5 = vcmp.eq.f32.partialorder %v2030_v47, %v3747_v22  ;;  %vm2176_vm0 = vcmp.eq.f32.partialorder %v2030_v47, %v3743_v14  ;;  %vm2272_vm13 = vcmp.eq.f32.partialorder %v2030_v47, %v3760_v18  ;;  %vm1986_vm11 = vcmp.eq.f32.partialorder %v1942_v30, %v3633_v13 }
 0x2e5   : > { %vm2096_vm9 = vmand %vm2000_vm4, %vm2080_vm5  ;;  %vm2146_vm4 = vcmp.eq.f32.partialorder %v1942_v30, %v3630_v5  ;;  %vm1906_vm5 = vcmp.eq.f32.partialorder %v5089_v31, %v3640_v43  ;;  %v8221_v47 = vmov 0 }
 0x2e6   : > { %vm2112_vm7 = vmor %vm8206_vm1, %vm2096_vm9  ;;  %vm2242_vm1 = vcmp.eq.f32.partialorder %v1942_v30, %v3637_v41  ;;  %vm2226_vm9 = vcmp.eq.f32.partialorder %v5089_v31, %v3649_v6  ;;  %v8230_v30 = vmov 0 }
 0x2e7   : > { %vm2192_vm14 = vmand %vm2160_vm10, %vm2176_vm0  ;;  %v2038_v26 = vpop.permute.xlu0 %2037  ;;  %v1950_v16 = vpop.permute.xlu1 %1949 }
 0x2e8   : > { %vm2208_vm6 = vmor %vm2112_vm7, %vm2192_vm14  ;;  %vm2082_vm8 = vcmp.eq.f32.partialorder %v2038_v26, %v3747_v22  ;;  %vm2178_vm10 = vcmp.eq.f32.partialorder %v2038_v26, %v3743_v14  ;;  %vm8209_vm14 = vnez %v8131_v8  ;;  %v8214_v8 = vmov 0 }
 0x2e9   : > { %vm2288_vm12 = vmand %vm2256_vm2, %vm2272_vm13 }
 0x2ea   : > { %vm5709_vm3 = vmor %vm2208_vm6, %vm2288_vm12  ;;  %vm8210_vm6 = vnez %v8139_v24  ;;  %v8216_v24 = vmov 0 }
 0x2eb   : > { %v8208_v50 = vsel %vm5709_vm3, 4294967295, %v8207_v50  ;;  %vm2002_vm7 = vmand %vm1906_vm5, %vm1986_vm11  ;;  %vm2274_vm5 = vcmp.eq.f32.partialorder %v2038_v26, %v3760_v18  ;;  %v2046_v31 = vpop.permute.xlu0 %2045  ;;  %v8234_v26 = vld [vmem:[#allocation14_spill] sm:$0xff] }
 0x2ec   : > { %vm2162_vm0 = vmand %vm2130_vm15, %vm2146_vm4 }
 0x2ed   : > { %vm2258_vm2 = vmand %vm2226_vm9, %vm2242_vm1  ;;  %vm1981_vm9 = vcmp.eq.f32.partialorder %v5680_v7, %v3633_v13 }
 0x2ee   : > { %vm2098_vm13 = vmand %vm2002_vm7, %vm2082_vm8  ;;  %vm1988_vm7 = vcmp.eq.f32.partialorder %v1950_v16, %v3633_v13  ;;  %vm1901_vm8 = vcmp.eq.f32.partialorder %v4786_v2, %v3640_v43 }
 0x2ef   : > { %vm8211_vm12 = vmor %vm8209_vm14, %vm8210_vm6  ;;  %vm2125_vm14 = vcmp.eq.f32.partialorder %v4786_v2, %v3644_v0  ;;  %vm2132_vm6 = vcmp.eq.f32.partialorder %v5247_v32, %v3644_v0 }
 0x2f0   : > { %vm2114_vm3 = vmor %vm8211_vm12, %vm2098_vm13  ;;  %vm2141_vm13 = vcmp.eq.f32.partialorder %v5680_v7, %v3630_v5 }
 0x2f1   : > { %vm2194_vm11 = vmand %vm2162_vm0, %vm2178_vm10  ;;  %vm1908_vm0 = vcmp.eq.f32.partialorder %v5247_v32, %v3640_v43  ;;  %vm2244_vm10 = vcmp.eq.f32.partialorder %v1950_v16, %v3637_v41 }
 0x2f2   : > { %vm2210_vm4 = vmor %vm2114_vm3, %vm2194_vm11  ;;  %vm2148_vm3 = vcmp.eq.f32.partialorder %v1950_v16, %v3630_v5  ;;  %vm2228_vm11 = vcmp.eq.f32.partialorder %v5247_v32, %v3649_v6  ;;  %v1958_v32 = vpop.permute.xlu1 %1957  ;;  %v8235_v16 = vld [vmem:[#allocation28_spill] sm:$0xff] }
 0x2f3   : > { %vm2290_vm15 = vmand %vm2258_vm2, %vm2274_vm5  ;;  %vm2084_vm5 = vcmp.eq.f32.partialorder %v2046_v31, %v3747_v22 }
 0x2f4   : > { %vm5730_vm1 = vmor %vm2210_vm4, %vm2290_vm15 }
 0x2f5   : > { %v8213_v63 = vsel %vm5730_vm1, 4294967295, %v8212_v63  ;;  %vm5744_vm2 = vmand %vm1901_vm8, %vm1981_vm9  ;;  %vm2180_vm8 = vcmp.eq.f32.partialorder %v2046_v31, %v3743_v14 }
 0x2f6   : > { %v8215_v8 = vsel %vm5744_vm2, 4294967295, %v8214_v8  ;;  %vm2004_vm12 = vmand %vm1908_vm0, %vm1988_vm7  ;;  %vm8218_vm2 = vnez %v8149_v56  ;;  %vm8219_vm0 = vnez %v8159_v1  ;;  %v2054_v56 = vpop.permute.xlu0 %2053  ;;  %v8227_v1 = vmov 0 }
 0x2f7   : > { %vm5756_vm4 = vmand %vm2125_vm14, %vm2141_vm13  ;;  %vm2276_vm14 = vcmp.eq.f32.partialorder %v2046_v31, %v3760_v18  ;;  %v1966_v31 = vpop.permute.xlu1 %1965 }
 0x2f8   : > { %v8217_v24 = vsel %vm5756_vm4, 4294967295, %v8216_v24  ;;  %vm2164_vm15 = vmand %vm2132_vm6, %vm2148_vm3  ;;  %vm2077_vm3 = vcmp.eq.f32.partialorder %v5690_v58, %v3747_v22 }
 0x2f9   : > { %vm2260_vm9 = vmand %vm2228_vm11, %vm2244_vm10 }
 0x2fa   : > { %vm2100_vm1 = vmand %vm2004_vm12, %vm2084_vm5  ;;  %vm8223_vm12 = vnez %v8215_v8  ;;  %v8241_v8 = vld [vmem:[#allocation53_spill] sm:$0xff] }
 0x2fb   : > { %vm8220_vm7 = vmor %vm8218_vm2, %vm8219_vm0  ;;  %vm2173_vm2 = vcmp.eq.f32.partialorder %v5690_v58, %v3743_v14 }
 0x2fc   : > { %vm2116_vm13 = vmor %vm8220_vm7, %vm2100_vm1  ;;  %vm1990_vm1 = vcmp.eq.f32.partialorder %v1958_v32, %v3633_v13 }
 0x2fd   : > { %vm2196_vm4 = vmand %vm2164_vm15, %vm2180_vm8  ;;  %vm2150_vm15 = vcmp.eq.f32.partialorder %v1958_v32, %v3630_v5  ;;  %vm8225_vm8 = vnez %v8027_v20  ;;  %v8233_v20 = vld [vmem:[#allocation5_spill] sm:$0xff] }
 0x2fe   : > { %vm2212_vm6 = vmor %vm2116_vm13, %vm2196_vm4  ;;  %vm1910_vm4 = vcmp.eq.f32.partialorder %v5366_v4, %v3640_v43  ;;  %vm8229_vm13 = vnez %v8217_v24  ;;  %v8242_v24 = vld [vmem:[#allocation30_spill] sm:$0xff] }
 0x2ff   : > { %vm2292_vm10 = vmand %vm2260_vm9, %vm2276_vm14  ;;  %vm8224_vm9 = vnez %v8019_v40  ;;  %v8232_v40 = vld [vmem:[#allocation27_spill] sm:$0xff] }
 0x300   : > { %vm5769_vm11 = vmor %vm2212_vm6, %vm2292_vm10  ;;  %vm2134_vm6 = vcmp.eq.f32.partialorder %v5366_v4, %v3644_v0 }
 0x301   : > { %v8222_v47 = vsel %vm5769_vm11, 4294967295, %v8221_v47  ;;  %vm2093_vm5 = vmand %vm8223_vm12, %vm2077_vm3  ;;  %vm2246_vm3 = vcmp.eq.f32.partialorder %v1958_v32, %v3637_v41  ;;  %vm2086_vm12 = vcmp.eq.f32.partialorder %v2054_v56, %v3747_v22  ;;  %v8245_v32 = vmov 0 }
 0x302   : > { %vm8226_vm0 = vmor %vm8224_vm9, %vm8225_vm8 }
 0x303   : > { %vm5786_vm7 = vmor %vm8226_vm0, %vm2093_vm5  ;;  %vm2230_vm5 = vcmp.eq.f32.partialorder %v5366_v4, %v3649_v6  ;;  %vm2182_vm0 = vcmp.eq.f32.partialorder %v2054_v56, %v3743_v14  ;;  %v8239_v4 = vmov 0 }
 0x304   : > { %v8228_v1 = vsel %vm5786_vm7, 4294967295, %v8227_v1  ;;  %vm5792_vm14 = vmand %vm8229_vm13, %vm2173_vm2  ;;  %vm341_vm2 = vcmp.le.f32.partialorder %v8233_v20, %v8232_v40  ;;  %vm425_vm13 = vcmp.le.f32.partialorder %v8235_v16, %v8234_v26  ;;  %vm8236_vm7 = vnez %v8164_v35  ;;  %v8243_v35 = vld [vmem:[#allocation43_spill] sm:$0xff] }
 0x305   : > { %v8231_v30 = vsel %vm5792_vm14, 4294967295, %v8230_v30  ;;  %vm2006_vm10 = vmand %vm1910_vm4, %vm1990_vm1  ;;  %vm8237_vm1 = vnez %v8170_v15  ;;  %v8244_v15 = vld [vmem:[#allocation51_spill] sm:$0xff] }
 0x306   : > { %vm2166_vm9 = vmand %vm2134_vm6, %vm2150_vm15  ;;  %vm2278_vm6 = vcmp.eq.f32.partialorder %v2054_v56, %v3760_v18  ;;  %v8249_v56 = vmov 0  ;;  %v8252_v20 = vld [vmem:[#allocation55_spill] sm:$0xff] }
 0x307   : > { %vm2262_vm8 = vmand %vm2230_vm5, %vm2246_vm3  ;;  %vm2237_vm3 = vcmp.eq.f32.partialorder %v5680_v7, %v3637_v41  ;;  %v2062_v7 = vpop.permute.xlu0 %2061  ;;  %v8253_v26 = vld [vmem:[#allocation71_spill] sm:$0xff] }
 0x308   : > { %vm2102_vm11 = vmand %vm2006_vm10, %vm2086_vm12 }
 0x309   : > { %vm8238_vm4 = vmor %vm8236_vm7, %vm8237_vm1  ;;  %vm525_vm1 = vcmp.le.f32.partialorder %v8242_v24, %v8241_v8  ;;  %vm609_vm7 = vcmp.le.f32.partialorder %v8244_v15, %v8243_v35  ;;  %v8254_v24 = vld [vmem:[#allocation75_spill] sm:$0xff] }
 0x30a   : > { %vm2118_vm14 = vmor %vm8238_vm4, %vm2102_vm11  ;;  %vm2221_vm11 = vcmp.eq.f32.partialorder %v4786_v2, %v3649_v6  ;;  %vm1992_vm4 = vcmp.eq.f32.partialorder %v1966_v31, %v3633_v13  ;;  %v8251_v2 = vld [vmem:[#allocation77_spill] sm:$0xff]  ;;  %v8264_v35 = vld [vmem:[#allocation3_spill] sm:$0xff] }
 0x30b   : > { %vm2198_vm15 = vmand %vm2166_vm9, %vm2182_vm0  ;;  %vm2269_vm0 = vcmp.eq.f32.partialorder %v5690_v58, %v3760_v18  ;;  %v8255_v58 = vmov 0 }
 0x30c   : > { %vm2214_vm5 = vmor %vm2118_vm14, %vm2198_vm15  ;;  %vm725_vm15 = vcmp.le.f32.partialorder %v8252_v20, %v8251_v2  ;;  %v8266_v20 = vld [vmem:[#allocation29_spill] sm:$0xff] }
 0x30d   : > { %vm5815_vm10 = vmand %vm341_vm2, %vm425_vm13  ;;  %vm8248_vm2 = vnez %v8228_v1  ;;  %v8257_v1 = vmov 0 }
 0x30e   : > { %v8240_v4 = vsel %vm5815_vm10, 4294967295, %v8239_v4  ;;  %vm2294_vm12 = vmand %vm2262_vm8, %vm2278_vm6  ;;  %vm8247_vm8 = vnez %v8231_v30  ;;  %v8259_v30 = vld [vmem:[#allocation41_spill] sm:$0xff] }
 0x30f   : > { %vm5825_vm9 = vmor %vm2214_vm5, %vm2294_vm12  ;;  %vm2152_vm5 = vcmp.eq.f32.partialorder %v1966_v31, %v3630_v5  ;;  %vm1912_vm12 = vcmp.eq.f32.partialorder %v5424_v53, %v3640_v43 }
 0x310   : > { %v8246_v32 = vsel %vm5825_vm9, 4294967295, %v8245_v32  ;;  %vm2253_vm14 = vmand %vm2221_vm11, %vm2237_vm3  ;;  %vm809_vm3 = vcmp.le.f32.partialorder %v8254_v24, %v8253_v26  ;;  %vm2088_vm9 = vcmp.eq.f32.partialorder %v2062_v7, %v3747_v22  ;;  %v8270_v26 = vmov 0 }
 0x311   : > { %vm2205_vm13 = vmor %vm8248_vm2, %vm8247_vm8  ;;  %vm2248_vm8 = vcmp.eq.f32.partialorder %v1966_v31, %v3637_v41  ;;  %v8260_v31 = vmov 0 }
 0x312   : > { %vm5836_vm6 = vmand %vm525_vm1, %vm609_vm7  ;;  %vm2136_vm1 = vcmp.eq.f32.partialorder %v5424_v53, %v3644_v0 }
 0x313   : > { %v8250_v56 = vsel %vm5836_vm6, 4294967295, %v8249_v56  ;;  %vm2285_vm11 = vmand %vm2253_vm14, %vm2269_vm0  ;;  %vm2232_vm6 = vcmp.eq.f32.partialorder %v5424_v53, %v3649_v6  ;;  %vm608_vm0 = vcmp.le.f32.partialorder %v8244_v15, %v8259_v30  ;;  %v8265_v53 = vld [vmem:[#allocation15_spill] sm:$0xff]  ;;  %v8272_v30 = vmov 0 }
 0x314   : > { %vm5850_vm7 = vmor %vm2205_vm13, %vm2285_vm11  ;;  %vm2184_vm13 = vcmp.eq.f32.partialorder %v2062_v7, %v3743_v14 }
 0x315   : > { %v8256_v58 = vsel %vm5850_vm7, 4294967295, %v8255_v58  ;;  %vm2008_vm2 = vmand %vm1912_vm12, %vm1992_vm4 }
 0x316   : > { %vm5855_vm10 = vmand %vm725_vm15, %vm809_vm3  ;;  %vm2280_vm3 = vcmp.eq.f32.partialorder %v2062_v7, %v3760_v18  ;;  %v8277_v7 = vld [vmem:[#allocation7_spill] sm:$0xff] }
 0x317   : > { %v8258_v1 = vsel %vm5855_vm10, 4294967295, %v8257_v1  ;;  %vm2168_vm14 = vmand %vm2136_vm1, %vm2152_vm5  ;;  %vm340_vm10 = vcmp.le.f32.partialorder %v8264_v35, %v8232_v40  ;;  %vm424_vm5 = vcmp.le.f32.partialorder %v8235_v16, %v8265_v53  ;;  %vm8268_vm1 = vnez %v8180_v39  ;;  %v8274_v35 = vld [vmem:[#allocation32_spill] sm:$0xff]  ;;  %v1974_v39 = vpop.permute.xlu1 %1973  ;;  %v8278_v53 = vld [vmem:[#allocation18_spill] sm:$0xff] }
 0x318   : > { %vm5863_vm11 = vmand %vm2232_vm6, %vm2248_vm8  ;;  %vm524_vm6 = vcmp.le.f32.partialorder %v8266_v20, %v8241_v8  ;;  %vm8267_vm8 = vnez %v8176_v28  ;;  %v8275_v28 = vld [vmem:[#allocation47_spill] sm:$0xff]  ;;  %v8279_v20 = vmov 0 }
 0x319   : > { %v8261_v31 = vsel %vm5863_vm11, 4294967295, %v8260_v31  ;;  %vm2104_vm12 = vmand %vm2008_vm2, %vm2088_vm9 }
 0x31a   : > { %vm8269_vm7 = vmor %vm8267_vm8, %vm8268_vm1  ;;  %vm528_vm1 = vcmp.le.f32.partialorder %v8274_v35, %v8241_v8  ;;  %vm612_vm8 = vcmp.le.f32.partialorder %v8244_v15, %v8275_v28  ;;  %v8282_v35 = vmov 0  ;;  %v8286_v28 = vld [vmem:[#allocation66_spill] sm:$0xff] }
 0x31b   : > { %vm2120_vm11 = vmor %vm8269_vm7, %vm2104_vm12  ;;  %vm8276_vm7 = vnez %v8261_v31  ;;  %v8317_v31 = vmov 0 }
 0x31c   : > { %vm5884_vm4 = vmand %vm524_vm6, %vm608_vm0  ;;  %vm344_vm6 = vcmp.le.f32.partialorder %v8277_v7, %v8232_v40  ;;  %v8288_v7 = vmov 0 }
 0x31d   : > { %v8271_v26 = vsel %vm5884_vm4, 4294967295, %v8270_v26  ;;  %vm2200_vm9 = vmand %vm2168_vm14, %vm2184_vm13  ;;  %vm7390_vm14 = vmmov 1   ;;  %vm8326_vm4 = vcmp.eq.f32.partialorder %v5532_v49, %v3633_v13 }
 0x31e   : > { %vm2216_vm2 = vmor %vm2120_vm11, %vm2200_vm9  ;;  %vm808_vm9 = vcmp.le.f32.partialorder %v8254_v24, %v8286_v28  ;;  %v8298_v28 = vld [vmem:[#allocation45_spill] sm:$0xff] }
 0x31f   : > { %vm5888_vm15 = vmand %vm340_vm10, %vm424_vm5  ;;  %vm428_vm10 = vcmp.le.f32.partialorder %v8235_v16, %v8278_v53  ;;  %v2070_v53 = vpop.permute.xlu0 %2069  ;;  %vm8294_vm5 = vnez %v8250_v56  ;;  %v8303_v56 = vmov 0 }
 0x320   : > { %v8273_v30 = vsel %vm5888_vm15, 4294967295, %v8272_v30  ;;  %vm2296_vm12 = vmand %vm8276_vm7, %vm2280_vm3  ;;  %vm8327_vm15 = vcmp.eq.f32.partialorder %v5416_v55, %v3640_v43 }
 0x321   : > { %vm2312_vm0 = vmor %vm2216_vm2, %vm2296_vm12  ;;  %vm8287_vm2 = vnez %v8256_v58  ;;  %vm8292_vm12 = vnez %v8258_v1  ;;  %v8296_v58 = vmov 0  ;;  %v8307_v1 = vld [vmem:[#allocation31_spill] sm:$0xff] }
 0x322   : > { %vm5903_vm11 = vmxor %vm2312_vm0, %vm7390_vm14  ;;  %vm8293_vm0 = vnez %v8240_v4  ;;  %v8302_v4 = vld [vmem:[#allocation16_spill] sm:$0xff] }
 0x323   : > { %v8280_v20 = vsel %vm5903_vm11, 4294967295, %v8279_v20  ;;  %vm5907_vm13 = vmand %vm528_vm1, %vm612_vm8  ;;  %vm1994_vm1 = vcmp.eq.f32.partialorder %v1974_v39, %v3633_v13 }
 0x324   : > { %8281 = vst [vmem:[#allocation103_spill] sm:$0xff] %v8280_v20  ;;  %v8283_v35 = vsel %vm5907_vm13, 4294967295, %v8282_v35  ;;  %vm5920_vm7 = vmxor %vm8287_vm2, %vm7390_vm14  ;;  %vm8300_vm13 = vnez %v8190_v60  ;;  %vm2138_vm14 = vcmp.eq.f32.partialorder %v5479_v27, %v3644_v0  ;;  %v8315_v20 = vld [vmem:[#allocation76_spill] sm:$0xff] }
 0x325   : > { %v8289_v7 = vsel %vm5920_vm7, 4294967295, %v8288_v7  ;;  %vm5925_vm8 = vmand %vm344_vm6, %vm428_vm10  ;;  %vm724_vm6 = vcmp.le.f32.partialorder %v8299_v51, %v8251_v2  ;;  %vm1914_vm10 = vcmp.eq.f32.partialorder %v5479_v27, %v3640_v43  ;;  %v8330_v51 = vld [vmem:[#allocation22_spill] sm:$0xff]  ;;  %v8340_v60 = vld [vmem:[#allocation20_spill] sm:$0xff] }
 0x326   : > { %v8291_v3 = vsel %vm5925_vm8, 4294967295, %v8290_v3  ;;  %vm8295_vm11 = vmand %vm8293_vm0, %vm8294_vm5  ;;  %vm8308_vm8 = vcmp.eq.f32.partialorder %v1974_v39, %v3630_v5  ;;  %vm8311_vm5 = vcmp.le.f32.partialorder %v8244_v15, %v8298_v28  ;;  %v8319_v28 = vld [vmem:[#allocation2_spill] sm:$0xff]  ;;  %v2440_v17 = vadd.s32 8, %v8330_v51 }
 0x327   : > { %vm5936_vm3 = vmand %vm8295_vm11, %vm8292_vm12  ;;  %vm8301_vm11 = vnez %v8186_v59  ;;  %vm2124_vm12 = vcmp.eq.f32.partialorder %v5416_v55, %v3644_v0  ;;  %v8339_v59 = vld [vmem:[#allocation9_spill] sm:$0xff] }
 0x328   : > { %v8297_v58 = vsel %vm5936_vm3, 4294967295, %v8296_v58  ;;  %vm5954_vm0 = vmand %vm724_vm6, %vm808_vm9  ;;  %vm526_vm9 = vcmp.le.f32.partialorder %v8307_v1, %v8241_v8  ;;  %vm2234_vm6 = vcmp.eq.f32.partialorder %v5479_v27, %v3649_v6  ;;  %v8312_v27 = vmov 0  ;;  %v8314_v1 = vld [vmem:[#allocation56_spill] sm:$0xff] }
 0x329   : > { %v8304_v56 = vsel %vm5954_vm0, 4294967295, %v8303_v56  ;;  %vm5964_vm2 = vmand %vm1914_vm10, %vm1994_vm1  ;;  %vm2186_vm10 = vcmp.eq.f32.partialorder %v2070_v53, %v3743_v14 }
 0x32a   : > { %vm5979_vm1 = vmand %vm2138_vm14, %vm8308_vm8  ;;  %vm8316_vm8 = vcmp.eq.f32.partialorder %v1974_v39, %v3637_v41  ;;  %vm2140_vm14 = vcmp.eq.f32.partialorder %v5532_v49, %v3630_v5  ;;  %v8323_v39 = vmov 0 }
 0x32b   : > { %vm5990_vm7 = vmand %vm526_vm9, %vm8311_vm5  ;;  %vm342_vm5 = vcmp.le.f32.partialorder %v8319_v28, %v8232_v40  ;;  %v8325_v28 = vld [vmem:[#allocation49_spill] sm:$0xff] }
 0x32c   : > { %v8313_v27 = vsel %vm5990_vm7, 4294967295, %v8312_v27  ;;  %vm6000_vm0 = vmand %vm2234_vm6, %vm8316_vm8  ;;  %vm8321_vm7 = vcmp.eq.f32.partialorder %v2070_v53, %v3747_v22  ;;  %vm8322_vm8 = vcmp.le.f32.partialorder %v8235_v16, %v8302_v4  ;;  %vm614_vm9 = vcmp.le.f32.partialorder %v8244_v15, %v8325_v28 }
 0x32d   : > { %v8318_v31 = vsel %vm6000_vm0, 4294967295, %v8317_v31  ;;  %vm2106_vm6 = vmand %vm5964_vm2, %vm8321_vm7  ;;  %v8331_v4 = vlaneseq  ;;  %v8350_v28 = vmov 0 }
 0x32e   : > { %vm6020_vm3 = vmand %vm342_vm5, %vm8322_vm8  ;;  %vm2282_vm5 = vcmp.eq.f32.partialorder %v2070_v53, %v3760_v18  ;;  %v8341_v53 = vmov 0 }
 0x32f   : > { %v8324_v39 = vsel %vm6020_vm3, 4294967295, %v8323_v39  ;;  %vm6032_vm0 = vmand %vm8327_vm15, %vm8326_vm4  ;;  %v6038_v10 = vand.u32 127, %v8331_v4  ;;  %vm8335_vm4 = vcmp.le.f32.partialorder %v8254_v24, %v8315_v20  ;;  %vm8336_vm15 = vcmp.le.f32.partialorder %v8314_v1, %v8251_v2  ;;  %v2014_v20 = vpop.permute.xlu1 %2013  ;;  %v8349_v1 = vld [vmem:[#allocation73_spill] sm:$0xff] }
 0x330   : > { %v8329_v19 = vsel %vm6032_vm0, 4294967295, %v8328_v19  ;;  %vm8332_vm7 = vmor %vm8301_vm11, %vm8300_vm13  ;;  %v8337_v4 = vmov 0  ;;  %vm346_vm13 = vcmp.le.f32.partialorder %v8339_v59, %v8232_v40  ;;  %vm430_vm11 = vcmp.le.f32.partialorder %v8235_v16, %v8340_v60  ;;  %v8352_v59 = vld [vmem:[#allocation42_spill] sm:$0xff]  ;;  %v8357_v60 = vld [vmem:[#allocation87_spill] sm:$0xff] }
 0x331   : > { %vm6045_vm2 = vmor %vm8332_vm7, %vm2106_vm6 }
 0x332   : > { %vm6056_vm8 = vmand %vm8336_vm15, %vm8335_vm4  ;;  %vm8363_vm4 = vnez %v8271_v26  ;;  %v8373_v26 = vmov 0 }
 0x333   : > { %v8338_v4 = vsel %vm6056_vm8, 4294967295, %v8337_v4  ;;  %vm2202_vm0 = vmand %vm5979_vm1, %vm2186_vm10  ;;  %vm8345_vm1 = vcmp.le.f32.partialorder %v8320_v57, %v8241_v8  ;;  %v8354_v57 = vmov 0 }
 0x334   : > { %vm6066_vm6 = vmand %vm2124_vm12, %vm2140_vm14  ;;  %vm8348_vm12 = vnez %v8318_v31  ;;  %v8356_v31 = vld [vmem:[#allocation59_spill] sm:$0xff] }
 0x335   : > { %v8342_v53 = vsel %vm6066_vm6, 4294967295, %v8341_v53  ;;  %vm2218_vm7 = vmor %vm6045_vm2, %vm2202_vm0  ;;  %vm810_vm6 = vcmp.le.f32.partialorder %v8254_v24, %v8349_v1  ;;  %v8359_v1 = vld [vmem:[#allocation17_spill] sm:$0xff] }
 0x336   : > { %vm6079_vm10 = vmand %vm8345_vm1, %vm614_vm9  ;;  %vm611_vm9 = vcmp.le.f32.partialorder %v8244_v15, %v8352_v59  ;;  %vm2220_vm1 = vcmp.eq.f32.partialorder %v5416_v55, %v3649_v6  ;;  %v8360_v55 = vld [vmem:[#allocation33_spill] sm:$0xff]  ;;  %v8367_v59 = vmov 0 }
 0x337   : > { %v8347_v21 = vsel %vm6079_vm10, 4294967295, %v8346_v21  ;;  %vm2298_vm14 = vmand %vm8348_vm12, %vm2282_vm5  ;;  %vm2236_vm5 = vcmp.eq.f32.partialorder %v5532_v49, %v3637_v41  ;;  %vm8353_vm12 = vmmov 1   ;;  %vm8362_vm10 = vnez %v8273_v30 }
 0x338   : > { %vm2314_vm2 = vmor %vm2218_vm7, %vm2298_vm14  ;;  %v8365_v49 = vmov 0  ;;  %vm8369_vm14 = vcmp.lt.s32.totalorder %v2440_v17, %v6038_v10  ;;  %v8375_v30 = vmov 0  ;;  %v8377_v17 = vld [vmem:[#allocation4_spill] sm:$0xff] }
 0x339   : > { %vm6088_vm3 = vmand %vm346_vm13, %vm430_vm11  ;;  %vm726_vm13 = vcmp.le.f32.partialorder %v8356_v31, %v8251_v2  ;;  %vm8371_vm11 = vnez %v8289_v7  ;;  %vm343_vm0 = vcmp.le.f32.partialorder %v8377_v17, %v8232_v40  ;;  %v8380_v7 = vld [vmem:[#allocation58_spill] sm:$0xff]  ;;  %v8388_v31 = vmov 0 }
 0x33a   : > { %v8351_v28 = vsel %vm6088_vm3, 4294967295, %v8350_v28  ;;  %vm6099_vm8 = vmxor %vm2314_vm2, %vm8353_vm12  ;;  %vm527_vm3 = vcmp.le.f32.partialorder %v8360_v55, %v8241_v8  ;;  %vm8361_vm2 = vnez %v8304_v56  ;;  %v8385_v56 = vmov 0 }
 0x33b   : > { %v8355_v57 = vsel %vm6099_vm8, 4294967295, %v8354_v57  ;;  %vm8364_vm15 = vmand %vm8362_vm10, %vm8363_vm4  ;;  %vm8370_vm8 = vnez %v8297_v58  ;;  %v8381_v58 = vld [vmem:[#allocation78_spill] sm:$0xff]  ;;  %v8399_v55 = vmov 0  ;;  %v8425_v17 = vmov 0 }
 0x33c   : > { %vm6121_vm12 = vmand %vm8364_vm15, %vm8361_vm2 }
 0x33d   : > { %v8366_v49 = vsel %vm6121_vm12, 4294967295, %v8365_v49  ;;  %vm6125_vm7 = vmand %vm726_vm13, %vm810_vm6  ;;  %vm1982_vm6 = vcmp.eq.f32.partialorder %v5686_v38, %v3633_v13  ;;  %vm2172_vm13 = vcmp.eq.f32.partialorder %v2014_v20, %v3743_v14 }
 0x33e   : > { %v8368_v59 = vsel %vm6125_vm7, 4294967295, %v8367_v59  ;;  %vm8372_vm4 = vmand %vm8370_vm8, %vm8371_vm11  ;;  %vm8383_vm11 = vnez %v8329_v19  ;;  %vm2142_vm8 = vcmp.eq.f32.partialorder %v5686_v38, %v3630_v5  ;;  %v8392_v19 = vmov 0 }
 0x33f   : > { %vm2493_vm10 = vmand %vm8372_vm4, %vm8369_vm14  ;;  %vm8384_vm4 = vcmp.le.f32.partialorder %v8235_v16, %v8359_v1  ;;  %v8434_v1 = vld [vmem:[#allocation44_spill] sm:$0xff] }
 0x340   : > { %vm6137_vm2 = vmand %vm527_vm3, %vm611_vm9  ;;  %vm1902_vm3 = vcmp.eq.f32.partialorder %v5475_v61, %v3640_v43  ;;  %vm8387_vm9 = vcmp.lt.s32.totalorder %v6038_v10, 64 }
 0x341   : > { %v8374_v26 = vsel %vm6137_vm2, 4294967295, %v8373_v26  ;;  %vm6141_vm15 = vmand %vm2220_vm1, %vm2236_vm5  ;;  %vm814_vm1 = vcmp.le.f32.partialorder %v8254_v24, %v8381_v58  ;;  %vm8382_vm5 = vcmp.eq.f32.partialorder %v2014_v20, %v3747_v22  ;;  %v8432_v58 = vmov 0 }
 0x342   : > { %v8376_v30 = vsel %vm6141_vm15, 4294967295, %v8375_v30  ;;  %vm2092_vm14 = vmand %vm8383_vm11, %vm8382_vm5  ;;  %vm8390_vm5 = vmmov 1   ;;  %vm8391_vm11 = vnez %v8208_v50  ;;  %v8435_v50 = vmov 0 }
 0x343   : > { %vm6165_vm2 = vmand %vm343_vm0, %vm8384_vm4  ;;  %vm8394_vm0 = vnez %v7669_v9  ;;  %vm8395_vm4 = vnez %v7673_v62  ;;  %v8404_v9 = vld [vmem:[#allocation36_spill] sm:$0xff] }
 0x344   : > { %v8386_v56 = vsel %vm6165_vm2, 4294967295, %v8385_v56  ;;  %vm6173_vm7 = vmand %vm2493_vm10, %vm8387_vm9  ;;  %vm2268_vm10 = vcmp.eq.f32.partialorder %v2014_v20, %v3760_v18  ;;  %v8405_v62 = vld [vmem:[#allocation52_spill] sm:$0xff]  ;;  %v8410_v20 = vmov 0 }
 0x345   : > { %v8389_v31 = vsel %vm6173_vm7, 4294967295, %v8388_v31  ;;  %vm6182_vm12 = vmxor %vm8391_vm11, %vm8390_vm5  ;;  %vm8401_vm11 = vnez %v8342_v53  ;;  %v8413_v53 = vmov 0 }
 0x346   : > { %v8393_v19 = vsel %vm6182_vm12, 4294967295, %v8392_v19  ;;  %vm8396_vm2 = vmor %vm8394_vm0, %vm8395_vm4  ;;  %vm8407_vm0 = vnez %v8291_v3  ;;  %vm2126_vm12 = vcmp.eq.f32.partialorder %v5475_v61, %v3644_v0  ;;  %v8415_v3 = vld [vmem:[#allocation11_spill] sm:$0xff] }
 0x347   : > { %vm6191_vm15 = vmor %vm8396_vm2, %vm2092_vm14  ;;  %vm8406_vm14 = vnez %v8338_v4  ;;  %vm2238_vm2 = vcmp.eq.f32.partialorder %v5686_v38, %v3637_v41  ;;  %v8419_v4 = vld [vmem:[#allocation23_spill] sm:$0xff]  ;;  %v8422_v38 = vld [vmem:[#allocation68_spill] sm:$0xff] }
 0x348   : > { %vm6196_vm9 = vmand %vm1902_vm3, %vm1982_vm6  ;;  %vm8408_vm6 = vnez %v8283_v35  ;;  %v8416_v35 = vmov 0 }
 0x349   : > { %v8400_v55 = vsel %vm6196_vm9, 4294967295, %v8399_v55  ;;  %vm6202_vm7 = vmand %vm8401_vm11, %vm2172_vm13  ;;  %vm8412_vm13 = vcmp.le.f32.partialorder %v8380_v7, %v8251_v2  ;;  %v8427_v7 = vmov 0 }
 0x34a   : > { %vm8409_vm3 = vmand %vm8407_vm0, %vm8408_vm6 }
 0x34b   : > { %vm6217_vm4 = vmand %vm8409_vm3, %vm8406_vm14 }
 0x34c   : > { %v8411_v20 = vsel %vm6217_vm4, 4294967295, %v8410_v20  ;;  %vm6224_vm11 = vmand %vm8412_vm13, %vm814_vm1  ;;  %vm8418_vm1 = vnez %v8376_v30  ;;  %vm432_vm13 = vcmp.le.f32.partialorder %v8235_v16, %v8419_v4  ;;  %v2022_v30 = vpop.permute.xlu1 %2021  ;;  %v8456_v4 = vmov 0 }
 0x34d   : > { %v8414_v53 = vsel %vm6224_vm11, 4294967295, %v8413_v53  ;;  %vm2204_vm14 = vmor %vm6191_vm15, %vm6202_vm7  ;;  %vm811_vm7 = vcmp.le.f32.partialorder %v8254_v24, %v8422_v38  ;;  %vm2476_vm15 = vcmp.lt.s32.totalorder %v8330_v51, %v6038_v10  ;;  %v2441_v38 = vadd.s32 16, %v8330_v51 }
 0x34e   : > { %vm6238_vm6 = vmand %vm2126_vm12, %vm2142_vm8  ;;  %vm2222_vm12 = vcmp.eq.f32.partialorder %v5475_v61, %v3649_v6  ;;  %v8429_v61 = vld [vmem:[#allocation61_spill] sm:$0xff] }
 0x34f   : > { %v8417_v35 = vsel %vm6238_vm6, 4294967295, %v8416_v35  ;;  %vm2284_vm3 = vmand %vm8418_vm1, %vm2268_vm10  ;;  %vm8423_vm10 = vcmp.le.f32.partialorder %v8244_v15, %v8405_v62  ;;  %vm8424_vm1 = vcmp.le.f32.partialorder %v8404_v9, %v8241_v8  ;;  %vm8431_vm6 = vcmp.le.f32.partialorder %v8415_v3, %v8232_v40  ;;  %v8454_v62 = vld [vmem:[#allocation6_spill] sm:$0xff]  ;;  %v8455_v3 = vld [vmem:[#allocation80_spill] sm:$0xff] }
 0x350   : > { %vm2300_vm8 = vmor %vm2204_vm14, %vm2284_vm3  ;;  %vm727_vm14 = vcmp.le.f32.partialorder %v8429_v61, %v8251_v2  ;;  %vm8430_vm3 = vnez %v8366_v49  ;;  %v8441_v49 = vmov 0  ;;  %v8444_v9 = vmov 0 }
 0x351   : > { %vm6262_vm0 = vmand %vm8424_vm1, %vm8423_vm10  ;;  %vm2078_vm10 = vcmp.eq.f32.partialorder %v2022_v30, %v3747_v22  ;;  %v8466_v61 = vmov 0 }
 0x352   : > { %v8426_v17 = vsel %vm6262_vm0, 4294967295, %v8425_v17  ;;  %vm6266_vm9 = vmand %vm2222_vm12, %vm2238_vm2  ;;  %vm613_vm2 = vcmp.le.f32.partialorder %v8244_v15, %v8434_v1  ;;  %vm8460_vm0 = vnez %v8070_v36  ;;  %v8473_v1 = vld [vmem:[#allocation54_spill] sm:$0xff]  ;;  %v8511_v36 = vmov 0 }
 0x353   : > { %v8428_v7 = vsel %vm6266_vm9, 4294967295, %v8427_v7  ;;  %vm2316_vm11 = vmxor %vm2300_vm8, %vm8390_vm5  ;;  %vm8437_vm5 = vnez %v8368_v59  ;;  %v8451_v59 = vmov 0  ;;  %vm8453_vm9 = vnez %v8400_v55  ;;  %v8505_v55 = vld [vmem:[#allocation63_spill] sm:$0xff] }
 0x354   : > { %vm2332_vm4 = vmand %vm8430_vm3, %vm2316_vm11  ;;  %vm8438_vm11 = vnez %v8324_v39  ;;  %vm8439_vm3 = vnez %v8313_v27  ;;  %v8446_v39 = vld [vmem:[#allocation19_spill] sm:$0xff] }
 0x355   : > { %vm6278_vm1 = vmand %vm8431_vm6, %vm432_vm13  ;;  %v8447_v27 = vld [vmem:[#allocation35_spill] sm:$0xff] }
 0x356   : > { %v8433_v58 = vsel %vm6278_vm1, 4294967295, %v8432_v58  ;;  %vm6284_vm12 = vmand %vm727_vm14, %vm811_vm7  ;;  %vm1903_vm7 = vcmp.eq.f32.partialorder %v5526_v12, %v3640_v43  ;;  %vm1983_vm14 = vcmp.eq.f32.partialorder %v5565_v42, %v3633_v13 }
 0x357   : > { %v8436_v50 = vsel %vm6284_vm12, 4294967295, %v8435_v50  ;;  %vm2492_vm8 = vmand %vm2332_vm4, %vm2476_vm15  ;;  %vm8443_vm4 = vcmp.lt.s32.totalorder %v6038_v10, 64  ;;  %vm2223_vm12 = vcmp.eq.f32.partialorder %v5526_v12, %v3649_v6 }
 0x358   : > { %vm8440_vm6 = vmand %vm8438_vm11, %vm8439_vm3  ;;  %vm8449_vm3 = vnez %v8386_v56  ;;  %vm345_vm11 = vcmp.le.f32.partialorder %v8454_v62, %v8232_v40  ;;  %v8499_v62 = vld [vmem:[#allocation69_spill] sm:$0xff] }
 0x359   : > { %vm6296_vm13 = vmand %vm8440_vm6, %vm8437_vm5  ;;  %vm529_vm5 = vcmp.le.f32.partialorder %v8447_v27, %v8241_v8  ;;  %v2443_v27 = vadd.s32 32, %v8330_v51  ;;  %v8517_v56 = vld [vmem:[#allocation37_spill] sm:$0xff] }
 0x35a   : > { %v8442_v49 = vsel %vm6296_vm13, 4294967295, %v8441_v49  ;;  %vm6306_vm15 = vmand %vm2492_vm8, %vm8443_vm4  ;;  %vm2239_vm13 = vcmp.eq.f32.partialorder %v5565_v42, %v3637_v41 }
 0x35b   : > { %v8445_v9 = vsel %vm6306_vm15, 4294967295, %v8444_v9  ;;  %vm6323_vm4 = vmand %vm529_vm5, %vm613_vm2  ;;  %vm8475_vm2 = vnez %v8414_v53  ;;  %vm8476_vm5 = vnez %v8351_v28  ;;  %v8490_v28 = vld [vmem:[#allocation25_spill] sm:$0xff]  ;;  %v8491_v53 = vmov 0 }
 0x35c   : > { %v8452_v59 = vsel %vm6323_vm4, 4294967295, %v8451_v59  ;;  %vm2094_vm6 = vmand %vm8453_vm9, %vm2078_vm10  ;;  %vm8461_vm9 = vnez %v8082_v46  ;;  %v8472_v46 = vld [vmem:[#allocation38_spill] sm:$0xff] }
 0x35d   : > { %vm6337_vm8 = vmand %vm1903_vm7, %vm1983_vm14  ;;  %vm2270_vm7 = vcmp.eq.f32.partialorder %v2022_v30, %v3760_v18  ;;  %vm8465_vm14 = vcmp.le.f32.partialorder %v8235_v16, %v8446_v39  ;;  %v8474_v39 = vld [vmem:[#allocation60_spill] sm:$0xff] }
 0x35e   : > { %v8457_v4 = vsel %vm6337_vm8, 4294967295, %v8456_v4  ;;  %vm8462_vm10 = vmor %vm8460_vm0, %vm8461_vm9  ;;  %vm8468_vm0 = vcmp.eq.f32.partialorder %v2022_v30, %v3743_v14  ;;  %v8483_v30 = vmov 0 }
 0x35f   : > { %vm6351_vm15 = vmor %vm8462_vm10, %vm2094_vm6  ;;  %vm8469_vm6 = vnez %v8417_v35  ;;  %v8479_v35 = vmov 0 }
 0x360   : > { %vm6359_vm1 = vmand %vm345_vm11, %vm8465_vm14  ;;  %vm732_vm14 = vcmp.le.f32.partialorder %v8474_v39, %v8251_v2  ;;  %vm8482_vm11 = vcmp.eq.f32.partialorder %v5526_v12, %v3644_v0  ;;  %v2026_v12 = vpop.permute.xlu1 %2025  ;;  %v8531_v39 = vld [vmem:[#allocation8_spill] sm:$0xff] }
 0x361   : > { %v8467_v61 = vsel %vm6359_vm1, 4294967295, %v8466_v61  ;;  %vm6371_vm9 = vmand %vm8469_vm6, %vm8468_vm0  ;;  %vm8477_vm1 = vnez %v8347_v21  ;;  %vm8481_vm6 = vcmp.eq.f32.partialorder %v5565_v42, %v3630_v5  ;;  %v8486_v21 = vmov 0  ;;  %v8489_v42 = vld [vmem:[#allocation13_spill] sm:$0xff] }
 0x362   : > { %vm8478_vm4 = vmand %vm8476_vm5, %vm8477_vm1  ;;  %vm8485_vm1 = vcmp.le.f32.partialorder %v8254_v24, %v8455_v3  ;;  %v8502_v3 = vmov 0 }
 0x363   : > { %vm6388_vm0 = vmand %vm8478_vm4, %vm8475_vm2  ;;  %vm8488_vm2 = vnez %v8428_v7  ;;  %v8497_v7 = vmov 0 }
 0x364   : > { %v8480_v35 = vsel %vm6388_vm0, 4294967295, %v8479_v35  ;;  %vm6398_vm10 = vmand %vm8482_vm11, %vm8481_vm6  ;;  %vm350_vm11 = vcmp.le.f32.partialorder %v8489_v42, %v8232_v40  ;;  %vm434_vm6 = vcmp.le.f32.partialorder %v8235_v16, %v8490_v28  ;;  %v8532_v42 = vld [vmem:[#allocation82_spill] sm:$0xff]  ;;  %v8574_v28 = vld [vmem:[#allocation64_spill] sm:$0xff] }
 0x365   : > { %v8484_v30 = vsel %vm6398_vm10, 4294967295, %v8483_v30  ;;  %vm2206_vm8 = vmor %vm6351_vm15, %vm6371_vm9  ;;  %vm2478_vm15 = vcmp.lt.s32.totalorder %v2441_v38, %v6038_v10  ;;  %v8504_v38 = vld [vmem:[#allocation46_spill] sm:$0xff] }
 0x366   : > { %vm6409_vm4 = vmand %vm732_vm14, %vm8485_vm1  ;;  %vm2079_vm1 = vcmp.eq.f32.partialorder %v2026_v12, %v3747_v22 }
 0x367   : > { %v8487_v21 = vsel %vm6409_vm4, 4294967295, %v8486_v21  ;;  %vm2286_vm5 = vmand %vm8488_vm2, %vm2270_vm7  ;;  %vm8495_vm2 = vcmp.le.f32.partialorder %v8244_v15, %v8473_v1  ;;  %vm8496_vm4 = vcmp.le.f32.partialorder %v8472_v46, %v8241_v8  ;;  %v8524_v46 = vmov 0 }
 0x368   : > { %vm6419_vm10 = vmand %vm2223_vm12, %vm2239_vm13  ;;  %vm813_vm13 = vcmp.le.f32.partialorder %v8254_v24, %v8499_v62  ;;  %v2442_v1 = vadd.s32 24, %v8330_v51  ;;  %v8578_v62 = vld [vmem:[#allocation48_spill] sm:$0xff] }
 0x369   : > { %v8492_v53 = vsel %vm6419_vm10, 4294967295, %v8491_v53  ;;  %vm2302_vm9 = vmor %vm2206_vm8, %vm2286_vm5  ;;  %vm8500_vm10 = vmmov 1   ;;  %vm8501_vm5 = vnez %v8442_v49  ;;  %v8509_v49 = vmov 0 }
 0x36a   : > { %vm6435_vm12 = vmand %vm8496_vm4, %vm8495_vm2  ;;  %vm615_vm4 = vcmp.le.f32.partialorder %v8244_v15, %v8504_v38  ;;  %vm729_vm2 = vcmp.le.f32.partialorder %v8505_v55, %v8251_v2  ;;  %v8585_v55 = vmov 0  ;;  %v2446_v38 = vadd.s32 56, %v8330_v51 }
 0x36b   : > { %v8498_v7 = vsel %vm6435_vm12, 4294967295, %v8497_v7  ;;  %vm2318_vm8 = vmxor %vm2302_vm9, %vm8500_vm10  ;;  %vm8506_vm12 = vnez %v8436_v50  ;;  %vm8507_vm9 = vnez %v8374_v26  ;;  %v8514_v50 = vmov 0  ;;  %v8516_v26 = vld [vmem:[#allocation21_spill] sm:$0xff] }
 0x36c   : > { %vm2334_vm0 = vmand %vm8501_vm5, %vm2318_vm8  ;;  %vm8542_vm5 = vcmp.le.f32.partialorder %v8235_v16, %v8516_v26 }
 0x36d   : > { %vm6445_vm14 = vmand %vm350_vm11, %vm434_vm6 }
 0x36e   : > { %v8503_v3 = vsel %vm6445_vm14, 4294967295, %v8502_v3  ;;  %vm8508_vm7 = vmand %vm8449_vm3, %vm8507_vm9  ;;  %vm8513_vm14 = vnez %v8213_v63  ;;  %v8521_v63 = vmov 0  ;;  %vm2145_vm9 = vcmp.eq.f32.partialorder %v5606_v54, %v3630_v5 }
 0x36f   : > { %vm6460_vm8 = vmand %vm8508_vm7, %vm8506_vm12  ;;  %vm8523_vm7 = vcmp.lt.s32.totalorder %v6038_v10, 64 }
 0x370   : > { %v8510_v49 = vsel %vm6460_vm8, 4294967295, %v8509_v49  ;;  %vm2494_vm11 = vmand %vm2334_vm0, %vm2478_vm15  ;;  %vm531_vm0 = vcmp.le.f32.partialorder %v8517_v56, %v8241_v8  ;;  %vm8526_vm15 = vnez %v7708_v29  ;;  %v8537_v29 = vmov 0 }
 0x371   : > { %vm6464_vm6 = vmand %vm729_vm2, %vm813_vm13  ;;  %vm8518_vm13 = vnez %v8457_v4  ;;  %v8529_v4 = vmov 0 }
 0x372   : > { %v8512_v36 = vsel %vm6464_vm6, 4294967295, %v8511_v36  ;;  %vm6472_vm3 = vmxor %vm8513_vm14, %vm8500_vm10 }
 0x373   : > { %v8515_v50 = vsel %vm6472_vm3, 4294967295, %v8514_v50  ;;  %vm2095_vm14 = vmand %vm8518_vm13, %vm2079_vm1  ;;  %vm8527_vm1 = vnez %v7710_v45  ;;  %v8543_v45 = vmov 0  ;;  %vm8555_vm3 = vnez %v8492_v53  ;;  %v8576_v53 = vld [vmem:[#allocation24_spill] sm:$0xff] }
 0x374   : > { %vm6491_vm6 = vmand %vm531_vm0, %vm615_vm4  ;;  %vm347_vm0 = vcmp.le.f32.partialorder %v8531_v39, %v8232_v40  ;;  %v8631_v39 = vmov 0 }
 0x375   : > { %v8522_v63 = vsel %vm6491_vm6, 4294967295, %v8521_v63  ;;  %vm6497_vm8 = vmand %vm2494_vm11, %vm8523_vm7  ;;  %vm8540_vm7 = vcmp.eq.f32.partialorder %v2026_v12, %v3743_v14  ;;  %vm2225_vm6 = vcmp.eq.f32.partialorder %v5569_v34, %v3649_v6  ;;  %vm8556_vm11 = vnez %v8487_v21 }
 0x376   : > { %v8525_v46 = vsel %vm6497_vm8, 4294967295, %v8524_v46  ;;  %vm8528_vm13 = vmor %vm8526_vm15, %vm8527_vm1  ;;  %vm8533_vm15 = vcmp.lt.s32.totalorder %v2443_v27, %v6038_v10  ;;  %vm8535_vm1 = vnez %v8393_v19  ;;  %vm8541_vm8 = vnez %v8484_v30  ;;  %v8553_v30 = vld [vmem:[#allocation62_spill] sm:$0xff]  ;;  %v8577_v27 = vld [vmem:[#allocation39_spill] sm:$0xff] }
 0x377   : > { %vm6507_vm12 = vmor %vm8528_vm13, %vm2095_vm14  ;;  %vm8534_vm14 = vnez %v8411_v20  ;;  %v8547_v19 = vmov 0  ;;  %v8550_v20 = vmov 0  ;;  %v8566_v21 = vmov 0 }
 0x378   : > { %v8530_v4 = vsel %vm6507_vm12, 4294967295, %v8529_v4  ;;  %vm8536_vm13 = vmand %vm8534_vm14, %vm8535_vm1  ;;  %vm8546_vm14 = vcmp.eq.f32.partialorder %v5569_v34, %v3640_v43 }
 0x379   : > { %vm6527_vm4 = vmand %vm8536_vm13, %vm8533_vm15  ;;  %vm8545_vm15 = vcmp.eq.f32.partialorder %v5606_v54, %v3633_v13  ;;  %vm734_vm13 = vcmp.le.f32.partialorder %v8553_v30, %v8251_v2  ;;  %v8635_v30 = vmov 0 }
 0x37a   : > { %v8538_v29 = vsel %vm6527_vm4, 4294967295, %v8537_v29  ;;  %vm2191_vm2 = vmand %vm8541_vm8, %vm8540_vm7  ;;  %vm8549_vm8 = vnez %v8222_v47  ;;  %v8560_v47 = vmov 0 }
 0x37b   : > { %vm6542_vm12 = vmand %vm347_vm0, %vm8542_vm5  ;;  %vm8552_vm5 = vnez %v8530_v4 }
 0x37c   : > { %v8544_v45 = vsel %vm6542_vm12, 4294967295, %v8543_v45  ;;  %vm6552_vm1 = vmand %vm8546_vm14, %vm8545_vm15  ;;  %vm2241_vm15 = vcmp.eq.f32.partialorder %v5606_v54, %v3637_v41  ;;  %vm8554_vm14 = vcmp.eq.f32.partialorder %v2026_v12, %v3760_v18  ;;  %v8563_v54 = vmov 0  ;;  %v8570_v12 = vld [vmem:[#allocation70_spill] sm:$0xff] }
 0x37d   : > { %v8548_v19 = vsel %vm6552_vm1, 4294967295, %v8547_v19  ;;  %vm6559_vm7 = vmxor %vm8549_vm8, %vm8500_vm10  ;;  %vm8562_vm1 = vcmp.le.f32.partialorder %v8254_v24, %v8532_v42 }
 0x37e   : > { %v8551_v20 = vsel %vm6559_vm7, 4294967295, %v8550_v20  ;;  %vm2207_vm0 = vmor %vm8552_vm5, %vm2191_vm2  ;;  %vm8557_vm7 = vnez %v8433_v58  ;;  %vm8558_vm2 = vnez %v8426_v17  ;;  %v2445_v17 = vadd.s32 48, %v8330_v51  ;;  %v2034_v58 = vpop.permute.xlu1 %2033 }
 0x37f   : > { %vm2287_vm8 = vmand %vm8555_vm3, %vm8554_vm14  ;;  %vm8565_vm3 = vcmp.eq.f32.partialorder %v5569_v34, %v3644_v0  ;;  %v8571_v34 = vmov 0 }
 0x380   : > { %vm8559_vm5 = vmand %vm8557_vm7, %vm8558_vm2  ;;  %vm2479_vm7 = vcmp.lt.s32.totalorder %v2442_v1, %v6038_v10 }
 0x381   : > { %vm6582_vm4 = vmand %vm8559_vm5, %vm8556_vm11  ;;  %vm8587_vm5 = vnez %v8525_v46 }
 0x382   : > { %v8561_v47 = vsel %vm6582_vm4, 4294967295, %v8560_v47  ;;  %vm6589_vm12 = vmand %vm734_vm13, %vm8562_vm1  ;;  %vm8568_vm1 = vnez %v8498_v7  ;;  %vm8569_vm13 = vnez %v8503_v3 }
 0x383   : > { %v8564_v54 = vsel %vm6589_vm12, 4294967295, %v8563_v54  ;;  %vm6596_vm14 = vmand %vm8565_vm3, %vm2145_vm9  ;;  %vm815_vm12 = vcmp.le.f32.partialorder %v8254_v24, %v8570_v12  ;;  %vm8573_vm3 = vnez %v8510_v49  ;;  %v2444_v49 = vadd.s32 40, %v8330_v51  ;;  %v2042_v12 = vpop.permute.xlu1 %2041 }
 0x384   : > { %v8567_v21 = vsel %vm6596_vm14, 4294967295, %v8566_v21  ;;  %vm2303_vm11 = vmor %vm2207_vm0, %vm2287_vm8  ;;  %vm8575_vm14 = vcmp.lt.s32.totalorder %v6038_v10, 64 }
 0x385   : > { %vm2319_vm2 = vmxor %vm2303_vm11, %vm8500_vm10  ;;  %vm731_vm11 = vcmp.le.f32.partialorder %v8574_v28, %v8251_v2  ;;  %v8645_v28 = vmov 0 }
 0x386   : > { %vm6609_vm9 = vmand %vm2225_vm6, %vm2241_vm15  ;;  %vm8601_vm15 = vnez %v8538_v29 }
 0x387   : > { %v8572_v34 = vsel %vm6609_vm9, 4294967295, %v8571_v34  ;;  %vm2335_vm0 = vmand %vm8573_vm3, %vm2319_vm2  ;;  %vm8579_vm2 = vnez %v8512_v36  ;;  %vm8581_vm3 = vnez %v8452_v59  ;;  %v8593_v59 = vmov 0  }
 0x388   : > { %vm2495_vm8 = vmand %vm2335_vm0, %vm2479_vm7  ;;  %vm8580_vm7 = vnez %v8467_v61  ;;  %v8608_v36 = vmov 0 }
 0x389   : > { %vm2512_vm10 = vmand %vm2495_vm8, %vm8575_vm14 }
 0x38a   : > { %vm8582_vm0 = vmand %vm8580_vm7, %vm8581_vm3  ;;  %vm8595_vm7 = vnez %v8548_v19 }
 0x38b   : > { %vm6633_vm9 = vmand %vm8582_vm0, %vm8579_vm2  ;;  %vm8594_vm2 = vcmp.eq.f32.partialorder %v2034_v58, %v3747_v22 }
 0x38c   : > { %vm6637_vm14 = vmand %vm731_vm11, %vm815_vm12  ;;  %vm8588_vm12 = vnez %v8389_v31  ;;  %vm8589_vm11 = vnez %v8445_v9  ;;  %v8598_v31 = vmov 0  ;;  %v8602_v9 = vmov 0 }
 0x38d   : > { %v8586_v55 = vsel %vm6637_vm14, 4294967295, %v8585_v55  ;;  %vm2526_vm6 = vmpackc.low %vm2512_vm10, %vm8587_vm5 }
 0x38e   : > { %vm8590_vm3 = vmpackc.low %vm8588_vm12, %vm8589_vm11  ;;  %vm8596_vm11 = vcmp.le.f32.partialorder %v8244_v15, %v8578_v62  ;;  %v8666_v62 = vmov 0 }
 0x38f   : > { %vm2527_vm0 = vmpackc.even %vm2526_vm6, %vm8590_vm3  ;;  %vm8597_vm3 = vcmp.le.f32.partialorder %v8577_v27, %v8241_v8  ;;  %vm8606_vm6 = vnez %v8515_v50  ;;  %v8657_v27 = vmov 0  ;;  %v8731_v50 = vld [vmem:[#allocation117_spill] sm:$0xff] }
 0x390   : > { %v2537_v61 = vsel %vm2527_vm0, 16843009, %v8593_v59  ;;  %vm2097_vm12 = vmand %vm8595_vm7, %vm8594_vm2  ;;  %vm8600_vm0 = vcmp.lt.s32.totalorder %v6038_v10, 64  ;;  %vm8604_vm7 = vcmp.lt.s32.totalorder %v2445_v17, %v6038_v10  ;;  %vm8605_vm2 = vnez %v8480_v35  ;;  %v8615_v35 = vld [vmem:[#allocation10_spill] sm:$0xff] }
 0x391   : > { %vm6675_vm5 = vmand %vm8597_vm3, %vm8596_vm11  ;;  %v2541_v26 = vunpack.c.0.s8 %v2537_v61  ;;  %v2542_v56 = vunpack.c.1.s8 %v2537_v61  ;;  %v2543_v46 = vunpack.c.2.s8 %v2537_v61  ;;  %v2544_v1 = vunpack.c.3.s8 %v2537_v61  ;;  %v8677_v61 = vld [vmem:[#allocation12_spill] sm:$0xff] }
 0x392   : > { %v8599_v31 = vsel %vm6675_vm5, 4294967295, %v8598_v31  ;;  %vm6683_vm8 = vmand %vm8601_vm15, %vm8600_vm0  ;;  %vm8610_vm15 = vnez %v7736_v33  ;;  %vm8611_vm11 = vnez %v7738_v23  ;;  %v8618_v33 = vmov 0 }
 0x393   : > { %v8603_v9 = vsel %vm6683_vm8, 4294967295, %v8602_v9  ;;  %vm8607_vm4 = vmand %vm8605_vm2, %vm8606_vm6  ;;  %vm8617_vm2 = vcmp.eq.f32.partialorder %v5610_v11, %v3640_v43  ;;  %vm8622_vm5 = vmmov 1   ;;  %vm8623_vm6 = vnez %v8246_v32 }
 0x394   : > { %vm6694_vm10 = vmand %vm8607_vm4, %vm8604_vm7  ;;  %vm349_vm4 = vcmp.le.f32.partialorder %v8615_v35, %v8232_v40  ;;  %vm8616_vm7 = vcmp.eq.f32.partialorder %v5636_v48, %v3633_v13  ;;  %v8624_v23 = vmov 0  ;;  %v2557_v32 = vpack.c.b16 %v2541_v26, %v2541_v26  ;;  %v8716_v26 = vld [vmem:[#allocation83_spill] sm:$0xff] }
 0x395   : > { %v8609_v36 = vsel %vm6694_vm10, 4294967295, %v8608_v36  ;;  %vm8612_vm3 = vmor %vm8610_vm15, %vm8611_vm11  ;;  %v2559_v42 = vpack.c.b16 %v2542_v56, %v2542_v56  ;;  %v2561_v29 = vpack.c.b16 %v2543_v46, %v2543_v46  ;;  %v2563_v19 = vpack.c.b16 %v2544_v1, %v2544_v1 }
 0x396   : > { %vm6704_vm0 = vmor %vm8612_vm3, %vm2097_vm12  ;;  %vm8630_vm12 = vcmp.le.f32.partialorder %v8235_v16, %v8576_v53  ;;  %vm8638_vm3 = vcmp.eq.f32.partialorder %v5610_v11, %v3644_v0  ;;  %v2558_v7 = vpack.c.b8 %v2557_v32, %v2557_v32  ;;  %v8654_v53 = vmov 0  ;;  %v8814_v32 = vld [vmem:[#allocation91_spill] sm:$0xff] }
 0x397   : > { %vm6718_vm10 = vmand %vm8617_vm2, %vm8616_vm7  ;;  %vm8626_vm7 = vcmp.eq.f32.partialorder %v2034_v58, %v3743_v14  ;;  %vm8627_vm2 = vnez %v8567_v21  ;;  %v8639_v21 = vmov 0  ;;  %v2560_v3 = vpack.c.b8 %v2559_v42, %v2559_v42 }
 0x398   : > { %v8619_v33 = vsel %vm6718_vm10, 4294967295, %v8618_v33  ;;  %vm6731_vm8 = vmxor %vm8623_vm6, %vm8622_vm5  ;;  %v2564_v17 = vpack.c.b8 %v2563_v19, %v2563_v19  ;;  %2589 = vst [vmem:[%s6778_s24] sm:$0x3] %v2558_v7  ;;  %vm8669_vm11 = vnez %v8609_v36  ;;  %v8712_v36 = vmov 0 }
 0x399   : > { %v8625_v23 = vsel %vm6731_vm8, 4294967295, %v8624_v23  ;;  %vm6739_vm10 = vmand %vm8627_vm2, %vm8626_vm7  ;;  %vm8633_vm7 = vnez %v8564_v54  ;;  %v2562_v54 = vpack.c.b8 %v2561_v29, %v2561_v29  ;;  %2590 = vst [vmem:[%s6778_s24 + $0x2] sm:$0x3] %v2560_v3  ;;  %v2448_v56 = vadd.s32 72, %v8330_v51 }
 0x39a   : > { %vm6746_vm14 = vmand %vm349_vm4, %vm8630_vm12  ;;  %vm8637_vm12 = vcmp.eq.f32.partialorder %v5636_v48, %v3630_v5  ;;  %2592 = vst [vmem:[%s6778_s24 + $0x6] sm:$0x3] %v2564_v17 }
 0x39b   : > { %v8632_v39 = vsel %vm6746_vm14, 4294967295, %v8631_v39  ;;  %vm2209_vm6 = vmor %vm6704_vm0, %vm6739_vm10  ;;  %vm8642_vm10 = vnez %v8572_v34  ;;  %v8647_v34 = vld [vmem:[#allocation72_spill] sm:$0xff]  ;;  %2591 = vst [vmem:[%s6778_s24 + $0x4] sm:$0x3] %v2562_v54  ;;  %vm8686_vm14 = vcmp.eq.f32.partialorder %v2042_v12, %v3743_v14 }
 0x39c   : > { %vm8634_vm2 = vmand %vm8569_vm13, %vm8568_vm1  ;;  %vm2481_vm1 = vcmp.lt.s32.totalorder %v2444_v49, %v6038_v10  ;;  %vm8641_vm13 = vcmp.eq.f32.partialorder %v2034_v58, %v3760_v18  ;;  %v2447_v58 = vadd.s32 64, %v8330_v51  ;;  %v8700_v49 = vld [vmem:[#allocation74_spill] sm:$0xff] }
 0x39d   : > { %vm6761_vm4 = vmand %vm8634_vm2, %vm8633_vm7  ;;  %vm8643_vm7 = vcmp.eq.f32.partialorder %v5636_v48, %v3637_v41  ;;  %vm8644_vm2 = vcmp.eq.f32.partialorder %v5610_v11, %v3649_v6  ;;  %v8648_v11 = vld [vmem:[#allocation50_spill] sm:$0xff]  ;;  %v8649_v48 = vld [vmem:[#allocation65_spill] sm:$0xff] }
 0x39e   : > { %v8636_v30 = vsel %vm6761_vm4, 4294967295, %v8635_v30  ;;  %vm6771_vm8 = vmand %vm8638_vm3, %vm8637_vm12 }
 0x39f   : > { %v8640_v21 = vsel %vm6771_vm8, 4294967295, %v8639_v21  ;;  %vm2289_vm0 = vmand %vm8642_vm10, %vm8641_vm13  ;;  %vm817_vm10 = vcmp.le.f32.partialorder %v8254_v24, %v8647_v34  ;;  %vm8652_vm8 = vnez %v8522_v63  ;;  %v8662_v63 = vld [vmem:[#allocation26_spill] sm:$0xff]  ;;  %v8756_v34 = vmov 0 }
 0x3a0   : > { %vm2305_vm3 = vmor %vm2209_vm6, %vm2289_vm0 }
 0x3a1   : > { %vm6791_vm12 = vmand %vm8644_vm2, %vm8643_vm7  ;;  %vm2083_vm7 = vcmp.eq.f32.partialorder %v2042_v12, %v3747_v22  ;;  %vm619_vm2 = vcmp.le.f32.partialorder %v8244_v15, %v8648_v11  ;;  %v8659_v15 = vmov 0  ;;  %v8759_v11 = vmov 0 }
 0x3a2   : > { %v8646_v28 = vsel %vm6791_vm12, 4294967295, %v8645_v28  ;;  %vm2321_vm13 = vmxor %vm2305_vm3, %vm8622_vm5  ;;  %vm733_vm3 = vcmp.le.f32.partialorder %v8649_v48, %v8251_v2  ;;  %vm8650_vm5 = vnez %v8586_v55  ;;  %vm8651_vm12 = vnez %v8544_v45  ;;  %v8663_v45 = vld [vmem:[#allocation40_spill] sm:$0xff] }
 0x3a3   : > { %vm2337_vm6 = vmand %vm6633_vm9, %vm2321_vm13  ;;  %vm8656_vm9 = vcmp.lt.s32.totalorder %v6038_v10, 64  ;;  %v8675_v55 = vmov 0  ;;  %v8762_v48 = vmov 0 }
 0x3a4   : > { %vm2497_vm0 = vmand %vm2337_vm6, %vm2481_vm1 }
 0x3a5   : > { %vm8653_vm4 = vmand %vm8651_vm12, %vm8652_vm8  ;;  %vm535_vm12 = vcmp.le.f32.partialorder %v8663_v45, %v8241_v8  ;;  %v8670_v8 = vmov 0  ;;  %v8771_v45 = vld [vmem:[#allocation103_spill] sm:$0xff] }
 0x3a6   : > { %vm6819_vm15 = vmand %vm8653_vm4, %vm8650_vm5  ;;  %vm8668_vm4 = vcmp.lt.s32.totalorder %v6038_v10, 64 }
 0x3a7   : > { %v8655_v53 = vsel %vm6819_vm15, 4294967295, %v8654_v53  ;;  %vm6825_vm1 = vmand %vm2497_vm0, %vm8656_vm9 }
 0x3a8   : > { %v8658_v27 = vsel %vm6825_vm1, 4294967295, %v8657_v27  ;;  %vm6829_vm13 = vmand %vm733_vm3, %vm817_vm10  ;;  %vm8664_vm3 = vnez %v8619_v33  ;;  %vm8679_vm1 = vnez %v8561_v47  ;;  %v2050_v47 = vpop.permute.xlu1 %2049 }
 0x3a9   : > { %v8660_v15 = vsel %vm6829_vm13, 4294967295, %v8659_v15  ;;  %vm2099_vm9 = vmand %vm8664_vm3, %vm2083_vm7  ;;  %vm8672_vm7 = vnez %v7765_v25  ;;  %vm8673_vm3 = vnez %v7767_v52  ;;  %v8682_v25 = vmov 0 }
 0x3aa   : > { %vm6853_vm5 = vmand %vm535_vm12, %vm619_vm2  ;;  %vm2275_vm2 = vcmp.eq.f32.partialorder %v2042_v12, %v3760_v18  ;;  %vm351_vm12 = vcmp.le.f32.partialorder %v8677_v61, %v8232_v40  ;;  %vm8687_vm13 = vnez %v8640_v21  ;;  %v8693_v40 = vmov 0 }
 0x3ab   : > { %v8667_v62 = vsel %vm6853_vm5, 4294967295, %v8666_v62  ;;  %vm6861_vm10 = vmand %vm8669_vm11, %vm8668_vm4  ;;  %vm2133_vm11 = vcmp.eq.f32.partialorder %v5640_v44, %v3644_v0  ;;  %vm2149_vm4 = vcmp.eq.f32.partialorder %v5658_v37, %v3630_v5  ;;  %vm8678_vm5 = vcmp.lt.s32.totalorder %v2447_v58, %v6038_v10 }
 0x3ac   : > { %v8671_v8 = vsel %vm6861_vm10, 4294967295, %v8670_v8  ;;  %vm8674_vm0 = vmor %vm8672_vm7, %vm8673_vm3  ;;  %v8745_v21 = vmov 0  ;;  %v2058_v12 = vpop.permute.xlu1 %2057  ;;  %v2451_v58 = vadd.s32 96, %v8330_v51  ;;  %v2452_v61 = vadd.s32 104, %v8330_v51 }
 0x3ad   : > { %vm6871_vm8 = vmor %vm8674_vm0, %vm2099_vm9  ;;  %vm8680_vm0 = vnez %v8551_v20  ;;  %v2449_v20 = vadd.s32 80, %v8330_v51  ;;  %v8789_v52 = vmov 0 }
 0x3ae   : > { %v8676_v55 = vsel %vm6871_vm8, 4294967295, %v8675_v55  ;;  %vm8681_vm9 = vmand %vm8679_vm1, %vm8680_vm0  ;;  %vm8688_vm8 = vcmp.le.f32.partialorder %v8235_v16, %v8662_v63  ;;  %vm8691_vm1 = vcmp.eq.f32.partialorder %v5658_v37, %v3633_v13  ;;  %v8697_v16 = vmov 0  ;;  %v8769_v63 = vld [vmem:[#allocation85_spill] sm:$0xff] }
 0x3af   : > { %vm6889_vm7 = vmand %vm8681_vm9, %vm8678_vm5  ;;  %vm8692_vm5 = vcmp.eq.f32.partialorder %v5640_v44, %v3640_v43  ;;  %vm8695_vm6 = vnez %v8676_v55 }
 0x3b0   : > { %v8683_v25 = vsel %vm6889_vm7, 4294967295, %v8682_v25  ;;  %vm2195_vm15 = vmand %vm8687_vm13, %vm8686_vm14  ;;  %vm2229_vm13 = vcmp.eq.f32.partialorder %v5640_v44, %v3649_v6  ;;  %vm8699_vm7 = vmmov 1   ;;  %v8701_v44 = vmov 0 }
 0x3b1   : > { %vm6904_vm0 = vmand %vm351_vm12, %vm8688_vm8  ;;  %vm2245_vm8 = vcmp.eq.f32.partialorder %v5658_v37, %v3637_v41  ;;  %vm8696_vm12 = vnez %v8646_v28  ;;  %v8704_v37 = vld [vmem:[#allocation67_spill] sm:$0xff]  ;;  %v8750_v28 = vmov 0 }
 0x3b2   : > { %vm6914_vm9 = vmand %vm8692_vm5, %vm8691_vm1  ;;  %vm2483_vm1 = vcmp.lt.s32.totalorder %v2446_v38, %v6038_v10  ;;  %v2453_v38 = vadd.s32 112, %v8330_v51 }
 0x3b3   : > { %v8694_v40 = vsel %vm6914_vm9, 4294967295, %v8693_v40  ;;  %vm2211_vm14 = vmor %vm8695_vm6, %vm2195_vm15  ;;  %vm819_vm6 = vcmp.le.f32.partialorder %v8254_v24, %v8700_v49  ;;  %v8791_v49 = vld [vmem:[#allocation121_spill] sm:$0xff]  ;;  %v8798_v24 = vld [vmem:[#allocation88_spill] sm:$0xff] }
 0x3b4   : > { %vm2291_vm3 = vmand %vm8696_vm12, %vm2275_vm2  ;;  %vm8703_vm2 = vnez %v8655_v53  ;;  %vm735_vm12 = vcmp.le.f32.partialorder %v8704_v37, %v8251_v2  ;;  %v8715_v2 = vld [vmem:[#allocation102_spill] sm:$0xff]  ;;  %v2450_v53 = vadd.s32 88, %v8330_v51 }
 0x3b5   : > { %vm6926_vm10 = vmand %vm2133_vm11, %vm2149_vm4 }
 0x3b6   : > { %v8698_v16 = vsel %vm6926_vm10, 4294967295, %v8697_v16  ;;  %vm2307_vm5 = vmor %vm2211_vm14, %vm2291_vm3  ;;  %vm8705_vm3 = vcmp.lt.s32.totalorder %v6038_v10, 64  ;;  %vm8707_vm10 = vnez %v8632_v39  ;;  %v8733_v39 = vld [vmem:[#allocation118_spill] sm:$0xff] }
 0x3b7   : > { %vm2323_vm15 = vmxor %vm2307_vm5, %vm8699_vm7  ;;  %vm2085_vm5 = vcmp.eq.f32.partialorder %v2050_v47, %v3747_v22  ;;  %vm8706_vm7 = vnez %v8660_v15  ;;  %v8766_v15 = vld [vmem:[#allocation120_spill] sm:$0xff] }
 0x3b8   : > { %vm6935_vm9 = vmand %vm2229_vm13, %vm2245_vm8  ;;  %vm8708_vm13 = vnez %v8599_v31 }
 0x3b9   : > { %v8702_v44 = vsel %vm6935_vm9, 4294967295, %v8701_v44  ;;  %vm2339_vm11 = vmand %vm8703_vm2, %vm2323_vm15  ;;  %vm2486_vm15 = vcmp.lt.s32.totalorder %v2449_v20, %v6038_v10  ;;  %vm8714_vm2 = vnez %v8671_v8  ;;  %v2066_v8 = vpop.permute.xlu1 %2065 }
 0x3ba   : > { %vm2499_vm4 = vmand %vm2339_vm11, %vm2483_vm1 }
 0x3bb   : > { %vm2516_vm14 = vmand %vm2499_vm4, %vm8705_vm3  ;;  %vm1991_vm3 = vcmp.eq.f32.partialorder %v8716_v26, %v3633_v13 }
 0x3bc   : > { %vm8709_vm8 = vmand %vm8707_vm10, %vm8708_vm13  ;;  %vm8721_vm10 = vnez %v8694_v40 }
 0x3bd   : > { %vm6953_vm9 = vmand %vm8709_vm8, %vm8706_vm7  ;;  %vm8717_vm7 = vnez %v8658_v27  ;;  %v8764_v27 = vld [vmem:[#allocation119_spill] sm:$0xff] }
 0x3be   : > { %vm6957_vm1 = vmand %vm735_vm12, %vm819_vm6  ;;  %vm8718_vm6 = vnez %v8603_v9  ;;  %v8724_v9 = vmov 0 }
 0x3bf   : > { %v8713_v36 = vsel %vm6957_vm1, 4294967295, %v8712_v36  ;;  %vm2529_vm11 = vmpackc.low %vm2516_vm14, %vm8714_vm2  ;;  %vm8720_vm1 = vnez %v8667_v62  ;;  %vm8726_vm14 = vnez %v8636_v30  ;;  %vm8727_vm2 = vnez %v8625_v23  ;;  %v8816_v23 = vld [vmem:[#allocation86_spill] sm:$0xff] }
 0x3c0   : > { %vm8719_vm12 = vmpackc.low %vm8717_vm7, %vm8718_vm6  ;;  %vm2277_vm7 = vcmp.eq.f32.partialorder %v2050_v47, %v3760_v18  ;;  %vm8723_vm6 = vnez %v8683_v25  ;;  %v8774_v62 = vmov 0  ;;  %v8785_v25 = vld [vmem:[#allocation84_spill] sm:$0xff] }
 0x3c1   : > { %vm2530_vm13 = vmpackc.even %vm2529_vm11, %vm8719_vm12  ;;  %vm8722_vm11 = vcmp.lt.s32.totalorder %v6038_v10, 64 }
 0x3c2   : > { %v2538_v31 = vsel %vm2530_vm13, 16843009, %v8593_v59  ;;  %vm2101_vm4 = vmand %vm8721_vm10, %vm2085_vm5  ;;  %vm8732_vm5 = vnez %v8731_v50  ;;  %vm8734_vm10 = vnez %v8733_v39  ;;  %v8810_v50 = vld [vmem:[#allocation96_spill] sm:$0xff]  ;;  %v8812_v39 = vmov 0 }
 0x3c3   : > { %vm6991_vm12 = vmand %vm8723_vm6, %vm8722_vm11  ;;  %v2545_v1 = vunpack.c.0.s8 %v2538_v31  ;;  %v2546_v4 = vunpack.c.1.s8 %v2538_v31  ;;  %v2547_v35 = vunpack.c.2.s8 %v2538_v31  ;;  %v2548_v33 = vunpack.c.3.s8 %v2538_v31 }
 0x3c4   : > { %v8725_v9 = vsel %vm6991_vm12, 4294967295, %v8724_v9  ;;  %vm8728_vm13 = vmand %vm8726_vm14, %vm8727_vm2 }
 0x3c5   : > { %vm7000_vm8 = vmand %vm8728_vm13, %vm2486_vm15  ;;  %vm8738_vm15 = vcmp.eq.f32.partialorder %v8715_v2, %v3640_v43  ;;  %v2565_v42 = vpack.c.b16 %v2545_v1, %v2545_v1  ;;  %v2567_v29 = vpack.c.b16 %v2546_v4, %v2546_v4  ;;  %v2569_v19 = vpack.c.b16 %v2547_v35, %v2547_v35 }
 0x3c6   : > { %vm8735_vm11 = vmor %vm8732_vm5, %vm8734_vm10  ;;  %vm8742_vm5 = vnez %v8698_v16  ;;  %v2571_v30 = vpack.c.b16 %v2548_v33, %v2548_v33  ;;  %v8807_v33 = vld [vmem:[#allocation79_spill] sm:$0xff] }
 0x3c7   : > { %vm7009_vm6 = vmor %vm8735_vm11, %vm2101_vm4  ;;  %vm8741_vm4 = vcmp.eq.f32.partialorder %v2050_v47, %v3743_v14  ;;  %vm8743_vm11 = vcmp.eq.f32.partialorder %v8716_v26, %v3630_v5  ;;  %v2566_v7 = vpack.c.b8 %v2565_v42, %v2565_v42  ;;  %v2568_v3 = vpack.c.b8 %v2567_v29, %v2567_v29 }
 0x3c8   : > { %vm7021_vm2 = vmand %vm8738_vm15, %vm1991_vm3  ;;  %vm8744_vm15 = vcmp.eq.f32.partialorder %v8715_v2, %v3644_v0  ;;  %v2570_v54 = vpack.c.b8 %v2569_v19, %v2569_v19  ;;  %v2572_v17 = vpack.c.b8 %v2571_v30, %v2571_v30 }
 0x3c9   : > { %vm2197_vm10 = vmand %vm8742_vm5, %vm8741_vm4  ;;  %vm8747_vm5 = vnez %v8702_v44  ;;  %vm8752_vm4 = vmmov 1   ;;  %2593 = vst [vmem:[%s6778_s24 + $0x8] sm:$0x3] %v2566_v7  ;;  %v8793_v44 = vld [vmem:[#allocation122_spill] sm:$0xff] }
 0x3ca   : > { %vm2213_vm3 = vmor %vm7009_vm6, %vm2197_vm10  ;;  %vm8748_vm10 = vcmp.eq.f32.partialorder %v8716_v26, %v3637_v41  ;;  %2594 = vst [vmem:[%s6778_s24 + $0xa] sm:$0x3] %v2568_v3 }
 0x3cb   : > { %vm7039_vm14 = vmand %vm8744_vm15, %vm8743_vm11  ;;  %vm8749_vm11 = vcmp.eq.f32.partialorder %v8715_v2, %v3649_v6  ;;  %2595 = vst [vmem:[%s6778_s24 + $0xc] sm:$0x3] %v2570_v54 }
 0x3cc   : > { %v8746_v21 = vsel %vm7039_vm14, 4294967295, %v8745_v21  ;;  %vm2293_vm13 = vmand %vm8747_vm5, %vm2277_vm7  ;;  %2596 = vst [vmem:[%s6778_s24 + $0xe] sm:$0x3] %v2572_v17  ;;  %vm2087_vm14 = vcmp.eq.f32.partialorder %v2058_v12, %v3747_v22 }
 0x3cd   : > { %vm2309_vm6 = vmor %vm2213_vm3, %vm2293_vm13  ;;  %vm8753_vm3 = vcmp.lt.s32.totalorder %v2448_v56, %v6038_v10  ;;  %v8800_v56 = vld [vmem:[#allocation92_spill] sm:$0xff] }
 0x3ce   : > { %vm7054_vm15 = vmand %vm8749_vm11, %vm8748_vm10  ;;  %vm8754_vm10 = vnez %v8713_v36 }
 0x3cf   : > { %v8751_v28 = vsel %vm7054_vm15, 4294967295, %v8750_v28  ;;  %vm2325_vm7 = vmxor %vm2309_vm6, %vm8752_vm4  ;;  %vm8758_vm4 = vcmp.lt.s32.totalorder %v6038_v10, 64 }
 0x3d0   : > { %vm2341_vm13 = vmand %vm6953_vm9, %vm2325_vm7  ;;  %vm2488_vm9 = vcmp.lt.s32.totalorder %v2451_v58, %v6038_v10  ;;  %vm2279_vm7 = vcmp.eq.f32.partialorder %v2058_v12, %v3760_v18 }
 0x3d1   : > { %vm2501_vm5 = vmand %vm2341_vm13, %vm8753_vm3  ;;  %vm2183_vm13 = vcmp.eq.f32.partialorder %v2058_v12, %v3743_v14  ;;  %vm8765_vm3 = vnez %v8764_v27 }
 0x3d2   : > { %vm8755_vm11 = vmand %vm6904_vm0, %vm8720_vm1 }
 0x3d3   : > { %vm7076_vm6 = vmand %vm8755_vm11, %vm8754_vm10 }
 0x3d4   : > { %v8757_v34 = vsel %vm7076_vm6, 4294967295, %v8756_v34  ;;  %vm7082_vm15 = vmand %vm2501_vm5, %vm8758_vm4  ;;  %vm8767_vm5 = vnez %v8766_v15  ;;  %vm8777_vm6 = vnez %v8751_v28 }
 0x3d5   : > { %v8760_v11 = vsel %vm7082_vm15, 4294967295, %v8759_v11  ;;  %vm2103_vm0 = vmand %vm7021_vm2, %vm2087_vm14  ;;  %vm8770_vm14 = vnez %v8769_v63  ;;  %vm8772_vm2 = vnez %v8771_v45 }
 0x3d6   : > { %vm8761_vm1 = vmmov %vm8758_vm4 }
 0x3d7   : > { %vm7098_vm4 = vmand %vm7000_vm8, %vm8761_vm1  ;;  %vm8776_vm8 = vnez %v8746_v21 }
 0x3d8   : > { %v8763_v48 = vsel %vm7098_vm4, 4294967295, %v8762_v48  ;;  %vm8768_vm10 = vmor %vm8765_vm3, %vm8767_vm5 }
 0x3d9   : > { %vm2119_vm11 = vmor %vm8768_vm10, %vm2103_vm0  ;;  %vm2487_vm0 = vcmp.lt.s32.totalorder %v2450_v53, %v6038_v10  ;;  %vm8778_vm10 = vmmov 1  }
 0x3da   : > { %vm8773_vm12 = vmand %vm8770_vm14, %vm8772_vm2  ;;  %vm8779_vm14 = vnez %v8757_v34 }
 0x3db   : > { %vm7114_vm15 = vmand %vm8773_vm12, %vm2488_vm9 }
 0x3dc   : > { %v8775_v62 = vsel %vm7114_vm15, 4294967295, %v8774_v62  ;;  %vm2199_vm1 = vmand %vm8776_vm8, %vm2183_vm13  ;;  %vm8780_vm15 = vcmp.lt.s32.totalorder %v6038_v10, 64  ;;  %vm2089_vm13 = vcmp.eq.f32.partialorder %v2066_v8, %v3747_v22 }
 0x3dd   : > { %vm2215_vm4 = vmor %vm2119_vm11, %vm2199_vm1  ;;  %vm8781_vm11 = vnez %v8763_v48 }
 0x3de   : > { %vm2295_vm3 = vmand %vm8777_vm6, %vm2279_vm7  ;;  %vm8782_vm7 = vnez %v8760_v11 }
 0x3df   : > { %vm2311_vm5 = vmor %vm2215_vm4, %vm2295_vm3  ;;  %vm8783_vm4 = vnez %v8725_v9 }
 0x3e0   : > { %vm2327_vm2 = vmxor %vm2311_vm5, %vm8778_vm10  ;;  %vm2185_vm5 = vcmp.eq.f32.partialorder %v2066_v8, %v3743_v14 }
 0x3e1   : > { %vm2343_vm9 = vmand %vm8779_vm14, %vm2327_vm2  ;;  %vm2281_vm2 = vcmp.eq.f32.partialorder %v2066_v8, %v3760_v18  ;;  %vm8787_vm14 = vcmp.lt.s32.totalorder %v6038_v10, 64 }
 0x3e2   : > { %vm2503_vm12 = vmand %vm2343_vm9, %vm2487_vm0  ;;  %vm8788_vm9 = vnez %v8775_v62 }
 0x3e3   : > { %vm2520_vm8 = vmand %vm2503_vm12, %vm8780_vm15  ;;  %vm8786_vm15 = vnez %v8785_v25 }
 0x3e4   : > { %vm2532_vm6 = vmpackc.low %vm2520_vm8, %vm8781_vm11  ;;  %vm8792_vm8 = vnez %v8791_v49  ;;  %vm8794_vm11 = vnez %v8793_v44 }
 0x3e5   : > { %vm8784_vm1 = vmpackc.low %vm8782_vm7, %vm8783_vm4  ;;  %vm2490_vm7 = vcmp.lt.s32.totalorder %v2453_v38, %v6038_v10  ;;  %vm8799_vm4 = vnez %v8798_v24 }
 0x3e6   : > { %vm2533_vm3 = vmpackc.even %vm2532_vm6, %vm8784_vm1 }
 0x3e7   : > { %v2539_v55 = vsel %vm2533_vm3, 16843009, %v8593_v59  ;;  %vm2105_vm0 = vmand %vm8786_vm15, %vm2089_vm13  ;;  %vm2489_vm15 = vcmp.lt.s32.totalorder %v2452_v61, %v6038_v10 }
 0x3e8   : > { %vm7147_vm12 = vmand %vm8788_vm9, %vm8787_vm14  ;;  %v2549_v40 = vunpack.c.0.s8 %v2539_v55  ;;  %v2550_v16 = vunpack.c.1.s8 %v2539_v55  ;;  %v2551_v20 = vunpack.c.2.s8 %v2539_v55  ;;  %v2552_v47 = vunpack.c.3.s8 %v2539_v55 }
 0x3e9   : > { %v8790_v52 = vsel %vm7147_vm12, 4294967295, %v8789_v52  ;;  %vm8795_vm6 = vmor %vm8792_vm8, %vm8794_vm11  ;;  %vm8802_vm9 = vnez %v8357_v60  ;;  %v8809_v60 = vld [vmem:[#allocation95_spill] sm:$0xff]  ;;  %vm2251_vm12 = vcmp.eq.f32.partialorder %v8810_v50, %v3637_v41  ;;  %v8822_v41 = vld [vmem:[#allocation81_spill] sm:$0xff] }
 0x3ea   : > { %vm7156_vm13 = vmor %vm8795_vm6, %vm2105_vm0  ;;  %v2573_v36 = vpack.c.b16 %v2549_v40, %v2549_v40  ;;  %v2575_v2 = vpack.c.b16 %v2550_v16, %v2550_v16  ;;  %v2577_v26 = vpack.c.b16 %v2551_v20, %v2551_v20  ;;  %v2579_v31 = vpack.c.b16 %v2552_v47, %v2552_v47 }
 0x3eb   : > { %vm2201_vm1 = vmand %vm8799_vm4, %vm2185_vm5  ;;  %vm8801_vm0 = vnez %v8800_v56  ;;  %vm8803_vm5 = vnez %v8355_v57  ;;  %v2074_v57 = vpop.permute.xlu1 %2073 }
 0x3ec   : > { %vm2217_vm3 = vmor %vm7156_vm13, %vm2201_vm1  ;;  %v2574_v46 = vpack.c.b8 %v2573_v36, %v2573_v36  ;;  %v2576_v1 = vpack.c.b8 %v2575_v2, %v2575_v2  ;;  %v2578_v4 = vpack.c.b8 %v2577_v26, %v2577_v26  ;;  %v2580_v35 = vpack.c.b8 %v2579_v31, %v2579_v31 }
 0x3ed   : > { %vm2297_vm14 = vmand %vm8801_vm0, %vm2281_vm2  ;;  %vm8808_vm2 = vnez %v8807_v33  ;;  %vm1915_vm1 = vcmp.eq.f32.partialorder %v8809_v60, %v3640_v43  ;;  %vm1995_vm0 = vcmp.eq.f32.partialorder %v8810_v50, %v3633_v13  ;;  %v8819_v43 = vmov 0 }
 0x3ee   : > { %vm8804_vm8 = vmand %vm8802_vm9, %vm8803_vm5  ;;  %2597 = vst [vmem:[%s6778_s24 + $0x10] sm:$0x3] %v2574_v46  ;;  %vm2091_vm5 = vcmp.eq.f32.partialorder %v2074_v57, %v3747_v22  ;;  %vm2235_vm9 = vcmp.eq.f32.partialorder %v8809_v60, %v3649_v6 }
 0x3ef   : > { %vm7175_vm11 = vmand %vm8804_vm8, %vm2490_vm7  ;;  %2598 = vst [vmem:[%s6778_s24 + $0x12] sm:$0x3] %v2576_v1  ;;  %vm8817_vm8 = vnez %v8816_v23 }
 0x3f0   : > { %vm2313_vm6 = vmor %vm2217_vm3, %vm2297_vm14  ;;  %2599 = vst [vmem:[%s6778_s24 + $0x14] sm:$0x3] %v2578_v4  ;;  %vm8811_vm3 = vcmp.lt.s32.totalorder %v6038_v10, 64 }
 0x3f1   : > { %vm2329_vm13 = vmxor %vm2313_vm6, %vm8778_vm10  ;;  %2600 = vst [vmem:[%s6778_s24 + $0x16] sm:$0x3] %v2580_v35 }
 0x3f2   : > { %vm2345_vm4 = vmand %vm8808_vm2, %vm2329_vm13  ;;  %vm2139_vm13 = vcmp.eq.f32.partialorder %v8809_v60, %v3644_v0  ;;  %vm2155_vm2 = vcmp.eq.f32.partialorder %v8810_v50, %v3630_v5  ;;  %v2454_v0 = vadd.s32 120, %v8330_v51 }
 0x3f3   : > { %vm2505_vm7 = vmand %vm2345_vm4, %vm2489_vm15  ;;  %vm8815_vm15 = vnez %v8814_v32 }
 0x3f4   : > { %vm7194_vm14 = vmand %vm2505_vm7, %vm8811_vm3  ;;  %vm2187_vm3 = vcmp.eq.f32.partialorder %v2074_v57, %v3743_v14 }
 0x3f5   : > { %v8813_v39 = vsel %vm7194_vm14, 4294967295, %v8812_v39  ;;  %vm1835_vm6 = vmor %vm8817_vm8, %vm8815_vm15  ;;  %vm8818_vm15 = vcmp.lt.s32.totalorder %v6038_v10, 64 }
 0x3f6   : > { %vm2011_vm4 = vmand %vm1915_vm1, %vm1995_vm0  ;;  %vm2283_vm0 = vcmp.eq.f32.partialorder %v2074_v57, %v3760_v18 }
 0x3f7   : > { %vm2107_vm7 = vmand %vm2011_vm4, %vm2091_vm5 }
 0x3f8   : > { %vm2123_vm10 = vmor %vm1835_vm6, %vm2107_vm7  ;;  %vm2491_vm7 = vcmp.lt.s32.totalorder %v2454_v0, %v6038_v10 }
 0x3f9   : > { %vm2171_vm14 = vmand %vm2139_vm13, %vm2155_vm2  ;;  %vm8821_vm13 = vmmov 1  }
 0x3fa   : > { %vm7220_vm8 = vmand %vm7175_vm11, %vm8818_vm15  ;;  %vm8823_vm15 = vnez %v8822_v41 }
 0x3fb   : > { %v8820_v43 = vsel %vm7220_vm8, 4294967295, %v8819_v43  ;;  %vm2203_vm1 = vmand %vm2171_vm14, %vm2187_vm3  ;;  %vm8824_vm14 = vcmp.lt.s32.totalorder %v6038_v10, 64 }
 0x3fc   : > { %vm2219_vm5 = vmor %vm2123_vm10, %vm2203_vm1  ;;  %vm8825_vm10 = vnez %v8820_v43 }
 0x3fd   : > { %vm2267_vm6 = vmand %vm2235_vm9, %vm2251_vm12  ;;  %vm8826_vm12 = vnez %v8813_v39 }
 0x3fe   : > { %vm2299_vm4 = vmand %vm2267_vm6, %vm2283_vm0  ;;  %vm8827_vm0 = vnez %v8790_v52 }
 0x3ff   : > { %vm2315_vm2 = vmor %vm2219_vm5, %vm2299_vm4 }
 0x400   : > { %vm2331_vm11 = vmxor %vm2315_vm2, %vm8821_vm13 }
 0x401   : > { %vm2347_vm8 = vmand %vm8823_vm15, %vm2331_vm11 }
 0x402   : > { %vm2507_vm3 = vmand %vm2347_vm8, %vm2491_vm7 }
 0x403   : > { %vm2524_vm1 = vmand %vm2507_vm3, %vm8824_vm14 }
 0x404   : > { %vm2535_vm9 = vmpackc.low %vm2524_vm1, %vm8825_vm10 }
 0x405   : > { %vm8828_vm6 = vmpackc.low %vm8826_vm12, %vm8827_vm0 }
 0x406   : > { %vm2536_vm5 = vmpackc.even %vm2535_vm9, %vm8828_vm6 }
 0x407   : > { %v2540_v5 = vsel %vm2536_vm5, 16843009, %v8593_v59 }
 0x408   : > { %v2553_v13 = vunpack.c.0.s8 %v2540_v5  ;;  %v2554_v6 = vunpack.c.1.s8 %v2540_v5  ;;  %v2555_v22 = vunpack.c.2.s8 %v2540_v5  ;;  %v2556_v14 = vunpack.c.3.s8 %v2540_v5 }
 0x40a   : > { %v2581_v18 = vpack.c.b16 %v2553_v13, %v2553_v13  ;;  %v2583_v10 = vpack.c.b16 %v2554_v6, %v2554_v6  ;;  %v2585_v51 = vpack.c.b16 %v2555_v22, %v2555_v22  ;;  %v2587_v42 = vpack.c.b16 %v2556_v14, %v2556_v14 }
 0x40c   : > { %v2582_v29 = vpack.c.b8 %v2581_v18, %v2581_v18  ;;  %v2584_v19 = vpack.c.b8 %v2583_v10, %v2583_v10  ;;  %v2586_v30 = vpack.c.b8 %v2585_v51, %v2585_v51  ;;  %v2588_v21 = vpack.c.b8 %v2587_v42, %v2587_v42 }
 0x40e   : > { %2601 = vst [vmem:[%s6778_s24 + $0x18] sm:$0x3] %v2582_v29  ;;  %2602 = vst [vmem:[%s6778_s24 + $0x1a] sm:$0x3] %v2584_v19 }
 0x40f   : > { %2603 = vst [vmem:[%s6778_s24 + $0x1c] sm:$0x3] %v2586_v30  ;;  %2604 = vst [vmem:[%s6778_s24 + $0x1e] sm:$0x3] %v2588_v21 }
 0x410 PF: > { %s12_s11 = sadd.s32 1, %s2866_s11   ;;  %s8829_s9 = smov %s2862_s10 }
 0x411   : > { %p9_p5 = scmp.ge.s32.totalorder %s12_s11, 4   ;;  %s8830_s10 = smov %s8832_s12 }
 0x413   :  { %11 = sbr.rel (!%p9_p5) target bundleno = 2 (0x2), region = 77 }

</bundles_post_ra>
